<compile_context>
chip_gen: v5e
topology: v5e:2x2
jax: 0.10.0
libtpu: 0.0.40
codegen_flags: <defaults>
</compile_context>

<pallas_src>
import functools

import jax
import jax.numpy as jnp
from jax.experimental import pallas as pl
from jax.experimental.pallas import tpu as pltpu


# ----------------------------- fused Pallas kernel -----------------------------

def _vgd_gnn_fused_kernel(a_ref, x_ref, gidc_ref, gidr_ref, bidx_ref,
                          w0_ref, b0_ref, wh_ref, bh_ref, p_ref,
                          w1a_ref, w1b_ref, b1_ref, w2_ref, b2_ref, w3_ref, b3_ref,
                          o_ref, *, layer_num, ratio, num_graphs):
    f32 = jnp.float32
    bf16 = jnp.bfloat16
    BIG = jnp.float32(1e30)

    A = a_ref[0]                            # [N,N] bf16, 0/1 adjacency (no self loops)
    h = x_ref[0]                            # [N,Fin] f32
    gid_c = gidc_ref[0]                     # [N,1] int32 graph id per node (column layout)
    gid_r = gidr_ref[0]                     # [1,N] int32 graph id per node (row layout)
    b_idx = bidx_ref[...]                   # [B,1,1] int32 graph index constant
    N = A.shape[0]
    B = num_graphs
    H = w0_ref.shape[1]

    # --- one-time masks / membership (resident for the whole forward, built from tiny inputs) ---
    ri = jax.lax.broadcasted_iota(jnp.int32, (N, N), 0)
    ci = jax.lax.broadcasted_iota(jnp.int32, (N, N), 1)
    eye_b = ri == ci                        # diagonal mask (bool; no f32 [N,N] eye kept around)
    lower = ci < ri                         # tie-break: smaller index ranks first
    sg_bf = (gid_c == gid_r).astype(bf16)   # [N,N] same-graph mask (0/1 exact in bf16, MXU operand)
    ones_row = jnp.ones((1, N), f32)
    b_row = jax.lax.broadcasted_iota(jnp.int32, (B, N), 0)
    S = (b_row == gid_r).astype(f32)        # [B,N] one-hot graph membership (MXU operand)
    s_add = jnp.where(b_idx == gid_c[None, :, :], jnp.float32(0.0), -BIG)   # [B,N,1] additive mask

    mcol = jnp.ones((N, 1), f32)            # active-node mask (column layout)
    gmp_acc = jnp.zeros((B, H), f32)
    gap_acc = jnp.zeros((B, H), f32)

    for layer in range(layer_num):          # static unroll, layer_num is small
        if layer == 0:
            W = w0_ref[...]                 # [Fin,H]
            bias = b0_ref[...]              # [1,H]
        else:
            W = wh_ref[layer - 1]           # [H,H]
            bias = bh_ref[layer - 1]        # [1,H]
        p_hat = p_ref[layer]                # [H,1], pre-normalized in the wrapper

        mcol_bf = mcol.astype(bf16)

        # ---- GCNConv (sym-norm, self-loop folded analytically) + ReLU + node mask ----
        #   deg = m*(A@m + 1);  h' = relu(dinv*(A@(dinv*xW)) + dinv^2*xW + b) * m
        deg = mcol * (jnp.dot(A, mcol_bf, preferred_element_type=f32) + 1.0)      # [N,1]
        dinv = jnp.where(deg > 0, jax.lax.rsqrt(jnp.maximum(deg, 1e-12)), 0.0)
        xw = jnp.dot(h, W, preferred_element_type=f32)                            # [N,H]
        agg = jnp.dot(A, (dinv * xw).astype(bf16), preferred_element_type=f32)    # bf16 MXU path
        h = jnp.maximum(dinv * agg + (dinv * dinv) * xw + bias, 0.0) * mcol

        # ---- TopKPooling: score = tanh(h @ p_hat); keep top ceil(ratio*n_g) per graph ----
        score = jnp.tanh(jnp.dot(h, p_hat, preferred_element_type=f32))           # [N,1]
        # column -> row relayout of the scores via an identity matmul (exact, on the MXU)
        score_r = jnp.dot(ones_row, jnp.where(eye_b, score, 0.0),
                          preferred_element_type=f32)                             # [1,N]
        better = (score_r > score) | ((score_r == score) & lower)                 # [N,N] bool
        masked_better = jnp.where(better, sg_bf, jnp.zeros_like(sg_bf))           # [N,N] bf16
        rank = jnp.dot(masked_better, mcol_bf, preferred_element_type=f32)        # [N,1]
        cnt_node = jnp.dot(sg_bf, mcol_bf, preferred_element_type=f32)            # active in my graph
        keep = mcol * (rank < jnp.ceil(ratio * cnt_node)).astype(f32)             # [N,1]
        h = h * (score * keep)                                                    # kept feats * score
        mcol = keep

        # ---- readout: [global_max_pool, global_mean_pool], accumulated across layers ----
        cnt = jnp.dot(S, keep, preferred_element_type=f32)                        # [B,1] kept per graph
        gap = jnp.dot(S, h, preferred_element_type=f32) / jnp.maximum(cnt, 1.0)   # exact mean
        hk = h + (keep - 1.0) * BIG                                               # dropped rows -> -1e30
        gmp_raw = jnp.max(hk[None, :, :] + s_add, axis=1)                         # [B,H] segment max
        gmp = jnp.where(cnt > 0.0, gmp_raw, 0.0)                                  # empty graph -> 0
        gmp_acc = gmp_acc + gmp
        gap_acc = gap_acc + gap

    # ---- classifier head: lin1 -> relu -> lin2 -> relu -> lin3 -> log_softmax ----
    # TODO(synk): dropout1/dropout2 are identity (inference/eval mode); classifier activation
    # fixed to ReLU (config.classifier.activation == 'relu').
    h1 = jnp.maximum(jnp.dot(gmp_acc, w1a_ref[...], preferred_element_type=f32) +
                     jnp.dot(gap_acc, w1b_ref[...], preferred_element_type=f32) + b1_ref[...], 0.0)
    h2 = jnp.maximum(jnp.dot(h1, w2_ref[...], preferred_element_type=f32) + b2_ref[...], 0.0)
    z = jnp.dot(h2, w3_ref[...], preferred_element_type=f32) + b3_ref[...]        # [B,2]
    zs = z - jnp.max(z, axis=-1, keepdims=True)
    o_ref[0] = zs - jnp.log(jnp.sum(jnp.exp(zs), axis=-1, keepdims=True))


# ----------------------------- pallas_call wrapper -----------------------------

def _pb_spec(shape):
    """Per-graph-batch input: leading dim indexed by the parallel grid axis, rest full-extent."""
    nd = len(shape)
    return pl.BlockSpec((1,) + tuple(shape[1:]),
                        lambda g, _nd=nd: (g,) + (0,) * (_nd - 1))


def _shared_spec(shape):
    """Weights / constants shared by all grid steps."""
    nd = len(shape)
    return pl.BlockSpec(tuple(shape), lambda g, _nd=nd: (0,) * _nd)


def vgd_gnn_forward(params, A, x, batch_ids, num_graphs, layer_num, ratio):
    """A: [G,N,N] dense 0/1 adjacency per graph-batch, x: [G,N,Fin], batch_ids: [G,N] int."""
    G, N, _ = A.shape
    H = params["gcl_w"][0].shape[1]

    A_bf = A.astype(jnp.bfloat16)                                # exact for 0/1 values, half the DMA
    gid_c = batch_ids.astype(jnp.int32)[:, :, None]              # [G,N,1]
    gid_r = batch_ids.astype(jnp.int32)[:, None, :]              # [G,1,N]
    b_idx = jnp.arange(num_graphs, dtype=jnp.int32).reshape(num_graphs, 1, 1)

    w0 = params["gcl_w"][0]                                      # [Fin,H]
    b0 = params["gcl_b"][0].reshape(1, H)
    if layer_num > 1:
        wh = jnp.stack(params["gcl_w"][1:])                                  # [L-1,H,H]
        bh = jnp.stack([b.reshape(1, H) for b in params["gcl_b"][1:]])       # [L-1,1,H]
    else:
        wh = jnp.zeros((1, H, H), jnp.float32)                               # unused dummy
        bh = jnp.zeros((1, 1, H), jnp.float32)
    # TopK score weights pre-normalized on the host: p_hat = p / ||p||
    p_hat = jnp.stack([(p / jnp.maximum(jnp.linalg.norm(p), 1e-12)).reshape(H, 1)
                       for p in params["gpl_p"]])                            # [L,H,1]
    w1a = params["w1"][:H]                                       # rows multiplying the gmp half
    w1b = params["w1"][H:]                                       # rows multiplying the gap half
    b1 = params["b1"].reshape(1, -1)
    w2, b2 = params["w2"], params["b2"].reshape(1, -1)
    w3, b3 = params["w3"], params["b3"].reshape(1, -1)
    C = w3.shape[1]

    per_batch = (A_bf, x.astype(jnp.float32), gid_c, gid_r)
    shared = (b_idx, w0, b0, wh, bh, p_hat, w1a, w1b, b1, w2, b2, w3, b3)

    kernel = functools.partial(_vgd_gnn_fused_kernel, layer_num=layer_num,
                               ratio=ratio, num_graphs=num_graphs)
    return pl.pallas_call(
        kernel,
        grid=(G,),
        in_specs=[_pb_spec(a.shape) for a in per_batch] + [_shared_spec(a.shape) for a in shared],
        out_specs=_pb_spec((G, num_graphs, C)),
        out_shape=jax.ShapeDtypeStruct((G, num_graphs, C), jnp.float32),
        compiler_params=pltpu.CompilerParams(dimension_semantics=("parallel",)),
        # NOTE: at these sizes default scoped-VMEM limits are ample; when scaling N toward ~1K
        # set vmem_limit_bytes here (dense-[N,N] design vs v7x's 64 MiB physical VMEM).
    )(*per_batch, *shared)


# ----------------------------- main -----------------------------

if __name__ == "__main__":
    # config (DictConfig equivalent)
    FIN = 16          # hyper_parameters.vector_length
    H = 32            # gnn.hidden_size
    LAYER_NUM = 2     # gnn.layer_num
    RATIO = 0.8       # gnn.pooling_ratio
    B = 2             # graphs per batch
    N = 64            # nodes per batch (32 per graph)
    G = 2             # independent graph-batches per pallas_call (parallel grid axis)

    key = jax.random.PRNGKey(0)
    keys = jax.random.split(key, 16)

    # deterministic synthetic parameters
    params = {
        "gcl_w": [0.1 * jax.random.normal(keys[0], (FIN, H), jnp.float32),
                  0.1 * jax.random.normal(keys[1], (H, H), jnp.float32)],
        "gcl_b": [0.05 * jax.random.normal(keys[2], (H,), jnp.float32),
                  0.05 * jax.random.normal(keys[3], (H,), jnp.float32)],
        "gpl_p": [jax.random.normal(keys[4], (H, 1), jnp.float32),
                  jax.random.normal(keys[5], (H, 1), jnp.float32)],
        "w1": 0.1 * jax.random.normal(keys[6], (2 * H, H), jnp.float32),
        "b1": 0.05 * jax.random.normal(keys[7], (H,), jnp.float32),
        "w2": 0.1 * jax.random.normal(keys[8], (H, H // 2), jnp.float32),
        "b2": 0.05 * jax.random.normal(keys[9], (H // 2,), jnp.float32),
        "w3": 0.1 * jax.random.normal(keys[10], (H // 2, 2), jnp.float32),
        "b3": 0.05 * jax.random.normal(keys[11], (2,), jnp.float32),
    }

    # deterministic synthetic inputs: node features, per-graph random adjacency, batch vector
    x = jax.random.normal(keys[12], (G, N, FIN), jnp.float32)
    batch_ids = jnp.broadcast_to(
        jnp.concatenate([jnp.zeros((N // 2,), jnp.int32), jnp.ones((N - N // 2,), jnp.int32)]),
        (G, N))
    rnd = jax.random.uniform(keys[13], (G, N, N))
    upper = rnd < 0.15
    adj = jnp.logical_or(upper, jnp.swapaxes(upper, 1, 2))
    same_graph = batch_ids[:, :, None] == batch_ids[:, None, :]
    no_diag = ~jnp.eye(N, dtype=bool)[None, :, :]
    A = (adj & same_graph & no_diag).astype(jnp.float32)        # symmetric, block-diagonal, no diag

    log_probs = vgd_gnn_forward(params, A, x, batch_ids, B, LAYER_NUM, RATIO)
    log_probs = jax.block_until_ready(log_probs)
    assert log_probs.shape == (G, B, 2)
    assert bool(jnp.all(jnp.isfinite(log_probs)))
    assert bool(jnp.allclose(jnp.sum(jnp.exp(log_probs), axis=-1), 1.0, atol=1e-3))
    print("KERNEL_OK")
</pallas_src>

<mosaic_0001>
module attributes {stable_mosaic.version = 11 : i64} {
  func.func @_vgd_gnn_fused_kernel(%arg0: i32, %arg1: memref<1x64x64xbf16, #tpu.memory_space<vmem>>, %arg2: memref<1x64x16xf32, #tpu.memory_space<vmem>>, %arg3: memref<1x64x1xi32, #tpu.memory_space<vmem>>, %arg4: memref<1x1x64xi32, #tpu.memory_space<vmem>>, %arg5: memref<2x1x1xi32, #tpu.memory_space<vmem>>, %arg6: memref<16x32xf32, #tpu.memory_space<vmem>>, %arg7: memref<1x32xf32, #tpu.memory_space<vmem>>, %arg8: memref<1x32x32xf32, #tpu.memory_space<vmem>>, %arg9: memref<1x1x32xf32, #tpu.memory_space<vmem>>, %arg10: memref<2x32x1xf32, #tpu.memory_space<vmem>>, %arg11: memref<32x32xf32, #tpu.memory_space<vmem>>, %arg12: memref<32x32xf32, #tpu.memory_space<vmem>>, %arg13: memref<1x32xf32, #tpu.memory_space<vmem>>, %arg14: memref<32x16xf32, #tpu.memory_space<vmem>>, %arg15: memref<1x16xf32, #tpu.memory_space<vmem>>, %arg16: memref<16x2xf32, #tpu.memory_space<vmem>>, %arg17: memref<1x2xf32, #tpu.memory_space<vmem>>, %arg18: memref<1x2x2xf32, #tpu.memory_space<vmem>>) attributes {dimension_semantics = [#tpu.dimension_semantics<parallel>], iteration_bounds = array<i64: 2>, scalar_prefetch = 0 : i64, scratch_operands = 0 : i64, tpu.core_type = #tpu.core_type<tc>, window_params = [{transform_indices = @transform_0, window_bounds = array<i64: 1, 64, 64>}, {transform_indices = @transform_1, window_bounds = array<i64: 1, 64, 16>}, {transform_indices = @transform_2, window_bounds = array<i64: 1, 64, 1>}, {transform_indices = @transform_3, window_bounds = array<i64: 1, 1, 64>}, {pipeline_mode = #tpu.pipeline_mode<synchronous>, transform_indices = @transform_4, window_bounds = array<i64: 2, 1, 1>}, {pipeline_mode = #tpu.pipeline_mode<synchronous>, transform_indices = @transform_5, window_bounds = array<i64: 16, 32>}, {pipeline_mode = #tpu.pipeline_mode<synchronous>, transform_indices = @transform_6, window_bounds = array<i64: 1, 32>}, {pipeline_mode = #tpu.pipeline_mode<synchronous>, transform_indices = @transform_7, window_bounds = array<i64: 1, 32, 32>}, {pipeline_mode = #tpu.pipeline_mode<synchronous>, transform_indices = @transform_8, window_bounds = array<i64: 1, 1, 32>}, {pipeline_mode = #tpu.pipeline_mode<synchronous>, transform_indices = @transform_9, window_bounds = array<i64: 2, 32, 1>}, {pipeline_mode = #tpu.pipeline_mode<synchronous>, transform_indices = @transform_10, window_bounds = array<i64: 32, 32>}, {pipeline_mode = #tpu.pipeline_mode<synchronous>, transform_indices = @transform_11, window_bounds = array<i64: 32, 32>}, {pipeline_mode = #tpu.pipeline_mode<synchronous>, transform_indices = @transform_12, window_bounds = array<i64: 1, 32>}, {pipeline_mode = #tpu.pipeline_mode<synchronous>, transform_indices = @transform_13, window_bounds = array<i64: 32, 16>}, {pipeline_mode = #tpu.pipeline_mode<synchronous>, transform_indices = @transform_14, window_bounds = array<i64: 1, 16>}, {pipeline_mode = #tpu.pipeline_mode<synchronous>, transform_indices = @transform_15, window_bounds = array<i64: 16, 2>}, {pipeline_mode = #tpu.pipeline_mode<synchronous>, transform_indices = @transform_16, window_bounds = array<i64: 1, 2>}, {transform_indices = @transform_17, window_bounds = array<i64: 1, 2, 2>}]} {
    %c0 = arith.constant 0 : index
    %c0_0 = arith.constant 0 : index
    %c0_1 = arith.constant 0 : index
    %0 = vector.load %arg1[%c0, %c0_0, %c0_1] : memref<1x64x64xbf16, #tpu.memory_space<vmem>>, vector<1x64x64xbf16>
    %1 = vector.shape_cast %0 : vector<1x64x64xbf16> to vector<64x64xbf16>
    %c0_2 = arith.constant 0 : index
    %c0_3 = arith.constant 0 : index
    %c0_4 = arith.constant 0 : index
    %2 = vector.load %arg2[%c0_2, %c0_3, %c0_4] : memref<1x64x16xf32, #tpu.memory_space<vmem>>, vector<1x64x16xf32>
    %3 = vector.shape_cast %2 : vector<1x64x16xf32> to vector<64x16xf32>
    %c0_5 = arith.constant 0 : index
    %c0_6 = arith.constant 0 : index
    %c0_7 = arith.constant 0 : index
    %4 = vector.load %arg3[%c0_5, %c0_6, %c0_7] : memref<1x64x1xi32, #tpu.memory_space<vmem>>, vector<1x64x1xi32>
    %5 = vector.shape_cast %4 : vector<1x64x1xi32> to vector<64x1xi32>
    %c0_8 = arith.constant 0 : index
    %c0_9 = arith.constant 0 : index
    %c0_10 = arith.constant 0 : index
    %6 = vector.load %arg4[%c0_8, %c0_9, %c0_10] : memref<1x1x64xi32, #tpu.memory_space<vmem>>, vector<1x1x64xi32>
    %7 = vector.shape_cast %6 : vector<1x1x64xi32> to vector<1x64xi32>
    %c0_11 = arith.constant 0 : index
    %c0_12 = arith.constant 0 : index
    %c0_13 = arith.constant 0 : index
    %8 = vector.load %arg5[%c0_11, %c0_12, %c0_13] : memref<2x1x1xi32, #tpu.memory_space<vmem>>, vector<2x1x1xi32>
    %9 = tpu.iota {dimensions = array<i32: 0>} : vector<64x64xi32>
    %10 = tpu.iota {dimensions = array<i32: 1>} : vector<64x64xi32>
    %11 = arith.cmpi eq, %9, %10 : vector<64x64xi32>
    %12 = arith.cmpi slt, %10, %9 : vector<64x64xi32>
    %13 = vector.broadcast %5 : vector<64x1xi32> to vector<64x64xi32>
    %14 = vector.broadcast %7 : vector<1x64xi32> to vector<64x64xi32>
    %15 = arith.cmpi eq, %13, %14 : vector<64x64xi32>
    %16 = arith.extui %15 : vector<64x64xi1> to vector<64x64xi32>
    %17 = arith.sitofp %16 : vector<64x64xi32> to vector<64x64xf32>
    %18 = arith.truncf %17 : vector<64x64xf32> to vector<64x64xbf16>
    %cst = arith.constant 1.000000e+00 : f32
    %19 = vector.broadcast %cst : f32 to vector<1x64xf32>
    %20 = tpu.iota {dimensions = array<i32: 0>} : vector<2x64xi32>
    %21 = vector.broadcast %7 : vector<1x64xi32> to vector<2x64xi32>
    %22 = arith.cmpi eq, %20, %21 : vector<2x64xi32>
    %23 = arith.extui %22 : vector<2x64xi1> to vector<2x64xi32>
    %24 = arith.sitofp %23 : vector<2x64xi32> to vector<2x64xf32>
    %25 = vector.shape_cast %5 : vector<64x1xi32> to vector<1x64x1xi32>
    %26 = vector.broadcast %8 : vector<2x1x1xi32> to vector<2x64x1xi32>
    %27 = vector.broadcast %25 : vector<1x64x1xi32> to vector<2x64x1xi32>
    %28 = arith.cmpi eq, %26, %27 : vector<2x64x1xi32>
    %cst_14 = arith.constant 0.000000e+00 : f32
    %cst_15 = arith.constant 1.000000e+30 : f32
    %29 = arith.subf %cst_14, %cst_15 : f32
    %cst_16 = arith.constant 0.000000e+00 : f32
    %30 = vector.broadcast %cst_16 : f32 to vector<2x64x1xf32>
    %31 = vector.broadcast %29 : f32 to vector<2x64x1xf32>
    %32 = arith.select %28, %30, %31 : vector<2x64x1xi1>, vector<2x64x1xf32>
    %cst_17 = arith.constant 1.000000e+00 : f32
    %33 = vector.broadcast %cst_17 : f32 to vector<64x1xf32>
    %cst_18 = arith.constant 0.000000e+00 : f32
    %34 = vector.broadcast %cst_18 : f32 to vector<2x32xf32>
    %cst_19 = arith.constant 0.000000e+00 : f32
    %35 = vector.broadcast %cst_19 : f32 to vector<2x32xf32>
    %c0_20 = arith.constant 0 : index
    %c0_21 = arith.constant 0 : index
    %36 = vector.load %arg6[%c0_20, %c0_21] : memref<16x32xf32, #tpu.memory_space<vmem>>, vector<16x32xf32>
    %c0_22 = arith.constant 0 : index
    %c0_23 = arith.constant 0 : index
    %37 = vector.load %arg7[%c0_22, %c0_23] : memref<1x32xf32, #tpu.memory_space<vmem>>, vector<1x32xf32>
    %c0_24 = arith.constant 0 : index
    %c0_25 = arith.constant 0 : index
    %c0_26 = arith.constant 0 : index
    %38 = vector.load %arg10[%c0_24, %c0_25, %c0_26] : memref<2x32x1xf32, #tpu.memory_space<vmem>>, vector<1x32x1xf32>
    %39 = vector.shape_cast %38 : vector<1x32x1xf32> to vector<32x1xf32>
    %40 = arith.truncf %33 : vector<64x1xf32> to vector<64x1xbf16>
    %cst_27 = arith.constant dense<0.000000e+00> : vector<64x1xf32>
    %41 = tpu.matmul %1, %40, %cst_27 {dimension_numbers = #tpu.dot_dimension_numbers<[1], [0], [0], [1], [0, 0, 1, 1], [], []>} : vector<64x64xbf16>, vector<64x1xbf16>, vector<64x1xf32> -> vector<64x1xf32>
    %cst_28 = arith.constant 1.000000e+00 : f32
    %42 = vector.broadcast %cst_28 : f32 to vector<64x1xf32>
    %43 = arith.addf %41, %42 : vector<64x1xf32>
    %44 = arith.mulf %33, %43 : vector<64x1xf32>
    %cst_29 = arith.constant 0.000000e+00 : f32
    %45 = vector.broadcast %cst_29 : f32 to vector<64x1xf32>
    %46 = arith.cmpf ogt, %44, %45 : vector<64x1xf32>
    %cst_30 = arith.constant 9.99999996E-13 : f32
    %47 = vector.broadcast %cst_30 : f32 to vector<64x1xf32>
    %48 = arith.maximumf %44, %47 : vector<64x1xf32>
    %49 = math.rsqrt %48 : vector<64x1xf32>
    %cst_31 = arith.constant 0.000000e+00 : f32
    %50 = vector.broadcast %cst_31 : f32 to vector<64x1xf32>
    %51 = arith.select %46, %49, %50 : vector<64x1xi1>, vector<64x1xf32>
    %cst_32 = arith.constant dense<0.000000e+00> : vector<64x32xf32>
    %52 = tpu.matmul %3, %36, %cst_32 {dimension_numbers = #tpu.dot_dimension_numbers<[1], [0], [0], [1], [0, 0, 1, 1], [], []>} : vector<64x16xf32>, vector<16x32xf32>, vector<64x32xf32> -> vector<64x32xf32>
    %53 = vector.broadcast %51 : vector<64x1xf32> to vector<64x32xf32>
    %54 = arith.mulf %53, %52 : vector<64x32xf32>
    %55 = arith.truncf %54 : vector<64x32xf32> to vector<64x32xbf16>
    %cst_33 = arith.constant dense<0.000000e+00> : vector<64x32xf32>
    %56 = tpu.matmul %1, %55, %cst_33 {dimension_numbers = #tpu.dot_dimension_numbers<[1], [0], [0], [1], [0, 0, 1, 1], [], []>} : vector<64x64xbf16>, vector<64x32xbf16>, vector<64x32xf32> -> vector<64x32xf32>
    %57 = vector.broadcast %51 : vector<64x1xf32> to vector<64x32xf32>
    %58 = arith.mulf %57, %56 : vector<64x32xf32>
    %59 = arith.mulf %51, %51 : vector<64x1xf32>
    %60 = vector.broadcast %59 : vector<64x1xf32> to vector<64x32xf32>
    %61 = arith.mulf %60, %52 : vector<64x32xf32>
    %62 = arith.addf %58, %61 : vector<64x32xf32>
    %63 = vector.broadcast %37 : vector<1x32xf32> to vector<64x32xf32>
    %64 = arith.addf %62, %63 : vector<64x32xf32>
    %cst_34 = arith.constant 0.000000e+00 : f32
    %65 = vector.broadcast %cst_34 : f32 to vector<64x32xf32>
    %66 = arith.maximumf %64, %65 : vector<64x32xf32>
    %67 = vector.broadcast %33 : vector<64x1xf32> to vector<64x32xf32>
    %68 = arith.mulf %66, %67 : vector<64x32xf32>
    %cst_35 = arith.constant dense<0.000000e+00> : vector<64x1xf32>
    %69 = tpu.matmul %68, %39, %cst_35 {dimension_numbers = #tpu.dot_dimension_numbers<[1], [0], [0], [1], [0, 0, 1, 1], [], []>} : vector<64x32xf32>, vector<32x1xf32>, vector<64x1xf32> -> vector<64x1xf32>
    %70 = math.tanh %69 : vector<64x1xf32>
    %cst_36 = arith.constant 0.000000e+00 : f32
    %71 = vector.shape_cast %70 : vector<64x1xf32> to vector<64x1xf32>
    %72 = vector.broadcast %71 : vector<64x1xf32> to vector<64x64xf32>
    %73 = vector.broadcast %cst_36 : f32 to vector<64x64xf32>
    %74 = arith.select %11, %72, %73 : vector<64x64xi1>, vector<64x64xf32>
    %cst_37 = arith.constant dense<0.000000e+00> : vector<1x64xf32>
    %75 = tpu.matmul %19, %74, %cst_37 {dimension_numbers = #tpu.dot_dimension_numbers<[1], [0], [0], [1], [0, 0, 1, 1], [], []>} : vector<1x64xf32>, vector<64x64xf32>, vector<1x64xf32> -> vector<1x64xf32>
    %76 = vector.broadcast %75 : vector<1x64xf32> to vector<64x64xf32>
    %77 = vector.broadcast %70 : vector<64x1xf32> to vector<64x64xf32>
    %78 = arith.cmpf ogt, %76, %77 : vector<64x64xf32>
    %79 = vector.broadcast %75 : vector<1x64xf32> to vector<64x64xf32>
    %80 = vector.broadcast %70 : vector<64x1xf32> to vector<64x64xf32>
    %81 = arith.cmpf oeq, %79, %80 : vector<64x64xf32>
    %82 = arith.andi %81, %12 : vector<64x64xi1>
    %83 = arith.ori %78, %82 : vector<64x64xi1>
    %cst_38 = arith.constant 0.000000e+00 : bf16
    %84 = vector.broadcast %cst_38 : bf16 to vector<64x64xbf16>
    %85 = arith.select %83, %18, %84 : vector<64x64xi1>, vector<64x64xbf16>
    %cst_39 = arith.constant dense<0.000000e+00> : vector<64x1xf32>
    %86 = tpu.matmul %85, %40, %cst_39 {dimension_numbers = #tpu.dot_dimension_numbers<[1], [0], [0], [1], [0, 0, 1, 1], [], []>} : vector<64x64xbf16>, vector<64x1xbf16>, vector<64x1xf32> -> vector<64x1xf32>
    %cst_40 = arith.constant dense<0.000000e+00> : vector<64x1xf32>
    %87 = tpu.matmul %18, %40, %cst_40 {dimension_numbers = #tpu.dot_dimension_numbers<[1], [0], [0], [1], [0, 0, 1, 1], [], []>} : vector<64x64xbf16>, vector<64x1xbf16>, vector<64x1xf32> -> vector<64x1xf32>
    %cst_41 = arith.constant 8.000000e-01 : f32
    %88 = vector.broadcast %cst_41 : f32 to vector<64x1xf32>
    %89 = arith.mulf %88, %87 : vector<64x1xf32>
    %90 = math.ceil %89 : vector<64x1xf32>
    %91 = arith.cmpf olt, %86, %90 : vector<64x1xf32>
    %92 = arith.extui %91 : vector<64x1xi1> to vector<64x1xi32>
    %93 = arith.sitofp %92 : vector<64x1xi32> to vector<64x1xf32>
    %94 = arith.mulf %33, %93 : vector<64x1xf32>
    %95 = arith.mulf %70, %94 : vector<64x1xf32>
    %96 = vector.broadcast %95 : vector<64x1xf32> to vector<64x32xf32>
    %97 = arith.mulf %68, %96 : vector<64x32xf32>
    %cst_42 = arith.constant dense<0.000000e+00> : vector<2x1xf32>
    %98 = tpu.matmul %24, %94, %cst_42 {dimension_numbers = #tpu.dot_dimension_numbers<[1], [0], [0], [1], [0, 0, 1, 1], [], []>} : vector<2x64xf32>, vector<64x1xf32>, vector<2x1xf32> -> vector<2x1xf32>
    %cst_43 = arith.constant dense<0.000000e+00> : vector<2x32xf32>
    %99 = tpu.matmul %24, %97, %cst_43 {dimension_numbers = #tpu.dot_dimension_numbers<[1], [0], [0], [1], [0, 0, 1, 1], [], []>} : vector<2x64xf32>, vector<64x32xf32>, vector<2x32xf32> -> vector<2x32xf32>
    %cst_44 = arith.constant 1.000000e+00 : f32
    %100 = vector.broadcast %cst_44 : f32 to vector<2x1xf32>
    %101 = arith.maximumf %98, %100 : vector<2x1xf32>
    %102 = vector.broadcast %101 : vector<2x1xf32> to vector<2x32xf32>
    %103 = arith.divf %99, %102 : vector<2x32xf32>
    %cst_45 = arith.constant 1.000000e+00 : f32
    %104 = vector.broadcast %cst_45 : f32 to vector<64x1xf32>
    %105 = arith.subf %94, %104 : vector<64x1xf32>
    %cst_46 = arith.constant 1.000000e+30 : f32
    %106 = vector.broadcast %cst_46 : f32 to vector<64x1xf32>
    %107 = arith.mulf %105, %106 : vector<64x1xf32>
    %108 = vector.broadcast %107 : vector<64x1xf32> to vector<64x32xf32>
    %109 = arith.addf %97, %108 : vector<64x32xf32>
    %110 = vector.shape_cast %109 : vector<64x32xf32> to vector<1x64x32xf32>
    %111 = vector.broadcast %110 : vector<1x64x32xf32> to vector<2x64x32xf32>
    %112 = vector.broadcast %32 : vector<2x64x1xf32> to vector<2x64x32xf32>
    %113 = arith.addf %111, %112 : vector<2x64x32xf32>
    %cst_47 = arith.constant dense<0xFF800000> : vector<2x32xf32>
    %114 = vector.multi_reduction <maximumf>, %113, %cst_47 [1] : vector<2x64x32xf32> to vector<2x32xf32>
    %cst_48 = arith.constant 0.000000e+00 : f32
    %115 = vector.broadcast %cst_48 : f32 to vector<2x1xf32>
    %116 = arith.cmpf ogt, %98, %115 : vector<2x1xf32>
    %cst_49 = arith.constant 0.000000e+00 : f32
    %117 = vector.shape_cast %116 : vector<2x1xi1> to vector<2x1xi1>
    %118 = vector.broadcast %117 : vector<2x1xi1> to vector<2x32xi1>
    %119 = vector.broadcast %cst_49 : f32 to vector<2x32xf32>
    %120 = arith.select %118, %114, %119 : vector<2x32xi1>, vector<2x32xf32>
    %121 = arith.addf %34, %120 : vector<2x32xf32>
    %122 = arith.addf %35, %103 : vector<2x32xf32>
    %c0_50 = arith.constant 0 : index
    %c0_51 = arith.constant 0 : index
    %c0_52 = arith.constant 0 : index
    %123 = vector.load %arg8[%c0_50, %c0_51, %c0_52] : memref<1x32x32xf32, #tpu.memory_space<vmem>>, vector<1x32x32xf32>
    %124 = vector.shape_cast %123 : vector<1x32x32xf32> to vector<32x32xf32>
    %c0_53 = arith.constant 0 : index
    %c0_54 = arith.constant 0 : index
    %c0_55 = arith.constant 0 : index
    %125 = vector.load %arg9[%c0_53, %c0_54, %c0_55] : memref<1x1x32xf32, #tpu.memory_space<vmem>>, vector<1x1x32xf32>
    %126 = vector.shape_cast %125 : vector<1x1x32xf32> to vector<1x32xf32>
    %c1 = arith.constant 1 : index
    %c0_56 = arith.constant 0 : index
    %c0_57 = arith.constant 0 : index
    %127 = vector.load %arg10[%c1, %c0_56, %c0_57] : memref<2x32x1xf32, #tpu.memory_space<vmem>>, vector<1x32x1xf32>
    %128 = vector.shape_cast %127 : vector<1x32x1xf32> to vector<32x1xf32>
    %129 = arith.truncf %94 : vector<64x1xf32> to vector<64x1xbf16>
    %cst_58 = arith.constant dense<0.000000e+00> : vector<64x1xf32>
    %130 = tpu.matmul %1, %129, %cst_58 {dimension_numbers = #tpu.dot_dimension_numbers<[1], [0], [0], [1], [0, 0, 1, 1], [], []>} : vector<64x64xbf16>, vector<64x1xbf16>, vector<64x1xf32> -> vector<64x1xf32>
    %cst_59 = arith.constant 1.000000e+00 : f32
    %131 = vector.broadcast %cst_59 : f32 to vector<64x1xf32>
    %132 = arith.addf %130, %131 : vector<64x1xf32>
    %133 = arith.mulf %94, %132 : vector<64x1xf32>
    %cst_60 = arith.constant 0.000000e+00 : f32
    %134 = vector.broadcast %cst_60 : f32 to vector<64x1xf32>
    %135 = arith.cmpf ogt, %133, %134 : vector<64x1xf32>
    %cst_61 = arith.constant 9.99999996E-13 : f32
    %136 = vector.broadcast %cst_61 : f32 to vector<64x1xf32>
    %137 = arith.maximumf %133, %136 : vector<64x1xf32>
    %138 = math.rsqrt %137 : vector<64x1xf32>
    %cst_62 = arith.constant 0.000000e+00 : f32
    %139 = vector.broadcast %cst_62 : f32 to vector<64x1xf32>
    %140 = arith.select %135, %138, %139 : vector<64x1xi1>, vector<64x1xf32>
    %cst_63 = arith.constant dense<0.000000e+00> : vector<64x32xf32>
    %141 = tpu.matmul %97, %124, %cst_63 {dimension_numbers = #tpu.dot_dimension_numbers<[1], [0], [0], [1], [0, 0, 1, 1], [], []>} : vector<64x32xf32>, vector<32x32xf32>, vector<64x32xf32> -> vector<64x32xf32>
    %142 = vector.broadcast %140 : vector<64x1xf32> to vector<64x32xf32>
    %143 = arith.mulf %142, %141 : vector<64x32xf32>
    %144 = arith.truncf %143 : vector<64x32xf32> to vector<64x32xbf16>
    %cst_64 = arith.constant dense<0.000000e+00> : vector<64x32xf32>
    %145 = tpu.matmul %1, %144, %cst_64 {dimension_numbers = #tpu.dot_dimension_numbers<[1], [0], [0], [1], [0, 0, 1, 1], [], []>} : vector<64x64xbf16>, vector<64x32xbf16>, vector<64x32xf32> -> vector<64x32xf32>
    %146 = vector.broadcast %140 : vector<64x1xf32> to vector<64x32xf32>
    %147 = arith.mulf %146, %145 : vector<64x32xf32>
    %148 = arith.mulf %140, %140 : vector<64x1xf32>
    %149 = vector.broadcast %148 : vector<64x1xf32> to vector<64x32xf32>
    %150 = arith.mulf %149, %141 : vector<64x32xf32>
    %151 = arith.addf %147, %150 : vector<64x32xf32>
    %152 = vector.broadcast %126 : vector<1x32xf32> to vector<64x32xf32>
    %153 = arith.addf %151, %152 : vector<64x32xf32>
    %cst_65 = arith.constant 0.000000e+00 : f32
    %154 = vector.broadcast %cst_65 : f32 to vector<64x32xf32>
    %155 = arith.maximumf %153, %154 : vector<64x32xf32>
    %156 = vector.broadcast %94 : vector<64x1xf32> to vector<64x32xf32>
    %157 = arith.mulf %155, %156 : vector<64x32xf32>
    %cst_66 = arith.constant dense<0.000000e+00> : vector<64x1xf32>
    %158 = tpu.matmul %157, %128, %cst_66 {dimension_numbers = #tpu.dot_dimension_numbers<[1], [0], [0], [1], [0, 0, 1, 1], [], []>} : vector<64x32xf32>, vector<32x1xf32>, vector<64x1xf32> -> vector<64x1xf32>
    %159 = math.tanh %158 : vector<64x1xf32>
    %cst_67 = arith.constant 0.000000e+00 : f32
    %160 = vector.shape_cast %159 : vector<64x1xf32> to vector<64x1xf32>
    %161 = vector.broadcast %160 : vector<64x1xf32> to vector<64x64xf32>
    %162 = vector.broadcast %cst_67 : f32 to vector<64x64xf32>
    %163 = arith.select %11, %161, %162 : vector<64x64xi1>, vector<64x64xf32>
    %cst_68 = arith.constant dense<0.000000e+00> : vector<1x64xf32>
    %164 = tpu.matmul %19, %163, %cst_68 {dimension_numbers = #tpu.dot_dimension_numbers<[1], [0], [0], [1], [0, 0, 1, 1], [], []>} : vector<1x64xf32>, vector<64x64xf32>, vector<1x64xf32> -> vector<1x64xf32>
    %165 = vector.broadcast %164 : vector<1x64xf32> to vector<64x64xf32>
    %166 = vector.broadcast %159 : vector<64x1xf32> to vector<64x64xf32>
    %167 = arith.cmpf ogt, %165, %166 : vector<64x64xf32>
    %168 = vector.broadcast %164 : vector<1x64xf32> to vector<64x64xf32>
    %169 = vector.broadcast %159 : vector<64x1xf32> to vector<64x64xf32>
    %170 = arith.cmpf oeq, %168, %169 : vector<64x64xf32>
    %171 = arith.andi %170, %12 : vector<64x64xi1>
    %172 = arith.ori %167, %171 : vector<64x64xi1>
    %cst_69 = arith.constant 0.000000e+00 : bf16
    %173 = vector.broadcast %cst_69 : bf16 to vector<64x64xbf16>
    %174 = arith.select %172, %18, %173 : vector<64x64xi1>, vector<64x64xbf16>
    %cst_70 = arith.constant dense<0.000000e+00> : vector<64x1xf32>
    %175 = tpu.matmul %174, %129, %cst_70 {dimension_numbers = #tpu.dot_dimension_numbers<[1], [0], [0], [1], [0, 0, 1, 1], [], []>} : vector<64x64xbf16>, vector<64x1xbf16>, vector<64x1xf32> -> vector<64x1xf32>
    %cst_71 = arith.constant dense<0.000000e+00> : vector<64x1xf32>
    %176 = tpu.matmul %18, %129, %cst_71 {dimension_numbers = #tpu.dot_dimension_numbers<[1], [0], [0], [1], [0, 0, 1, 1], [], []>} : vector<64x64xbf16>, vector<64x1xbf16>, vector<64x1xf32> -> vector<64x1xf32>
    %cst_72 = arith.constant 8.000000e-01 : f32
    %177 = vector.broadcast %cst_72 : f32 to vector<64x1xf32>
    %178 = arith.mulf %177, %176 : vector<64x1xf32>
    %179 = math.ceil %178 : vector<64x1xf32>
    %180 = arith.cmpf olt, %175, %179 : vector<64x1xf32>
    %181 = arith.extui %180 : vector<64x1xi1> to vector<64x1xi32>
    %182 = arith.sitofp %181 : vector<64x1xi32> to vector<64x1xf32>
    %183 = arith.mulf %94, %182 : vector<64x1xf32>
    %184 = arith.mulf %159, %183 : vector<64x1xf32>
    %185 = vector.broadcast %184 : vector<64x1xf32> to vector<64x32xf32>
    %186 = arith.mulf %157, %185 : vector<64x32xf32>
    %cst_73 = arith.constant dense<0.000000e+00> : vector<2x1xf32>
    %187 = tpu.matmul %24, %183, %cst_73 {dimension_numbers = #tpu.dot_dimension_numbers<[1], [0], [0], [1], [0, 0, 1, 1], [], []>} : vector<2x64xf32>, vector<64x1xf32>, vector<2x1xf32> -> vector<2x1xf32>
    %cst_74 = arith.constant dense<0.000000e+00> : vector<2x32xf32>
    %188 = tpu.matmul %24, %186, %cst_74 {dimension_numbers = #tpu.dot_dimension_numbers<[1], [0], [0], [1], [0, 0, 1, 1], [], []>} : vector<2x64xf32>, vector<64x32xf32>, vector<2x32xf32> -> vector<2x32xf32>
    %cst_75 = arith.constant 1.000000e+00 : f32
    %189 = vector.broadcast %cst_75 : f32 to vector<2x1xf32>
    %190 = arith.maximumf %187, %189 : vector<2x1xf32>
    %191 = vector.broadcast %190 : vector<2x1xf32> to vector<2x32xf32>
    %192 = arith.divf %188, %191 : vector<2x32xf32>
    %cst_76 = arith.constant 1.000000e+00 : f32
    %193 = vector.broadcast %cst_76 : f32 to vector<64x1xf32>
    %194 = arith.subf %183, %193 : vector<64x1xf32>
    %cst_77 = arith.constant 1.000000e+30 : f32
    %195 = vector.broadcast %cst_77 : f32 to vector<64x1xf32>
    %196 = arith.mulf %194, %195 : vector<64x1xf32>
    %197 = vector.broadcast %196 : vector<64x1xf32> to vector<64x32xf32>
    %198 = arith.addf %186, %197 : vector<64x32xf32>
    %199 = vector.shape_cast %198 : vector<64x32xf32> to vector<1x64x32xf32>
    %200 = vector.broadcast %199 : vector<1x64x32xf32> to vector<2x64x32xf32>
    %201 = vector.broadcast %32 : vector<2x64x1xf32> to vector<2x64x32xf32>
    %202 = arith.addf %200, %201 : vector<2x64x32xf32>
    %cst_78 = arith.constant dense<0xFF800000> : vector<2x32xf32>
    %203 = vector.multi_reduction <maximumf>, %202, %cst_78 [1] : vector<2x64x32xf32> to vector<2x32xf32>
    %cst_79 = arith.constant 0.000000e+00 : f32
    %204 = vector.broadcast %cst_79 : f32 to vector<2x1xf32>
    %205 = arith.cmpf ogt, %187, %204 : vector<2x1xf32>
    %cst_80 = arith.constant 0.000000e+00 : f32
    %206 = vector.shape_cast %205 : vector<2x1xi1> to vector<2x1xi1>
    %207 = vector.broadcast %206 : vector<2x1xi1> to vector<2x32xi1>
    %208 = vector.broadcast %cst_80 : f32 to vector<2x32xf32>
    %209 = arith.select %207, %203, %208 : vector<2x32xi1>, vector<2x32xf32>
    %210 = arith.addf %121, %209 : vector<2x32xf32>
    %211 = arith.addf %122, %192 : vector<2x32xf32>
    %c0_81 = arith.constant 0 : index
    %c0_82 = arith.constant 0 : index
    %212 = vector.load %arg11[%c0_81, %c0_82] : memref<32x32xf32, #tpu.memory_space<vmem>>, vector<32x32xf32>
    %cst_83 = arith.constant dense<0.000000e+00> : vector<2x32xf32>
    %213 = tpu.matmul %210, %212, %cst_83 {dimension_numbers = #tpu.dot_dimension_numbers<[1], [0], [0], [1], [0, 0, 1, 1], [], []>} : vector<2x32xf32>, vector<32x32xf32>, vector<2x32xf32> -> vector<2x32xf32>
    %c0_84 = arith.constant 0 : index
    %c0_85 = arith.constant 0 : index
    %214 = vector.load %arg12[%c0_84, %c0_85] : memref<32x32xf32, #tpu.memory_space<vmem>>, vector<32x32xf32>
    %cst_86 = arith.constant dense<0.000000e+00> : vector<2x32xf32>
    %215 = tpu.matmul %211, %214, %cst_86 {dimension_numbers = #tpu.dot_dimension_numbers<[1], [0], [0], [1], [0, 0, 1, 1], [], []>} : vector<2x32xf32>, vector<32x32xf32>, vector<2x32xf32> -> vector<2x32xf32>
    %216 = arith.addf %213, %215 : vector<2x32xf32>
    %c0_87 = arith.constant 0 : index
    %c0_88 = arith.constant 0 : index
    %217 = vector.load %arg13[%c0_87, %c0_88] : memref<1x32xf32, #tpu.memory_space<vmem>>, vector<1x32xf32>
    %218 = vector.broadcast %217 : vector<1x32xf32> to vector<2x32xf32>
    %219 = arith.addf %216, %218 : vector<2x32xf32>
    %cst_89 = arith.constant 0.000000e+00 : f32
    %220 = vector.broadcast %cst_89 : f32 to vector<2x32xf32>
    %221 = arith.maximumf %219, %220 : vector<2x32xf32>
    %c0_90 = arith.constant 0 : index
    %c0_91 = arith.constant 0 : index
    %222 = vector.load %arg14[%c0_90, %c0_91] : memref<32x16xf32, #tpu.memory_space<vmem>>, vector<32x16xf32>
    %cst_92 = arith.constant dense<0.000000e+00> : vector<2x16xf32>
    %223 = tpu.matmul %221, %222, %cst_92 {dimension_numbers = #tpu.dot_dimension_numbers<[1], [0], [0], [1], [0, 0, 1, 1], [], []>} : vector<2x32xf32>, vector<32x16xf32>, vector<2x16xf32> -> vector<2x16xf32>
    %c0_93 = arith.constant 0 : index
    %c0_94 = arith.constant 0 : index
    %224 = vector.load %arg15[%c0_93, %c0_94] : memref<1x16xf32, #tpu.memory_space<vmem>>, vector<1x16xf32>
    %225 = vector.broadcast %224 : vector<1x16xf32> to vector<2x16xf32>
    %226 = arith.addf %223, %225 : vector<2x16xf32>
    %cst_95 = arith.constant 0.000000e+00 : f32
    %227 = vector.broadcast %cst_95 : f32 to vector<2x16xf32>
    %228 = arith.maximumf %226, %227 : vector<2x16xf32>
    %c0_96 = arith.constant 0 : index
    %c0_97 = arith.constant 0 : index
    %229 = vector.load %arg16[%c0_96, %c0_97] : memref<16x2xf32, #tpu.memory_space<vmem>>, vector<16x2xf32>
    %cst_98 = arith.constant dense<0.000000e+00> : vector<2x2xf32>
    %230 = tpu.matmul %228, %229, %cst_98 {dimension_numbers = #tpu.dot_dimension_numbers<[1], [0], [0], [1], [0, 0, 1, 1], [], []>} : vector<2x16xf32>, vector<16x2xf32>, vector<2x2xf32> -> vector<2x2xf32>
    %c0_99 = arith.constant 0 : index
    %c0_100 = arith.constant 0 : index
    %231 = vector.load %arg17[%c0_99, %c0_100] : memref<1x2xf32, #tpu.memory_space<vmem>>, vector<1x2xf32>
    %232 = vector.broadcast %231 : vector<1x2xf32> to vector<2x2xf32>
    %233 = arith.addf %230, %232 : vector<2x2xf32>
    %cst_101 = arith.constant dense<0xFF800000> : vector<2xf32>
    %234 = vector.multi_reduction <maximumf>, %233, %cst_101 [1] : vector<2x2xf32> to vector<2xf32>
    %235 = vector.shape_cast %234 : vector<2xf32> to vector<2x1xf32>
    %236 = vector.broadcast %235 : vector<2x1xf32> to vector<2x2xf32>
    %237 = arith.subf %233, %236 : vector<2x2xf32>
    %238 = math.exp %237 : vector<2x2xf32>
    %cst_102 = arith.constant dense<0.000000e+00> : vector<2xf32>
    %239 = vector.multi_reduction <add>, %238, %cst_102 [1] : vector<2x2xf32> to vector<2xf32>
    %240 = vector.shape_cast %239 : vector<2xf32> to vector<2x1xf32>
    %241 = math.log %240 : vector<2x1xf32>
    %242 = vector.broadcast %241 : vector<2x1xf32> to vector<2x2xf32>
    %243 = arith.subf %237, %242 : vector<2x2xf32>
    %c0_103 = arith.constant 0 : index
    %c0_104 = arith.constant 0 : index
    %c0_105 = arith.constant 0 : index
    %244 = vector.load %arg18[%c0_103, %c0_104, %c0_105] : memref<1x2x2xf32, #tpu.memory_space<vmem>>, vector<1x2x2xf32>
    %245 = vector.shape_cast %244 : vector<1x2x2xf32> to vector<2x2xf32>
    %246 = vector.shape_cast %243 : vector<2x2xf32> to vector<1x2x2xf32>
    tpu.vector_store %arg18[%c0_103, %c0_104, %c0_105], %246 {strides = array<i32>} : memref<1x2x2xf32, #tpu.memory_space<vmem>>, vector<1x2x2xf32>,
    return
  }
  func.func @transform_0(%arg0: i32) -> (i32, i32, i32) {
    %c0_i32 = arith.constant 0 : i32
    %c0_i32_0 = arith.constant 0 : i32
    %c0_i32_1 = arith.constant 0 : i32
    return %arg0, %c0_i32, %c0_i32_0 : i32, i32, i32
  }
  func.func @transform_1(%arg0: i32) -> (i32, i32, i32) {
    %c0_i32 = arith.constant 0 : i32
    %c0_i32_0 = arith.constant 0 : i32
    %c0_i32_1 = arith.constant 0 : i32
    return %arg0, %c0_i32, %c0_i32_0 : i32, i32, i32
  }
  func.func @transform_2(%arg0: i32) -> (i32, i32, i32) {
    %c0_i32 = arith.constant 0 : i32
    %c0_i32_0 = arith.constant 0 : i32
    %c0_i32_1 = arith.constant 0 : i32
    return %arg0, %c0_i32, %c0_i32_0 : i32, i32, i32
  }
  func.func @transform_3(%arg0: i32) -> (i32, i32, i32) {
    %c0_i32 = arith.constant 0 : i32
    %c0_i32_0 = arith.constant 0 : i32
    %c0_i32_1 = arith.constant 0 : i32
    return %arg0, %c0_i32, %c0_i32_0 : i32, i32, i32
  }
  func.func @transform_4(%arg0: i32) -> (i32, i32, i32) {
    %c0_i32 = arith.constant 0 : i32
    %c0_i32_0 = arith.constant 0 : i32
    %c0_i32_1 = arith.constant 0 : i32
    %c0_i32_2 = arith.constant 0 : i32
    return %c0_i32, %c0_i32_0, %c0_i32_1 : i32, i32, i32
  }
  func.func @transform_5(%arg0: i32) -> (i32, i32) {
    %c0_i32 = arith.constant 0 : i32
    %c0_i32_0 = arith.constant 0 : i32
    %c0_i32_1 = arith.constant 0 : i32
    return %c0_i32, %c0_i32_0 : i32, i32
  }
  func.func @transform_6(%arg0: i32) -> (i32, i32) {
    %c0_i32 = arith.constant 0 : i32
    %c0_i32_0 = arith.constant 0 : i32
    %c0_i32_1 = arith.constant 0 : i32
    return %c0_i32, %c0_i32_0 : i32, i32
  }
  func.func @transform_7(%arg0: i32) -> (i32, i32, i32) {
    %c0_i32 = arith.constant 0 : i32
    %c0_i32_0 = arith.constant 0 : i32
    %c0_i32_1 = arith.constant 0 : i32
    %c0_i32_2 = arith.constant 0 : i32
    return %c0_i32, %c0_i32_0, %c0_i32_1 : i32, i32, i32
  }
  func.func @transform_8(%arg0: i32) -> (i32, i32, i32) {
    %c0_i32 = arith.constant 0 : i32
    %c0_i32_0 = arith.constant 0 : i32
    %c0_i32_1 = arith.constant 0 : i32
    %c0_i32_2 = arith.constant 0 : i32
    return %c0_i32, %c0_i32_0, %c0_i32_1 : i32, i32, i32
  }
  func.func @transform_9(%arg0: i32) -> (i32, i32, i32) {
    %c0_i32 = arith.constant 0 : i32
    %c0_i32_0 = arith.constant 0 : i32
    %c0_i32_1 = arith.constant 0 : i32
    %c0_i32_2 = arith.constant 0 : i32
    return %c0_i32, %c0_i32_0, %c0_i32_1 : i32, i32, i32
  }
  func.func @transform_10(%arg0: i32) -> (i32, i32) {
    %c0_i32 = arith.constant 0 : i32
    %c0_i32_0 = arith.constant 0 : i32
    %c0_i32_1 = arith.constant 0 : i32
    return %c0_i32, %c0_i32_0 : i32, i32
  }
  func.func @transform_11(%arg0: i32) -> (i32, i32) {
    %c0_i32 = arith.constant 0 : i32
    %c0_i32_0 = arith.constant 0 : i32
    %c0_i32_1 = arith.constant 0 : i32
    return %c0_i32, %c0_i32_0 : i32, i32
  }
  func.func @transform_12(%arg0: i32) -> (i32, i32) {
    %c0_i32 = arith.constant 0 : i32
    %c0_i32_0 = arith.constant 0 : i32
    %c0_i32_1 = arith.constant 0 : i32
    return %c0_i32, %c0_i32_0 : i32, i32
  }
  func.func @transform_13(%arg0: i32) -> (i32, i32) {
    %c0_i32 = arith.constant 0 : i32
    %c0_i32_0 = arith.constant 0 : i32
    %c0_i32_1 = arith.constant 0 : i32
    return %c0_i32, %c0_i32_0 : i32, i32
  }
  func.func @transform_14(%arg0: i32) -> (i32, i32) {
    %c0_i32 = arith.constant 0 : i32
    %c0_i32_0 = arith.constant 0 : i32
    %c0_i32_1 = arith.constant 0 : i32
    return %c0_i32, %c0_i32_0 : i32, i32
  }
  func.func @transform_15(%arg0: i32) -> (i32, i32) {
    %c0_i32 = arith.constant 0 : i32
    %c0_i32_0 = arith.constant 0 : i32
    %c0_i32_1 = arith.constant 0 : i32
    return %c0_i32, %c0_i32_0 : i32, i32
  }
  func.func @transform_16(%arg0: i32) -> (i32, i32) {
    %c0_i32 = arith.constant 0 : i32
    %c0_i32_0 = arith.constant 0 : i32
    %c0_i32_1 = arith.constant 0 : i32
    return %c0_i32, %c0_i32_0 : i32, i32
  }
  func.func @transform_17(%arg0: i32) -> (i32, i32, i32) {
    %c0_i32 = arith.constant 0 : i32
    %c0_i32_0 = arith.constant 0 : i32
    %c0_i32_1 = arith.constant 0 : i32
    return %arg0, %c0_i32, %c0_i32_0 : i32, i32, i32
  }
}

</mosaic_0001>

<bundles_post_ra>
// kernel: tpu_custom_call.1
= control target key start
LH: loop header
LB: loop body
LE: loop exit
PB: predicated region body
PF: predicated region fallthrough
CT: control target
= control target key end

     0   :  { %s5161_s0 = inlined_call_operand.vmem [shape: bf16[2,64,64], index: 0, kind: input, shape index: {}]   ;;  %s5162_s1 = inlined_call_operand.vmem [shape: f32[2,64,16], index: 1, kind: input, shape index: {}]   ;;  %s5163_s2 = inlined_call_operand.vmem [shape: s32[2,64,1], index: 2, kind: input, shape index: {}]   ;;  %s5164_s3 = inlined_call_operand.vmem [shape: s32[2,1,64], index: 3, kind: input, shape index: {}]   ;;  %s5165_s4 = inlined_call_operand.vmem [shape: s32[2,1,1], index: 4, kind: input, shape index: {}]   ;;  %s5166_s5 = inlined_call_operand.vmem [shape: f32[16,32], index: 5, kind: input, shape index: {}]   ;;  %s5167_s6 = inlined_call_operand.vmem [shape: f32[1,32], index: 6, kind: input, shape index: {}]   ;;  %s5168_s7 = inlined_call_operand.vmem [shape: f32[1,32,32], index: 7, kind: input, shape index: {}]   ;;  %s5169_s8 = inlined_call_operand.vmem [shape: f32[1,1,32], index: 8, kind: input, shape index: {}]   ;;  %s5170_s9 = inlined_call_operand.vmem [shape: f32[2,32,1], index: 9, kind: input, shape index: {}]   ;;  %s5171_s10 = inlined_call_operand.vmem [shape: f32[32,32], index: 10, kind: input, shape index: {}]   ;;  %s5172_s11 = inlined_call_operand.vmem [shape: f32[32,32], index: 11, kind: input, shape index: {}]   ;;  %s5173_s12 = inlined_call_operand.vmem [shape: f32[1,32], index: 12, kind: input, shape index: {}]   ;;  %s5174_s13 = inlined_call_operand.vmem [shape: f32[32,16], index: 13, kind: input, shape index: {}]   ;;  %s5175_s14 = inlined_call_operand.vmem [shape: f32[1,16], index: 14, kind: input, shape index: {}]   ;;  %s5176_s15 = inlined_call_operand.vmem [shape: f32[16,2], index: 15, kind: input, shape index: {}]   ;;  %s5177_s16 = inlined_call_operand.vmem [shape: f32[1,2], index: 16, kind: input, shape index: {}]   ;;  %s5178_s17 = inlined_call_operand.hbm [shape: f32[2,2,2], index: 17, kind: output, shape index: {}]  }
   0x1   :  { %5229 = sst [smem:[#allocation25_spill]] %s5161_s0 }
   0x2   :  { %5230 = sst [smem:[#allocation26_spill]] %s5162_s1 }
   0x3   :  { %5231 = sst [smem:[#allocation27_spill]] %s5163_s2 }
   0x4   :  { %22 = vsyncpa [#allocation3], 0 }
   0x5   :  { %24 = vsyncpa [#allocation3 + $0x1], 0  ;;  %s3622_s24 = smov 0   ;;  %s3624_s25 = smov 0  }
   0x6   :  { %s3626_s26 = smov 0   ;;  %s3628_s27 = smov 0  }
   0x7 LB: > { %5232 = sst [smem:[#allocation5_spill]] %s3512_s24  ;;  %s3643_s28 = sadd.s32 4294967295, %s3524_s27   ;;  %s3524_s27 = sphi %s3628_s27, %s5384_s27   ;;  %s3520_s26 = sphi %s3626_s26, %s5386_s26   ;;  %s3516_s25 = sphi %s3624_s25, %s5388_s25   ;;  %s3512_s24 = sphi %s3622_s24, %s5387_s24  }
   0x8   : > { %5233 = sst [smem:[#allocation6_spill]] %s3520_s26  ;;  %s3117_s29 = sadd.s32 4294967294, %s3524_s27  }
   0x9   : > { %s3647_s0 = sadd.s32 1, %s3524_s27   ;;  %s414_s30 = sadd.s32 1, %s3520_s26 }
   0xa   : > { %5234 = sst [smem:[#allocation7_spill]] %s3647_s0  ;;  %s411_s18 = ssub.s32 %s3524_s27, %s3647_s0 }
   0xb   : > { %p424_p0 = scmp.ne.s32.totalorder %s3520_s26, %s3516_s25  ;;  %p412_p1 = scmp.eq.s32.totalorder %s411_s18, 0 }
   0xc   : > { %p425_p2 = scmp.eq.s32.totalorder %s3643_s28, 1  ;;  %p430_p3 = scmp.ne.s32.totalorder %s3516_s25, %s3512_s24 }
   0xd   : > { %p431_p4 = scmp.eq.s32.totalorder %s3117_s29, 1  ;;  %p3120_p7 = scmp.ge.s32.totalorder %s3524_s27, 1 }
   0xe   : > { %s3658_s19 = scalar_select %p412_p1, %s3520_s26, %s414_s30  }
   0xf   : > { %p3660_p5 = por %p425_p2, %p424_p0  ;;  %p3664_p6 = por %p431_p4, %p430_p3 }
  0x10   : > { %5235 = sst [smem:[#allocation8_spill]] %s3658_s19  ;;  %p518_p8 = scmp.lt.s32.totalorder %s3524_s27, 3 }
  0x11   : > { %s5237_s20 = scalar_select %p3664_p6, 1, 0 }
  0x12   : > { %p519_p9 = pnand %p3120_p7, %p518_p8 }
  0x13   : > { %5238 = sst [smem:[#allocation9_spill]] %s5237_s20 }
  0x14   : > { %522 = sbr.rel (%p519_p9) target bundleno = 3301 (0xce5), region = 88 }
  0x19   : > { %p583_p10 = scmp.lt.s32.totalorder %s3643_s28, 1  ;;  %v3526_v0 = vmov 1065369472   ;;  %s5239_s26 = sld [smem:[#allocation25_spill]]  ;;  %vm5228_vm0 = vcmask 523264   ;;  %v752_v3 = vld [vmem:[%s5166_s5 + $0x8] sm:$0xff] }
  0x1a   : > { %795 = vmatpush.bf16.msra.mxu0 %v3526_v0  ;;  %s5240_s23 = sld [smem:[#allocation26_spill]]  ;;  %v751_v4 = vld [vmem:[%s5166_s5] sm:$0xff]  ;;  %963 = vmatpush.msra.mxu1 %v752_v3  ;;  %vm5184_vm1 = vcmask 130048   ;;  %v5197_v15 = vmov 0   ;;  %s580_s18 = sand.u32 1, %s3516_s25  }
  0x1b   : > { %s3673_s21 = scalar_select %p583_p10, %s3643_s28, 1  ;;  %3369 = vset.pattern.permute.xlu2 %v5197_v15  ;;  %3368 = vset.pattern.permute.xlu1 %v5197_v15 }
  0x1c   : > { %964 = vmatpush.msra.mxu1 %v751_v4  ;;  %3367 = vset.pattern.permute.xlu0 %v5197_v15  ;;  %s5241_s2 = sld [smem:[#allocation27_spill]]  ;;  %s3121_s24 = sshll.u32 %s580_s18, 1 }
  0x1d   : > { %s3315_s30 = sshll.u32 %s3673_s21, 5  ;;  %s3312_s20 = sshll.u32 %s3643_s28, 1 }
  0x1e   : > { %796 = vmatpush.bf16.msra.mxu0 %v3526_v0 }
  0x1f   : > { %s3685_s0 = scalar_lea.vmem %s5239_s26, %s3315_s30  ;;  %s3316_s26 = sshll.u32 %s3673_s21, 6 }
  0x20   : > { %v3688_v1 = vld [vmem:[%s3685_s0] sm:$0xff]  ;;  %v3699_v2 = vld [vmem:[%s3685_s0 + $0x8] sm:$0xff]  ;;  %s3706_s30 = scalar_lea.vmem %s5240_s23, %s3316_s26  ;;  %v3720_v7 = vld [vmem:[%s3685_s0 + $0x10] sm:$0xff]  ;;  %s582_s23 = scalar_lea.vmem [#allocation2], %s3121_s24 }
  0x21   : > { %v611_v5 = vld [vmem:[%s3706_s30] sm:$0xff]  ;;  %v612_v6 = vld [vmem:[%s3706_s30 + $0x8] sm:$0xff]  ;;  %v3726_v8 = vld [vmem:[%s3685_s0 + $0x18] sm:$0xff]  ;;  %s3482_s24 = scalar_lea.hbm %s5178_s17, 4 }
  0x22   : > { %797 = vmatpush.bf16.msra.mxu0 %v3526_v0  ;;  %3157 = vmatmul.msk.f32.vlgmr.msra.gmra.mxu1 %vm5184_vm1, %v611_v5  ;;  %v613_v9 = vld [vmem:[%s3706_s30 + $0x10] sm:$0xff]  ;;  %v614_v10 = vld [vmem:[%s3706_s30 + $0x18] sm:$0xff]  ;;  %v615_v11 = vld [vmem:[%s3706_s30 + $0x20] sm:$0xff]  ;;  %s3924_s22 = scalar_lea.vmem %s5241_s2, %s3316_s26  ;;  %s3020_s26 = scalar_lea.hbm %s5178_s17, %s3312_s20 }
  0x23   : > { %v616_v12 = vld [vmem:[%s3706_s30 + $0x28] sm:$0xff]  ;;  %v617_v14 = vld [vmem:[%s3706_s30 + $0x30] sm:$0xff]  ;;  %v618_v42 = vld [vmem:[%s3706_s30 + $0x38] sm:$0xff]  ;;  %s5242_s30 = scalar_lea.vmem %s5164_s3, %s3673_s21  ;;  %s3010_s21 = scalar_lea.sflag [#allocation3], %s580_s18 }
  0x26   : > { %798 = vmatpush.bf16.msra.mxu0 %v3526_v0 }
  0x29   : > { %3153 = vmatmul.msk.bf16.vlgmr.msra.gmra.mxu0 %vm5228_vm0, %v3688_v1 }
  0x2a   : > { %1453 = vmatpush.bf16.msrb.mxu0 %v3526_v0  ;;  %3158 = vmatmul.msk.f32.gmra.mxu1 %vm5184_vm1, %v612_v6 }
  0x2e   : > { %1454 = vmatpush.bf16.msrb.mxu0 %v3526_v0 }
  0x32   : > { %1455 = vmatpush.bf16.msrb.mxu0 %v3526_v0  ;;  %3159 = vmatmul.msk.f32.gmra.mxu1 %vm5184_vm1, %v613_v9 }
  0x36   : > { %1456 = vmatpush.bf16.msrb.mxu0 %v3526_v0 }
  0x39   : > { %3154 = vmatmul.msk.bf16.gmra.mxu0 %vm5228_vm0, %v3699_v2 }
  0x3a   : > { %3160 = vmatmul.msk.f32.gmra.mxu1 %vm5184_vm1, %v614_v10 }
  0x42   : > { %3161 = vmatmul.msk.f32.gmra.mxu1 %vm5184_vm1, %v615_v11 }
  0x49   : > { %3155 = vmatmul.msk.bf16.gmra.mxu0 %vm5228_vm0, %v3720_v7 }
  0x4a   : > { %3162 = vmatmul.msk.f32.gmra.mxu1 %vm5184_vm1, %v616_v12 }
  0x52   : > { %3163 = vmatmul.msk.f32.gmra.mxu1 %vm5184_vm1, %v617_v14 }
  0x59   : > { %3156 = vmatmul.msk.bf16.gmra.mxu0 %vm5228_vm0, %v3726_v8 }
  0x5a   : > { %3164 = vmatmul.msk.f32.gmra.mxu1 %vm5184_vm1, %v618_v42 }
  0xa6   : > { %v800_v13 = vpop.f32.mrf.mxu0 }
  0xa7   : > { %v3743_v17 = vadd.f32 1.0, %v800_v13 }
  0xa9   : > { %v828_v18 = vmax.f32 %v3743_v17, 1e-12  ;;  %vm820_vm13 = vcmp.gt.f32.partialorder %v3743_v17, 0.0 }
  0xab   : > { %3378 = vrsqrt.f32 %v828_v18  ;;  %vm842_vm10 = vweird.f32 %v828_v18 }
  0xae   : > { %v802_v16 = vpop.f32.mrf.mxu0 }
  0xaf   : > { %v3749_v30 = vadd.f32 1.0, %v802_v16 }
  0xb1   : > { %v3746_v23 = vpop.eup %3378  ;;  %v3755_v37 = vmax.f32 %v3749_v30, 1e-12 }
  0xb2   : > { %v837_v27 = vmul.f32 %v3746_v23, %v828_v18  ;;  %vm843_vm7 = vweird.f32 %v3746_v23 }
  0xb3   : > { %vm844_vm12 = vmor %vm842_vm10, %vm843_vm7  ;;  %vm852_vm10 = vweird.f32 %v3755_v37 }
  0xb4   : > { %v838_v31 = vmul.f32 %v3746_v23, %v837_v27 }
  0xb6   : > { %v805_v19 = vpop.f32.mrf.mxu0  ;;  %v839_v39 = vmul.f32 0.5, %v838_v31 }
  0xb7   : > { %v806_v20 = vadd.f32 1.0, %v805_v19 }
  0xb8   : > { %v840_v46 = vsub.f32 1.5, %v839_v39 }
  0xb9   : > { %v830_v21 = vmax.f32 %v806_v20, 1e-12  ;;  %vm822_vm5 = vcmp.gt.f32.partialorder %v806_v20, 0.0 }
  0xba   : > { %v841_v53 = vmul.f32 %v3746_v23, %v840_v46 }
  0xbb   : > { %3380 = vrsqrt.f32 %v830_v21  ;;  %vm862_vm3 = vweird.f32 %v830_v21 }
  0xbc   : > { %v845_v60 = vsel %vm844_vm12, %v3746_v23, %v841_v53 }
  0xbd   : > { %v3775_v6 = vsel %vm820_vm13, %v845_v60, 0.0 }
  0xbe   : > { %v807_v22 = vpop.f32.mrf.mxu0  ;;  %v1079_v16 = vmul.f32 %v3775_v6, %v3775_v6 }
  0xbf   : > { %v808_v24 = vadd.f32 1.0, %v807_v22 }
  0xc1   : > { %v3381_v25 = vpop.eup %3380  ;;  %v831_v26 = vmax.f32 %v808_v24, 1e-12  ;;  %vm823_vm11 = vcmp.gt.f32.partialorder %v808_v24, 0.0 }
  0xc2   : > { %v857_v28 = vmul.f32 %v3381_v25, %v830_v21  ;;  %vm863_vm2 = vweird.f32 %v3381_v25 }
  0xc3   : > { %3382 = vrsqrt.f32 %v831_v26  ;;  %vm864_vm4 = vmor %vm862_vm3, %vm863_vm2  ;;  %vm872_vm8 = vweird.f32 %v831_v26 }
  0xc4   : > { %v858_v29 = vmul.f32 %v3381_v25, %v857_v28 }
  0xc6   : > { %v810_v32 = vpop.f32.mrf.mxu0  ;;  %v859_v33 = vmul.f32 0.5, %v858_v29 }
  0xc7   : > { %v3752_v34 = vadd.f32 1.0, %v810_v32 }
  0xc8   : > { %v860_v35 = vsub.f32 1.5, %v859_v33 }
  0xc9   : > { %v3383_v36 = vpop.eup %3382  ;;  %v832_v38 = vmax.f32 %v3752_v34, 1e-12  ;;  %vm824_vm3 = vcmp.gt.f32.partialorder %v3752_v34, 0.0 }
  0xca   : > { %v867_v40 = vmul.f32 %v3383_v36, %v831_v26  ;;  %v861_v41 = vmul.f32 %v3381_v25, %v860_v35  ;;  %vm873_vm6 = vweird.f32 %v3383_v36 }
  0xcb   : > { %3384 = vrsqrt.f32 %v832_v38  ;;  %vm874_vm9 = vmor %vm872_vm8, %vm873_vm6  ;;  %vm882_vm15 = vweird.f32 %v832_v38 }
  0xcc   : > { %v868_v43 = vmul.f32 %v3383_v36, %v867_v40  ;;  %v865_v44 = vsel %vm864_vm4, %v3381_v25, %v861_v41  ;;  %3386 = vrsqrt.f32 %v3755_v37 }
  0xcd   : > { %v3761_v45 = vsel %vm822_vm5, %v865_v44, 0.0 }
  0xce   : > { %v869_v47 = vmul.f32 0.5, %v868_v43  ;;  %v812_v48 = vpop.f32.mrf.mxu0  ;;  %1002 = vperm.xlu2 %3369, %v3761_v45  }
  0xcf   : > { %v3764_v49 = vadd.f32 1.0, %v812_v48 }
  0xd0   : > { %v870_v50 = vsub.f32 1.5, %v869_v47 }
  0xd1   : > { %v3385_v51 = vpop.eup %3384  ;;  %v833_v52 = vmax.f32 %v3764_v49, 1e-12  ;;  %vm825_vm7 = vcmp.gt.f32.partialorder %v3764_v49, 0.0  ;;  %v1081_v49 = vmul.f32 %v3761_v45, %v3761_v45 }
  0xd2   : > { %v877_v54 = vmul.f32 %v3385_v51, %v832_v38  ;;  %v871_v55 = vmul.f32 %v3383_v36, %v870_v50  ;;  %v3769_v56 = vpop.eup %3386  ;;  %vm883_vm14 = vweird.f32 %v3385_v51 }
  0xd3   : > { %3388 = vrsqrt.f32 %v833_v52  ;;  %v847_v61 = vmul.f32 %v3769_v56, %v3755_v37  ;;  %vm884_vm2 = vmor %vm882_vm15, %vm883_vm14  ;;  %vm892_vm5 = vweird.f32 %v833_v52  ;;  %vm853_vm8 = vweird.f32 %v3769_v56 }
  0xd4   : > { %v875_v57 = vsel %vm874_vm9, %v3383_v36, %v871_v55  ;;  %v878_v58 = vmul.f32 %v3385_v51, %v877_v54  ;;  %vm821_vm15 = vcmp.gt.f32.partialorder %v3749_v30, 0.0  ;;  %v966_v55 = vpop.f32.mrf.mxu1 }
  0xd5   : > { %v919_v59 = vsel %vm823_vm11, %v875_v57, 0.0  ;;  %v848_v12 = vmul.f32 %v3769_v56, %v847_v61  ;;  %vm854_vm11 = vmor %vm852_vm10, %vm853_vm8 }
  0xd6   : > { %v815_v62 = vpop.f32.mrf.mxu0  ;;  %1007 = vperm.xlu2 %3369, %v919_v59   ;;  %v879_v63 = vmul.f32 0.5, %v878_v58  ;;  %v1082_v28 = vmul.f32 %v919_v59, %v919_v59 }
  0xd7   : > { %v816_v3 = vadd.f32 1.0, %v815_v62  ;;  %v849_v20 = vmul.f32 0.5, %v848_v12 }
  0xd8   : > { %v880_v4 = vsub.f32 1.5, %v879_v63 }
  0xd9   : > { %v3389_v5 = vpop.eup %3388  ;;  %v834_v9 = vmax.f32 %v816_v3, 1e-12  ;;  %v850_v27 = vsub.f32 1.5, %v849_v20  ;;  %vm826_vm14 = vcmp.gt.f32.partialorder %v816_v3, 0.0 }
  0xda   : > { %v887_v10 = vmul.f32 %v3389_v5, %v833_v52  ;;  %v881_v11 = vmul.f32 %v3385_v51, %v880_v4  ;;  %vm893_vm4 = vweird.f32 %v3389_v5 }
  0xdb   : > { %3390 = vrsqrt.f32 %v834_v9  ;;  %vm894_vm6 = vmor %vm892_vm5, %vm893_vm4  ;;  %v851_v34 = vmul.f32 %v3769_v56, %v850_v27  ;;  %vm902_vm12 = vweird.f32 %v834_v9 }
  0xdc   : > { %v888_v13 = vmul.f32 %v3389_v5, %v887_v10  ;;  %v885_v14 = vsel %vm884_vm2, %v3385_v51, %v881_v11 }
  0xdd   : > { %v3781_v17 = vsel %vm824_vm3, %v885_v14, 0.0  ;;  %v855_v40 = vsel %vm854_vm11, %v3769_v56, %v851_v34  ;;  %v969_v56 = vpop.f32.mrf.mxu1 }
  0xde   : > { %v889_v18 = vmul.f32 0.5, %v888_v13  ;;  %v817_v19 = vpop.f32.mrf.mxu0  ;;  %1012 = vperm.xlu1 %3368, %v3781_v17   ;;  %1089 = vperm.xlu2 %3369, %v1079_v16   ;;  %v917_v44 = vsel %vm821_vm15, %v855_v40, 0.0  ;;  %v1083_v53 = vmul.f32 %v3781_v17, %v3781_v17 }
  0xdf   : > { %v818_v21 = vadd.f32 1.0, %v817_v19  ;;  %v1080_v52 = vmul.f32 %v917_v44, %v917_v44 }
  0xe0   : > { %v890_v22 = vsub.f32 1.5, %v889_v18 }
  0xe1   : > { %v3391_v23 = vpop.eup %3390  ;;  %v835_v24 = vmax.f32 %v818_v21, 1e-12  ;;  %vm827_vm5 = vcmp.gt.f32.partialorder %v818_v21, 0.0 }
  0xe2   : > { %v897_v25 = vmul.f32 %v3391_v23, %v834_v9  ;;  %v891_v26 = vmul.f32 %v3389_v5, %v890_v22  ;;  %vm903_vm9 = vweird.f32 %v3391_v23 }
  0xe3   : > { %3392 = vrsqrt.f32 %v835_v24  ;;  %vm904_vm13 = vmor %vm902_vm12, %vm903_vm9  ;;  %vm912_vm3 = vweird.f32 %v835_v24 }
  0xe4   : > { %v895_v29 = vsel %vm894_vm6, %v3389_v5, %v891_v26  ;;  %v898_v31 = vmul.f32 %v3391_v23, %v897_v25  ;;  %v756_v25 = vld [vmem:[%s5170_s9 + $0x10] sm:$0xff]  ;;  %vm5193_vm6 = vcmask 261120  }
  0xe5   : > { %v921_v32 = vsel %vm825_vm7, %v895_v29, 0.0  ;;  %v3795_v45 = vpop.f32.mrf.mxu1 }
  0xe6   : > { %1017 = vperm.xlu1 %3368, %v921_v32   ;;  %1104 = vperm.xlu2 %3369, %v1082_v28   ;;  %v899_v33 = vmul.f32 0.5, %v898_v31  ;;  %v1084_v30 = vmul.f32 %v921_v32, %v921_v32  ;;  %v3371_v28 = vld [vmem:[%s5167_s6] ss:$0 sm:$0xff] }
  0xe8   : > { %v900_v35 = vsub.f32 1.5, %v899_v33 }
  0xe9   : > { %v3393_v36 = vpop.eup %3392 }
  0xea   : > { %v907_v38 = vmul.f32 %v3393_v36, %v835_v24  ;;  %v901_v39 = vmul.f32 %v3391_v23, %v900_v35  ;;  %vm913_vm2 = vweird.f32 %v3393_v36  ;;  %v757_v24 = vld [vmem:[%s5170_s9 + $0x18] sm:$0xff] }
  0xeb   : > { %vm914_vm4 = vmor %vm912_vm3, %vm913_vm2  ;;  %1199 = vmatpush.msra.mxu3 %v757_v24 }
  0xec   : > { %v908_v41 = vmul.f32 %v3393_v36, %v907_v38  ;;  %v905_v42 = vsel %vm904_vm13, %v3391_v23, %v901_v39 }
  0xed   : > { %v922_v43 = vsel %vm826_vm14, %v905_v42, 0.0  ;;  %v3797_v57 = vpop.f32.mrf.mxu1  ;;  %1200 = vmatpush.msra.mxu3 %v756_v25 }
  0xee   : > { %v909_v46 = vmul.f32 0.5, %v908_v41  ;;  %1022 = vperm.xlu0 %3367, %v922_v43   ;;  %v1085_v47 = vmul.f32 %v922_v43, %v922_v43  ;;  %997 = vperm.xlu1 %3368, %v917_v44  }
  0xf0   : > { %1119 = vperm.xlu2 %3369, %v1085_v47   ;;  %v910_v37 = vsub.f32 1.5, %v909_v46 }
  0xf2   : > { %v911_v48 = vmul.f32 %v3393_v36, %v910_v37 }
  0xf4   : > { %v915_v50 = vsel %vm914_vm4, %v3393_v36, %v911_v48 }
  0xf5   : > { %v923_v51 = vsel %vm827_vm5, %v915_v50, 0.0  ;;  %v3799_v58 = vpop.f32.mrf.mxu1 }
  0xf6   : > { %1027 = vperm.xlu0 %3367, %v923_v51   ;;  %1099 = vperm.xlu1 %3368, %v1081_v49   ;;  %v1086_v54 = vmul.f32 %v923_v51, %v923_v51 }
  0xfd   : > { %v3801_v59 = vpop.f32.mrf.mxu1 }
  0xfe   : > { %1114 = vperm.xlu1 %3368, %v1084_v30   ;;  %992 = vperm.xlu0 %3367, %v3775_v6  }
 0x105   : > { %v3803_v60 = vpop.f32.mrf.mxu1 }
 0x106   : > { %1094 = vperm.xlu0 %3367, %v1080_v52  }
 0x10d   : > { %v3809_v3 = vpop.f32.mrf.mxu1 }
 0x10e   : > { %1109 = vperm.xlu0 %3367, %v1083_v53  }
 0x116   : > { %1124 = vperm.xlu0 %3367, %v1086_v54  }
 0x128   : > { %v1003_v63 = vpop.permute.xlu2 %1002 }
 0x129   : > { %v1032_v18 = vmul.f32 %v1003_v63, %v3795_v45 }
 0x130   : > { %v1008_v12 = vpop.permute.xlu2 %1007 }
 0x131   : > { %v1033_v14 = vmul.f32 %v1008_v12, %v3797_v57 }
 0x133   : > { %v1039_v21 = vpack.c.bf16 %v1033_v14, %v1032_v18 }
 0x150   : > { %v3805_v61 = vpop.permute.xlu1 %1012 }
 0x151   : > { %v1034_v13 = vmul.f32 %v3805_v61, %v3799_v58 }
 0x158   : > { %v3811_v4 = vpop.permute.xlu1 %1017 }
 0x159   : > { %v1035_v10 = vmul.f32 %v3811_v4, %v3801_v59 }
 0x15b   : > { %v1040_v16 = vpack.c.bf16 %v1035_v10, %v1034_v13 }
 0x160   : > { %v3807_v62 = vpop.permute.xlu0 %1022  ;;  %v998_v19 = vpop.permute.xlu1 %997 }
 0x161   : > { %v1036_v6 = vmul.f32 %v3807_v62, %v3803_v60  ;;  %v1031_v22 = vmul.f32 %v998_v19, %v969_v56 }
 0x168   : > { %v3813_v5 = vpop.permute.xlu0 %1027  ;;  %v1100_v39 = vpop.permute.xlu1 %1099 }
 0x169   : > { %v1037_v9 = vmul.f32 %v3813_v5, %v3809_v3  ;;  %v1129_v42 = vmul.f32 %v1100_v39, %v3795_v45  ;;  %v625_v39 = vld [vmem:[%s3924_s22 + $0x30] sm:$0xff] }
 0x16b   : > { %v1041_v11 = vpack.c.bf16 %v1037_v9, %v1036_v6 }
 0x16d   : > { %1046 = vmatpush.bf16.msra.mxu2 %v1041_v11 }
 0x170   : > { %v993_v17 = vpop.permute.xlu0 %992 }
 0x171   : > { %1047 = vmatpush.bf16.msra.mxu2 %v1040_v16  ;;  %v1030_v20 = vmul.f32 %v993_v17, %v966_v55 }
 0x173   : > { %v1038_v23 = vpack.c.bf16 %v1031_v22, %v1030_v20 }
 0x175   : > { %1048 = vmatpush.bf16.msra.mxu2 %v1039_v21 }
 0x178   : > { %v1095_v32 = vpop.permute.xlu0 %1094 }
 0x179   : > { %1049 = vmatpush.bf16.msra.mxu2 %v1038_v23  ;;  %v1128_v35 = vmul.f32 %v1095_v32, %v969_v56 }
 0x17c   : > { %3165 = vmatmul.msk.bf16.vlgmr.msra.gmra.mxu2 %vm5228_vm0, %v3688_v1  ;;  %v755_v1 = vld [vmem:[%s5170_s9 + $0x8] sm:$0xff] }
 0x17d   : > { %1201 = vmatpush.msra.mxu3 %v755_v1 }
 0x180   : > { %v1110_v52 = vpop.permute.xlu0 %1109 }
 0x188   : > { %v1125_v18 = vpop.permute.xlu0 %1124 }
 0x189   : > { %v1134_v21 = vmul.f32 %v1125_v18, %v3809_v3  ;;  %v4033_v18 = vld [vmem:[%s5242_s30] ss:$0 sm:$0xff]  ;;  %s3022_s30 = sshll.u32 %s582_s23, 4  ;;  %s3023_s30 = int_to_ptr.vmem [resolvable:$true] %s3022_s30 }
 0x18c   : > { %3166 = vmatmul.msk.bf16.gmra.mxu2 %vm5228_vm0, %v3699_v2  ;;  %v754_v2 = vld [vmem:[%s5170_s9] sm:$0xff] }
 0x18d   : > { %1202 = vmatpush.msra.mxu3 %v754_v2 }
 0x18f   : > { %1392 = vmatpush.bf16.msrb.mxu3 %v3526_v0 }
 0x193   : > { %1393 = vmatpush.bf16.msrb.mxu3 %v3526_v0 }
 0x197   : > { %1394 = vmatpush.bf16.msrb.mxu3 %v3526_v0 }
 0x19b   : > { %1395 = vmatpush.bf16.msrb.mxu3 %v3526_v0 }
 0x19c   : > { %3167 = vmatmul.msk.bf16.gmra.mxu2 %vm5228_vm0, %v3720_v7  ;;  %v1090_v7 = vpop.permute.xlu2 %1089 }
 0x19d   : > { %v1127_v26 = vmul.f32 %v1090_v7, %v966_v55  ;;  %v1131_v55 = vmul.f32 %v1110_v52, %v3799_v58 }
 0x1a4   : > { %v1105_v47 = vpop.permute.xlu2 %1104 }
 0x1a5   : > { %v1130_v49 = vmul.f32 %v1105_v47, %v3797_v57  ;;  %v623_v47 = vld [vmem:[%s3924_s22 + $0x20] sm:$0xff] }
 0x1ac   : > { %3168 = vmatmul.msk.bf16.gmra.mxu2 %vm5228_vm0, %v3726_v8 }
 0x1ff   : > { %v1051_v8 = vpop.f32.mrf.mxu2 }
 0x200   : > { %v1071_v27 = vmul.f32 %v1051_v8, %v993_v17 }
 0x202   : > { %v1135_v29 = vadd.f32 %v1127_v26, %v1071_v27 }
 0x204   : > { %v3852_v31 = vadd.f32 %v3371_v28, %v1135_v29  ;;  %v619_v29 = vld [vmem:[%s3924_s22] sm:$0xff] }
 0x206   : > { %v5199_v33 = vmax.f32 %v3852_v31, 0.0 }
 0x207   : > { %v1053_v34 = vpop.f32.mrf.mxu2 }
 0x208   : > { %v1072_v36 = vmul.f32 %v1053_v34, %v998_v19  ;;  %3169 = vmatmul.msk.f32.vlgmr.msra.gmra.mxu3 %vm5193_vm6, %v5199_v33 }
 0x20a   : > { %v1136_v0 = vadd.f32 %v1128_v35, %v1072_v36  ;;  %v622_v35 = vld [vmem:[%s3924_s22 + $0x18] sm:$0xff] }
 0x20c   : > { %v3858_v38 = vadd.f32 %v3371_v28, %v1136_v0 }
 0x20e   : > { %v5200_v40 = vmax.f32 %v3858_v38, 0.0 }
 0x20f   : > { %v1056_v41 = vpop.f32.mrf.mxu2 }
 0x210   : > { %v1073_v43 = vmul.f32 %v1056_v41, %v1003_v63  ;;  %3170 = vmatmul.msk.f32.gmra.mxu3 %vm5193_vm6, %v5200_v40  ;;  %v1115_v63 = vpop.permute.xlu1 %1114  ;;  %v621_v41 = vld [vmem:[%s3924_s22 + $0x10] sm:$0xff] }
 0x211   : > { %v1132_v10 = vmul.f32 %v1115_v63, %v3801_v59 }
 0x212   : > { %v1137_v44 = vadd.f32 %v1129_v42, %v1073_v43  ;;  %v624_v43 = vld [vmem:[%s3924_s22 + $0x28] sm:$0xff] }
 0x214   : > { %v3865_v46 = vadd.f32 %v3371_v28, %v1137_v44  ;;  %v620_v44 = vld [vmem:[%s3924_s22 + $0x8] sm:$0xff] }
 0x216   : > { %v5201_v37 = vmax.f32 %v3865_v46, 0.0 }
 0x217   : > { %v1058_v48 = vpop.f32.mrf.mxu2 }
 0x218   : > { %v1074_v50 = vmul.f32 %v1058_v48, %v1008_v12  ;;  %3171 = vmatmul.msk.f32.gmra.mxu3 %vm5193_vm6, %v5201_v37  ;;  %v1120_v12 = vpop.permute.xlu2 %1119  ;;  %v626_v48 = vld [vmem:[%s3924_s22 + $0x38] sm:$0xff] }
 0x219   : > { %v1133_v16 = vmul.f32 %v1120_v12, %v3803_v60 }
 0x21a   : > { %v1138_v51 = vadd.f32 %v1130_v49, %v1074_v50  ;;  %v630_v49 = vlaneseq }
 0x21c   : > { %v3872_v30 = vadd.f32 %v3371_v28, %v1138_v51  ;;  %v3949_v50 = vshrl.u32 %v630_v49, 7  ;;  %v3954_v52 = vand.u32 127, %v630_v49 }
 0x21e   : > { %v5202_v53 = vmax.f32 %v3872_v30, 0.0  ;;  %v3952_v51 = vadd.s32 56, %v3949_v50  ;;  %vm5185_vm14 = vcmp.eq.s32.totalorder %v3949_v50, %v3954_v52 }
 0x21f   : > { %v1061_v54 = vpop.f32.mrf.mxu2 }
 0x220   : > { %v1075_v56 = vmul.f32 %v1061_v54, %v3805_v61  ;;  %3172 = vmatmul.msk.f32.gmra.mxu3 %vm5193_vm6, %v5202_v53  ;;  %vm5192_vm7 = vcmp.eq.s32.totalorder %v3952_v51, %v3954_v52 }
 0x222   : > { %v1139_v45 = vadd.f32 %v1131_v55, %v1075_v56  ;;  %v3959_v55 = vadd.s32 48, %v3949_v50 }
 0x224   : > { %v3880_v57 = vadd.f32 %v3371_v28, %v1139_v45  ;;  %v3966_v45 = vadd.s32 40, %v3949_v50  ;;  %vm5191_vm8 = vcmp.eq.s32.totalorder %v3959_v55, %v3954_v52 }
 0x226   : > { %v5203_v6 = vmax.f32 %v3880_v57, 0.0  ;;  %vm5190_vm9 = vcmp.eq.s32.totalorder %v3966_v45, %v3954_v52 }
 0x227   : > { %v1063_v9 = vpop.f32.mrf.mxu2 }
 0x228   : > { %v1076_v11 = vmul.f32 %v1063_v9, %v3811_v4  ;;  %3173 = vmatmul.msk.f32.gmra.mxu3 %vm5193_vm6, %v5203_v6  ;;  %v3979_v9 = vadd.s32 32, %v3949_v50 }
 0x22a   : > { %v1140_v58 = vadd.f32 %v1132_v10, %v1076_v11  ;;  %v3986_v10 = vadd.s32 24, %v3949_v50  ;;  %vm5189_vm10 = vcmp.eq.s32.totalorder %v3979_v9, %v3954_v52 }
 0x22c   : > { %v3888_v61 = vadd.f32 %v3371_v28, %v1140_v58  ;;  %v3997_v58 = vadd.s32 16, %v3949_v50  ;;  %vm5188_vm11 = vcmp.eq.s32.totalorder %v3986_v10, %v3954_v52 }
 0x22e   : > { %v1159_v13 = vmax.f32 %v3888_v61, 0.0  ;;  %vm5187_vm12 = vcmp.eq.s32.totalorder %v3997_v58, %v3954_v52  ;;  %v5280_v61 = vmax.f32 %v3865_v46, 0.0  ;;  %v1857_v46 = vld [vmem:[%s5168_s7 + $0x18] sm:$0xff] }
 0x22f   : > { %v1066_v14 = vpop.f32.mrf.mxu2 }
 0x230   : > { %v1077_v17 = vmul.f32 %v1066_v14, %v3807_v62  ;;  %3174 = vmatmul.msk.f32.gmra.mxu3 %vm5193_vm6, %v1159_v13 }
 0x232   : > { %v1141_v59 = vadd.f32 %v1133_v16, %v1077_v17  ;;  %v4012_v16 = vadd.s32 8, %v3949_v50 }
 0x234   : > { %v3896_v4 = vadd.f32 %v3371_v28, %v1141_v59  ;;  %vm5186_vm13 = vcmp.eq.s32.totalorder %v4012_v16, %v3954_v52 }
 0x236   : > { %v1160_v19 = vmax.f32 %v3896_v4, 0.0  ;;  %v5278_v4 = vmax.f32 %v3872_v30, 0.0  ;;  %v5284_v30 = vmax.f32 %v3852_v31, 0.0  ;;  %v1855_v31 = vld [vmem:[%s5168_s7 + $0x8] sm:$0xff] }
 0x237   : > { %v1068_v20 = vpop.f32.mrf.mxu2 }
 0x238   : > { %v1078_v22 = vmul.f32 %v1068_v20, %v3813_v5  ;;  %3175 = vmatmul.msk.f32.gmra.mxu3 %vm5193_vm6, %v1160_v19 }
 0x23a   : > { %v1142_v60 = vadd.f32 %v1134_v21, %v1078_v22  ;;  %v5208_v21 = vmov 1.0   ;;  %v5204_v22 = vmov 0.0  }
 0x23c   : > { %v3904_v62 = vadd.f32 %v3371_v28, %v1142_v60 }
 0x23e   : > { %v1161_v23 = vmax.f32 %v3904_v62, 0.0 }
 0x240   : > { %3176 = vmatmul.msk.f32.gmra.mxu3 %vm5193_vm6, %v1161_v23  ;;  %vm5194_vm6 = vcmp.lt.s32.totalorder %v3954_v52, %v3986_v10 }
 0x28b   : > { %v1204_v24 = vpop.f32.mrf.mxu3 }
 0x293   : > { %v1207_v25 = vpop.f32.mrf.mxu3 }
 0x29b   : > { %v1210_v1 = vpop.f32.mrf.mxu3 }
 0x2a3   : > { %v1213_v2 = vpop.f32.mrf.mxu3 }
 0x2ab   : > { %v1216_v3 = vpop.f32.mrf.mxu3 }
 0x2b3   : > { %v1219_v5 = vpop.f32.mrf.mxu3 }
 0x2b4   : > { %3394 = vtanh.f32 %v1219_v5 }
 0x2b5   : > { %3396 = vtanh.f32 %v1210_v1 }
 0x2ba   : > { %v3910_v7 = vpop.eup %3394 }
 0x2bb   : > { %1263 = vperm.xlu0 %3367, %v3910_v7   ;;  %v1222_v8 = vpop.f32.mrf.mxu3  ;;  %v3913_v26 = vpop.eup %3396 }
 0x2bc   : > { %3398 = vtanh.f32 %v1222_v8 }
 0x2bd   : > { %3400 = vtanh.f32 %v1213_v2 }
 0x2c2   : > { %v3915_v27 = vpop.eup %3398 }
 0x2c3   : > { %1248 = vperm.xlu0 %3367, %v3913_v26   ;;  %1268 = vperm.xlu2 %3369, %v3915_v27   ;;  %v1225_v28 = vpop.f32.mrf.mxu3  ;;  %v3927_v32 = vpop.eup %3400 }
 0x2c4   : > { %3402 = vtanh.f32 %v1225_v28 }
 0x2c5   : > { %3404 = vtanh.f32 %v1204_v24 }
 0x2c6   : > { %3406 = vtanh.f32 %v1216_v3 }
 0x2c7   : > { %3408 = vtanh.f32 %v1207_v25 }
 0x2ca   : > { %v3929_v34 = vpop.eup %3402 }
 0x2cb   : > { %658 = vperm.xlu0 %3367, %v619_v29   ;;  %1253 = vperm.xlu2 %3369, %v3927_v32   ;;  %v3934_v36 = vpop.eup %3404 }
 0x2cc   : > { %1273 = vperm.xlu1 %3368, %v3929_v34   ;;  %v3936_v0 = vpop.eup %3406 }
 0x2cd   : > { %v3942_v42 = vpop.eup %3408 }
 0x2d3   : > { %667 = vperm.xlu0 %3367, %v622_v35   ;;  %1238 = vperm.xlu2 %3369, %v3934_v36  }
 0x2d4   : > { %1258 = vperm.xlu1 %3368, %v3936_v0  }
 0x2db   : > { %676 = vperm.xlu0 %3367, %v625_v39   ;;  %664 = vperm.xlu2 %3369, %v621_v41  }
 0x2dc   : > { %1243 = vperm.xlu1 %3368, %v3942_v42  }
 0x2e3   : > { %673 = vperm.xlu2 %3369, %v624_v43  }
 0x2e4   : > { %661 = vperm.xlu1 %3368, %v620_v44  }
 0x2ec   : > { %670 = vperm.xlu1 %3368, %v623_v47  }
 0x2f4   : > { %679 = vperm.xlu1 %3368, %v626_v48  }
 0x31d   : > { %v3961_v56 = vpop.permute.xlu2 %1268 }
 0x325   : > { %v3999_v12 = vpop.permute.xlu2 %1253 }
 0x32d   : > { %v3956_v54 = vpop.permute.xlu0 %1263  ;;  %v1239_v20 = vpop.permute.xlu2 %1238 }
 0x335   : > { %v3992_v11 = vpop.permute.xlu0 %1248  ;;  %v665_v29 = vpop.permute.xlu2 %664 }
 0x336   : > { %vm684_vm4 = vcmp.eq.s32.totalorder %v665_v29, %v4033_v18 }
 0x337   : > { %v3130_v39 = vsel %vm684_vm4, 1.0, %v5204_v22  ;;  %vm649_vm4 = vcmp.lt.s32.totalorder %v3954_v52, %v3949_v50 }
 0x338   : > { %v4064_v43 = vpack.c.bf16 %v3130_v39, %v3130_v39 }
 0x33a   : > { %v1427_v47 = vunpack.c.l.b16 %v4064_v43 }
 0x33d   : > { %v659_v17 = vpop.permute.xlu0 %658 }
 0x33e   : > { %v3968_v63 = vpop.permute.xlu1 %1273  ;;  %vm682_vm15 = vcmp.eq.s32.totalorder %v659_v17, %v4033_v18  ;;  %v674_v17 = vpop.permute.xlu2 %673 }
 0x33f   : > { %3177 = vmatpush.msk.msrb.mxu1 %vm5192_vm7, %v3968_v63  ;;  %v3128_v60 = vsel %vm682_vm15, 1.0, %v5204_v22  ;;  %vm687_vm15 = vcmp.eq.s32.totalorder %v674_v17, %v4033_v18 }
 0x340   : > { %v4046_v25 = vpack.c.bf16 %v3128_v60, %v3128_v60 }
 0x341   : > { %3178 = vmatpush.msk.msrb.mxu1 %vm5191_vm8, %v3961_v56 }
 0x342   : > { %v1425_v3 = vunpack.c.l.b16 %v4046_v25 }
 0x343   : > { %3179 = vmatpush.msk.msrb.mxu1 %vm5190_vm9, %v3956_v54  ;;  %vm5227_vm9 = vcmp.lt.s32.totalorder %v3954_v52, %v3997_v58 }
 0x345   : > { %v668_v8 = vpop.permute.xlu0 %667 }
 0x346   : > { %v4001_v14 = vpop.permute.xlu1 %1258  ;;  %vm685_vm3 = vcmp.eq.s32.totalorder %v668_v8, %v4033_v18 }
 0x347   : > { %3180 = vmatpush.msk.msrb.mxu1 %vm5189_vm10, %v4001_v14  ;;  %v3131_v35 = vsel %vm685_vm3, 1.0, %v5204_v22 }
 0x348   : > { %v4062_v41 = vpack.c.bf16 %v3131_v35, %v3131_v35 }
 0x349   : > { %3181 = vmatpush.msk.msrb.mxu1 %vm5188_vm11, %v3999_v12 }
 0x34a   : > { %5243 = vst [vmem:[#allocation10_spill] sm:$0xff] %v4062_v41  ;;  %v1428_v44 = vunpack.c.l.b16 %v4062_v41 }
 0x34b   : > { %3182 = vmatpush.msk.msrb.mxu1 %vm5187_vm12, %v3992_v11 }
 0x34c   : > { %v4068_v49 = vpack.c.b16 %v1428_v44, %v1427_v47 }
 0x34d   : > { %v677_v39 = vpop.permute.xlu0 %676 }
 0x34e   : > { %v4024_v59 = vpop.permute.xlu1 %1243  ;;  %vm688_vm3 = vcmp.eq.s32.totalorder %v677_v39, %v4033_v18 }
 0x34f   : > { %3183 = vmatpush.msk.msrb.mxu1 %vm5186_vm13, %v4024_v59  ;;  %v3134_v47 = vsel %vm688_vm3, 1.0, %v5204_v22 }
 0x350   : > { %v4092_v17 = vpack.c.bf16 %v3134_v47, %v3134_v47 }
 0x351   : > { %3184 = vmatpush.msk.msrb.mxu1 %vm5185_vm14, %v1239_v20 }
 0x352   : > { %3185 = vmatmul.msk.f32.vlgmr.msrb.gmra.mxu1 %vm5228_vm0, %v5208_v21  ;;  %5247 = vst [vmem:[#allocation14_spill] sm:$0xff] %v4092_v17 }
 0x356   : > { %v662_v24 = vpop.permute.xlu1 %661 }
 0x357   : > { %vm683_vm2 = vcmp.eq.s32.totalorder %v662_v24, %v4033_v18  ;;  %v3133_v24 = vsel %vm687_vm15, 1.0, %v5204_v22 }
 0x358   : > { %v3129_v1 = vsel %vm683_vm2, 1.0, %v5204_v22 }
 0x359   : > { %v4050_v2 = vpack.c.bf16 %v3129_v1, %v3129_v1 }
 0x35b   : > { %v1426_v5 = vunpack.c.l.b16 %v4050_v2 }
 0x35d   : > { %v4054_v28 = vpack.c.b16 %v1426_v5, %v1425_v3  ;;  %v4078_v3 = vpack.c.bf16 %v3133_v24, %v3133_v24  ;;  %v1431_v24 = vunpack.c.l.b16 %v4092_v17 }
 0x35e   : > { %v671_v48 = vpop.permute.xlu1 %670 }
 0x35f   : > { %3190 = vmatmul.msk.bf16.vlgmr.msrb.gmra.mxu0 %vm5228_vm0, %v4054_v28  ;;  %vm686_vm5 = vcmp.eq.s32.totalorder %v671_v48, %v4033_v18  ;;  %5245 = vst [vmem:[#allocation12_spill] sm:$0xff] %v4078_v3  ;;  %v1430_v8 = vunpack.c.l.b16 %v4078_v3 }
 0x360   : > { %v3132_v60 = vsel %vm686_vm5, 1.0, %v5204_v22  ;;  %vm650_vm5 = vcmp.lt.s32.totalorder %v3954_v52, %v4012_v16 }
 0x361   : > { %v4076_v1 = vpack.c.bf16 %v3132_v60, %v3132_v60 }
 0x363   : > { %5244 = vst [vmem:[#allocation11_spill] sm:$0xff] %v4076_v1  ;;  %v1429_v5 = vunpack.c.l.b16 %v4076_v1 }
 0x365   : > { %v4082_v35 = vpack.c.b16 %v1430_v8, %v1429_v5 }
 0x366   : > { %v680_v29 = vpop.permute.xlu1 %679 }
 0x367   : > { %vm689_vm2 = vcmp.eq.s32.totalorder %v680_v29, %v4033_v18 }
 0x368   : > { %v3135_v44 = vsel %vm689_vm2, 1.0, %v5204_v22 }
 0x369   : > { %v4090_v48 = vpack.c.bf16 %v3135_v44, %v3135_v44 }
 0x36b   : > { %5246 = vst [vmem:[#allocation13_spill] sm:$0xff] %v4090_v48  ;;  %v1432_v60 = vunpack.c.l.b16 %v4090_v48 }
 0x36d   : > { %v4096_v5 = vpack.c.b16 %v1432_v60, %v1431_v24 }
 0x36f   : > { %3191 = vmatmul.msk.bf16.gmra.mxu0 %vm5228_vm0, %v4068_v49 }
 0x37f   : > { %3192 = vmatmul.msk.bf16.gmra.mxu0 %vm5228_vm0, %v4082_v35 }
 0x38f   : > { %3193 = vmatmul.msk.bf16.gmra.mxu0 %vm5228_vm0, %v4096_v5 }
 0x3cf   : > { %v1304_v8 = vpop.f32.mrf.mxu1 }
 0x3d0   : > { %v4100_v29 = vperm.slane %v1304_v8, 0 }
 0x3d2   : > { %vm1308_vm15 = vcmp.gt.f32.partialorder %v4100_v29, %v1239_v20  ;;  %vm1316_vm2 = vcmp.eq.f32.partialorder %v4100_v29, %v1239_v20  ;;  %vm1317_vm3 = vcmp.eq.f32.partialorder %v4100_v29, %v4024_v59  ;;  %vm1309_vm1 = vcmp.gt.f32.partialorder %v4100_v29, %v4024_v59 }
 0x3d3   : > { %vm1324_vm14 = vmand %vm1316_vm2, %vm649_vm4  ;;  %vm1318_vm7 = vcmp.eq.f32.partialorder %v4100_v29, %v3992_v11 }
 0x3d4   : > { %vm1325_vm13 = vmand %vm1317_vm3, %vm650_vm5  ;;  %vm1320_vm3 = vcmp.eq.f32.partialorder %v4100_v29, %v4001_v14 }
 0x3d5   : > { %vm1332_vm12 = vmor %vm1308_vm15, %vm1324_vm14  ;;  %vm1319_vm14 = vcmp.eq.f32.partialorder %v4100_v29, %v3999_v12 }
 0x3d6   : > { %vm1333_vm11 = vmor %vm1309_vm1, %vm1325_vm13  ;;  %vm1310_vm1 = vcmp.gt.f32.partialorder %v4100_v29, %v3992_v11 }
 0x3d7   : > { %vm1340_vm10 = vmpackc.low %vm1332_vm12, %vm1332_vm12 }
 0x3d8   : > { %vm1341_vm8 = vmpackc.low %vm1333_vm11, %vm1333_vm11  ;;  %v1348_v20 = vsel %vm1340_vm10, %v4046_v25, 0  ;;  %vm1311_vm11 = vcmp.gt.f32.partialorder %v4100_v29, %v3999_v12 }
 0x3d9   : > { %v1349_v59 = vsel %vm1341_vm8, %v4050_v2, 0  ;;  %v1364_v39 = vunpack.c.l.b16 %v1348_v20  ;;  %vm1326_vm10 = vmand %vm1318_vm7, %vm5227_vm9  ;;  %vm5195_vm7 = vcmp.lt.s32.totalorder %v3954_v52, %v3979_v9 }
 0x3da   : > { %v1365_v44 = vunpack.c.l.b16 %v1349_v59  ;;  %vm1327_vm8 = vmand %vm1319_vm14, %vm5194_vm6  ;;  %vm5196_vm14 = vcmp.lt.s32.totalorder %v3954_v52, %v3966_v45 }
 0x3db   : > { %vm1334_vm12 = vmor %vm1310_vm1, %vm1326_vm10  ;;  %vm1321_vm1 = vcmp.eq.f32.partialorder %v4100_v29, %v3956_v54  ;;  %vm1312_vm10 = vcmp.gt.f32.partialorder %v4100_v29, %v4001_v14 }
 0x3dc   : > { %v1372_v47 = vpack.c.b16 %v1365_v44, %v1364_v39  ;;  %vm1335_vm13 = vmor %vm1311_vm11, %vm1327_vm8  ;;  %vm1313_vm8 = vcmp.gt.f32.partialorder %v4100_v29, %v3956_v54 }
 0x3dd   : > { %vm1342_vm15 = vmpackc.low %vm1334_vm12, %vm1334_vm12 }
 0x3de   : > { %3186 = vmatmul.msk.bf16.vlgmr.msrb.gmra.mxu3 %vm5228_vm0, %v1372_v47  ;;  %vm1343_vm2 = vmpackc.low %vm1335_vm13, %vm1335_vm13  ;;  %v1350_v11 = vsel %vm1342_vm15, %v4064_v43, 0 }
 0x3df   : > { %v1351_v60 = vsel %vm1343_vm2, %v4062_v41, 0  ;;  %v1366_v24 = vunpack.c.l.b16 %v1350_v11  ;;  %vm1328_vm11 = vmand %vm1320_vm3, %vm5195_vm7  ;;  %vm5226_vm3 = vcmp.lt.s32.totalorder %v3954_v52, %v3959_v55  ;;  %vm1322_vm7 = vcmp.eq.f32.partialorder %v4100_v29, %v3961_v56 }
 0x3e0   : > { %v1367_v8 = vunpack.c.l.b16 %v1351_v60  ;;  %vm1329_vm12 = vmand %vm1321_vm1, %vm5196_vm14  ;;  %vm5225_vm1 = vcmp.lt.s32.totalorder %v3954_v52, %v3952_v51 }
 0x3e1   : > { %vm1336_vm13 = vmor %vm1312_vm10, %vm1328_vm11  ;;  %vm1323_vm10 = vcmp.eq.f32.partialorder %v4100_v29, %v3968_v63  ;;  %vm1314_vm11 = vcmp.gt.f32.partialorder %v4100_v29, %v3961_v56 }
 0x3e2   : > { %v1373_v12 = vpack.c.b16 %v1367_v8, %v1366_v24  ;;  %vm1337_vm15 = vmor %vm1313_vm8, %vm1329_vm12  ;;  %vm1315_vm8 = vcmp.gt.f32.partialorder %v4100_v29, %v3968_v63  ;;  %v1458_v63 = vpop.f32.mrf.mxu0 }
 0x3e3   : > { %vm1344_vm2 = vmpackc.low %vm1336_vm13, %vm1336_vm13  ;;  %v1478_v24 = vmul.f32 0.8, %v1458_v63 }
 0x3e4   : > { %vm1345_vm6 = vmpackc.low %vm1337_vm15, %vm1337_vm15  ;;  %v1352_v14 = vsel %vm1344_vm2, %v4076_v1, 0 }
 0x3e5   : > { %v1353_v20 = vsel %vm1345_vm6, %v4078_v3, 0  ;;  %v1368_v59 = vunpack.c.l.b16 %v1352_v14  ;;  %vm1330_vm6 = vmand %vm1322_vm7, %vm5226_vm3 }
 0x3e6   : > { %v1369_v39 = vunpack.c.l.b16 %v1353_v20  ;;  %vm1331_vm12 = vmand %vm1323_vm10, %vm5225_vm1  ;;  %v4365_v20 = vld [vmem:[%s3685_s0 + $0x8] sm:$0xff] }
 0x3e7   : > { %vm1338_vm13 = vmor %vm1314_vm11, %vm1330_vm6 }
 0x3e8   : > { %v1374_v54 = vpack.c.b16 %v1369_v39, %v1368_v59  ;;  %vm1339_vm15 = vmor %vm1315_vm8, %vm1331_vm12 }
 0x3e9   : > { %vm1346_vm2 = vmpackc.low %vm1338_vm13, %vm1338_vm13  ;;  %vm714_vm13 = vcmp.eq.s32.totalorder %v3949_v50, %v4033_v18 }
 0x3ea   : > { %vm1347_vm14 = vmpackc.low %vm1339_vm15, %vm1339_vm15  ;;  %v1354_v56 = vsel %vm1346_vm2, %v4092_v17, 0  ;;  %v1460_v29 = vpop.f32.mrf.mxu0 }
 0x3eb   : > { %v1355_v44 = vsel %vm1347_vm14, %v4090_v48, 0  ;;  %v1370_v47 = vunpack.c.l.b16 %v1354_v56 }
 0x3ec   : > { %v1371_v11 = vunpack.c.l.b16 %v1355_v44 }
 0x3ee   : > { %3187 = vmatmul.msk.bf16.gmra.mxu3 %vm5228_vm0, %v1373_v12  ;;  %v1375_v60 = vpack.c.b16 %v1371_v11, %v1370_v47  ;;  %v1486_v12 = vceil.f32 %v1478_v24 }
 0x3f2   : > { %v1463_v8 = vpop.f32.mrf.mxu0 }
 0x3fa   : > { %v1465_v59 = vpop.f32.mrf.mxu0 }
 0x3fe   : > { %3188 = vmatmul.msk.bf16.gmra.mxu3 %vm5228_vm0, %v1374_v54 }
 0x402   : > { %v1468_v15 = vpop.f32.mrf.mxu0 }
 0x40a   : > { %v1470_v56 = vpop.f32.mrf.mxu0 }
 0x40b   : > { %v1483_v47 = vmul.f32 0.8, %v1470_v56  ;;  %v4351_v56 = vld [vmem:[%s3685_s0] sm:$0xff] }
 0x40d   : > { %v1491_v40 = vceil.f32 %v1483_v47 }
 0x40e   : > { %3189 = vmatmul.msk.bf16.gmra.mxu3 %vm5228_vm0, %v1375_v60  ;;  %v1480_v60 = vmul.f32 0.8, %v1463_v8  ;;  %v1481_v8 = vmul.f32 0.8, %v1465_v59 }
 0x412   : > { %v1473_v11 = vpop.f32.mrf.mxu0 }
 0x461   : > { %v1397_v14 = vpop.f32.mrf.mxu3 }
 0x462   : > { %vm4184_vm7 = vcmp.lt.f32.partialorder %v1397_v14, %v1486_v12  ;;  %v1488_v12 = vceil.f32 %v1480_v60  ;;  %v1484_v14 = vmul.f32 0.8, %v1473_v11 }
 0x469   : > { %v1399_v39 = vpop.f32.mrf.mxu3 }
 0x471   : > { %v1402_v54 = vpop.f32.mrf.mxu3 }
 0x472   : > { %vm4199_vm10 = vcmp.lt.f32.partialorder %v1402_v54, %v1488_v12  ;;  %v1489_v54 = vceil.f32 %v1481_v8  ;;  %v4370_v12 = vld [vmem:[%s3685_s0 + $0x10] sm:$0xff] }
 0x473   : > { %v4206_v47 = vsel %vm4199_vm10, 1.0, %v5204_v22 }
 0x474   : > { %v1520_v59 = vmul.f32 %v3913_v26, %v4206_v47 }
 0x479   : > { %v1404_v33 = vpop.f32.mrf.mxu3 }
 0x47a   : > { %vm4221_vm6 = vcmp.lt.f32.partialorder %v1404_v33, %v1489_v54 }
 0x481   : > { %v1407_v44 = vpop.f32.mrf.mxu3 }
 0x489   : > { %v1409_v37 = vpop.f32.mrf.mxu3 }
 0x48a   : > { %vm4188_vm14 = vcmp.lt.f32.partialorder %v1409_v37, %v1491_v40  ;;  %v1492_v40 = vceil.f32 %v1484_v14  ;;  %v1475_v37 = vpop.f32.mrf.mxu0 }
 0x48b   : > { %v4195_v24 = vsel %vm4188_vm14, 1.0, %v5204_v22 }
 0x48c   : > { %v1523_v53 = vmul.f32 %v3910_v7, %v4195_v24 }
 0x48e   : > { %1553 = vperm.xlu1 %3368, %v1523_v53   ;;  %v1485_v53 = vmul.f32 0.8, %v1475_v37 }
 0x490   : > { %v1493_v14 = vceil.f32 %v1485_v53  ;;  %v1479_v53 = vmul.f32 0.8, %v1460_v29 }
 0x491   : > { %v1412_v6 = vpop.f32.mrf.mxu3 }
 0x492   : > { %vm4208_vm11 = vcmp.lt.f32.partialorder %v1412_v6, %v1492_v40  ;;  %v1482_v6 = vmul.f32 0.8, %v1468_v15  ;;  %v4228_v40 = vsel %vm4221_vm6, 1.0, %v5204_v22 }
 0x493   : > { %v4215_v7 = vsel %vm4208_vm11, 1.0, %v5204_v22  ;;  %v1521_v26 = vmul.f32 %v3927_v32, %v4228_v40  ;;  %v4259_v32 = vsel %vm4184_vm7, 1.0, %v5204_v22 }
 0x494   : > { %v1524_v11 = vmul.f32 %v3915_v27, %v4215_v7  ;;  %v1490_v15 = vceil.f32 %v1482_v6  ;;  %v1518_v29 = vmul.f32 %v3934_v36, %v4259_v32  ;;  %v4289_v36 = vsel %vm714_vm13, 1.0, %v5204_v22 }
 0x495   : > { %5264 = vst [vmem:[#allocation15_spill] sm:$0xff] %v4289_v36 }
 0x496   : > { %1538 = vperm.xlu1 %3368, %v1520_v59   ;;  %1558 = vperm.xlu0 %3367, %v1524_v11   ;;  %vm4249_vm12 = vcmp.lt.f32.partialorder %v1407_v44, %v1490_v15  ;;  %v1487_v44 = vceil.f32 %v1479_v53 }
 0x498   : > { %vm4281_vm15 = vcmp.lt.f32.partialorder %v1399_v39, %v1487_v44  ;;  %v5206_v39 = vmov 1.0|1.0   ;;  %v5276_v44 = vmax.f32 %v3880_v57, 0.0  ;;  %v5282_v57 = vmax.f32 %v3858_v38, 0.0  ;;  %v1856_v38 = vld [vmem:[%s5168_s7 + $0x10] sm:$0xff] }
 0x499   : > { %v1414_v8 = vpop.f32.mrf.mxu3 }
 0x49a   : > { %vm4230_vm8 = vcmp.lt.f32.partialorder %v1414_v8, %v1493_v14  ;;  %v4375_v14 = vld [vmem:[%s3685_s0 + $0x18] sm:$0xff]  ;;  %s3024_s0 = sshll.u32 %s3020_s26, 4  ;;  %s3025_s0 = int_to_ptr.hbm [resolvable:$true] %s3024_s0 }
 0x49b   : > { %v4237_v33 = vsel %vm4230_vm8, 1.0, %v5204_v22  ;;  %3202 = vmatpush.msk.msrb.mxu2 %vm4230_vm8, %v5208_v21  ;;  %vm4300_vm2 = vmpackc.low %vm4230_vm8, %vm4208_vm11 }
 0x49c   : > { %v1525_v27 = vmul.f32 %v3929_v34, %v4237_v33  ;;  %v4264_v34 = vsel %vm4249_vm12, 1.0, %v5204_v22  ;;  %vm4329_vm8 = vmpackc.low %vm4221_vm6, %vm4199_vm10 }
 0x49d   : > { %3203 = vmatpush.msk.msrb.mxu2 %vm4208_vm11, %v5208_v21  ;;  %v1522_v59 = vmul.f32 %v3936_v0, %v4264_v34  ;;  %v4294_v0 = vsel %vm4281_vm15, 1.0, %v5204_v22  ;;  %vm4318_vm11 = vmpackc.low %vm4188_vm14, %vm4249_vm12 }
 0x49e   : > { %1543 = vperm.xlu0 %3367, %v1521_v26   ;;  %1563 = vperm.xlu2 %3369, %v1525_v27   ;;  %v1519_v60 = vmul.f32 %v3942_v42, %v4294_v0 }
 0x49f   : > { %3204 = vmatpush.msk.msrb.mxu2 %vm4188_vm14, %v5208_v21  ;;  %vm4340_vm14 = vmpackc.low %vm4281_vm15, %vm4184_vm7 }
 0x4a1   : > { %3205 = vmatpush.msk.msrb.mxu2 %vm4249_vm12, %v5208_v21 }
 0x4a3   : > { %3206 = vmatpush.msk.msrb.mxu2 %vm4221_vm6, %v5208_v21 }
 0x4a5   : > { %3207 = vmatpush.msk.msrb.mxu2 %vm4199_vm10, %v5208_v21 }
 0x4a6   : > { %1528 = vperm.xlu0 %3367, %v1518_v29   ;;  %1548 = vperm.xlu2 %3369, %v1522_v59  }
 0x4a7   : > { %3208 = vmatpush.msk.msrb.mxu2 %vm4281_vm15, %v5208_v21 }
 0x4a9   : > { %3209 = vmatpush.msk.msrb.mxu2 %vm4184_vm7, %v5208_v21  ;;  %vm5286_vm7 = vcmask 261120  }
 0x4aa   : > { %3210 = vmatmul.msk.f32.vlgmr.msrb.gmra.mxu2 %vm5228_vm0, %v4289_v36  ;;  %vm5287_vm10 = vmmov %vm5286_vm7 }
 0x4ab   : > { %3225 = vmatpush.bf16.msk.msra.mxu2 %vm4300_vm2, %v5206_v39  ;;  %vm5289_vm6 = vmmov %vm5286_vm7 }
 0x4ac   : > { %vm5290_vm12 = vmmov %vm5289_vm6 }
 0x4ad   : > { %vm5291_vm13 = vmmov %vm5289_vm6 }
 0x4ae   : > { %1533 = vperm.xlu2 %3369, %v1519_v60   ;;  %vm5292_vm15 = vmmov %vm5289_vm6 }
 0x4af   : > { %3227 = vmatpush.bf16.msk.msra.mxu2 %vm4318_vm11, %v5206_v39 }
 0x4b3   : > { %3229 = vmatpush.bf16.msk.msra.mxu2 %vm4329_vm8, %v5206_v39 }
 0x4b7   : > { %3231 = vmatpush.bf16.msk.msra.mxu2 %vm4340_vm14, %v5206_v39 }
 0x4ba   : > { %3232 = vmatmul.msk.bf16.vlgmr.msra.gmra.mxu2 %vm5228_vm0, %v4351_v56 }
 0x4bb   : > { %3266 = vmatpush.bf16.msk.msrb.mxu2 %vm4300_vm2, %v5206_v39 }
 0x4bf   : > { %3268 = vmatpush.bf16.msk.msrb.mxu2 %vm4318_vm11, %v5206_v39 }
 0x4c3   : > { %3270 = vmatpush.bf16.msk.msrb.mxu2 %vm4329_vm8, %v5206_v39 }
 0x4c7   : > { %3272 = vmatpush.bf16.msk.msrb.mxu2 %vm4340_vm14, %v5206_v39 }
 0x4ca   : > { %3233 = vmatmul.msk.bf16.gmra.mxu2 %vm5228_vm0, %v4365_v20 }
 0x4da   : > { %3234 = vmatmul.msk.bf16.gmra.mxu2 %vm5228_vm0, %v4370_v12 }
 0x4ea   : > { %3235 = vmatmul.msk.bf16.gmra.mxu2 %vm5228_vm0, %v4375_v14 }
 0x4f8   : > { %v1564_v8 = vpop.permute.xlu2 %1563 }
 0x4f9   : > { %v4381_v37 = vmul.f32 %v1564_v8, %v1161_v23 }
 0x4fb   : > { %5273 = vst [vmem:[#allocation16_spill] sm:$0xff] %v4381_v37  ;;  %1605 = vmatpush.msra.mxu1 %v4381_v37 }
 0x500   : > { %v1554_v15 = vpop.permute.xlu1 %1553  ;;  %v1549_v26 = vpop.permute.xlu2 %1548 }
 0x501   : > { %v4390_v53 = vmul.f32 %v1554_v15, %v1159_v13  ;;  %v4395_v62 = vmul.f32 %v1549_v26, %v5276_v44  ;;  %v1854_v15 = vld [vmem:[%s5168_s7] sm:$0xff] }
 0x503   : > { %5275 = vst [vmem:[#allocation18_spill] sm:$0xff] %v4390_v53 }
 0x504   : > { %5277 = vst [vmem:[#allocation19_spill] sm:$0xff] %v4395_v62 }
 0x508   : > { %v1559_v27 = vpop.permute.xlu0 %1558  ;;  %v1539_v23 = vpop.permute.xlu1 %1538 }
 0x509   : > { %v4386_v54 = vmul.f32 %v1559_v27, %v1160_v19  ;;  %v1534_v59 = vpop.permute.xlu2 %1533  ;;  %v4405_v13 = vmul.f32 %v1539_v23, %v5280_v61 }
 0x50a   : > { %v4410_v11 = vmul.f32 %v1534_v59, %v5282_v57 }
 0x50b   : > { %5274 = vst [vmem:[#allocation17_spill] sm:$0xff] %v4386_v54  ;;  %1606 = vmatpush.msra.mxu1 %v4386_v54 }
 0x50c   : > { %5281 = vst [vmem:[#allocation21_spill] sm:$0xff] %v4405_v13 }
 0x50d   : > { %1607 = vmatpush.msra.mxu1 %v4390_v53  ;;  %5283 = vst [vmem:[#allocation22_spill] sm:$0xff] %v4410_v11 }
 0x50f   : > { %1608 = vmatpush.msra.mxu1 %v4395_v62 }
 0x510   : > { %v1544_v29 = vpop.permute.xlu0 %1543 }
 0x511   : > { %v4401_v19 = vmul.f32 %v1544_v29, %v5278_v4 }
 0x513   : > { %5279 = vst [vmem:[#allocation20_spill] sm:$0xff] %v4401_v19  ;;  %1609 = vmatpush.msra.mxu1 %v4401_v19 }
 0x515   : > { %1610 = vmatpush.msra.mxu1 %v4405_v13 }
 0x517   : > { %1611 = vmatpush.msra.mxu1 %v4410_v11 }
 0x518   : > { %v1529_v60 = vpop.permute.xlu0 %1528 }
 0x519   : > { %v4416_v8 = vmul.f32 %v1529_v60, %v5284_v30 }
 0x51b   : > { %5285 = vst [vmem:[#allocation23_spill] sm:$0xff] %v4416_v8  ;;  %1612 = vmatpush.msra.mxu1 %v4416_v8 }
 0x51c   : > { %3211 = vmatmul.msk.f32.vlgmr.msra.gmra.mxu1 %vm5228_vm0, %v4289_v36 }
 0x51d   : > { %2045 = vmatpush.msrb.mxu1 %v1857_v46 }
 0x51f   : > { %2046 = vmatpush.msrb.mxu1 %v1856_v38 }
 0x521   : > { %2047 = vmatpush.msrb.mxu1 %v1855_v31 }
 0x523   : > { %2048 = vmatpush.msrb.mxu1 %v1854_v15 }
 0x524   : > { %3236 = vmatmul.msk.f32.vlgmr.msrb.gmra.mxu1 %vm5286_vm7, %v4416_v8  ;;  %vm5293_vm7 = vmmov %vm5289_vm6 }
 0x52c   : > { %3237 = vmatmul.msk.f32.gmra.mxu1 %vm5287_vm10, %v4410_v11  ;;  %vm5294_vm10 = vmmov %vm5289_vm6 }
 0x52d   : > { %v4437_v26 = vpop.f32.mrf.mxu2 }
 0x52e   : > { %5288 = vst [vmem:[#allocation24_spill] sm:$0xff] %v4437_v26 }
 0x534   : > { %3238 = vmatmul.msk.f32.gmra.mxu1 %vm5289_vm6, %v4405_v13 }
 0x53c   : > { %3239 = vmatmul.msk.f32.gmra.mxu1 %vm5290_vm12, %v4401_v19 }
 0x53d   : > { %v1877_v27 = vpop.f32.mrf.mxu2 }
 0x53e   : > { %v1878_v4 = vadd.f32 1.0, %v1877_v27 }
 0x540   : > { %v4453_v57 = vmul.f32 %v4259_v32, %v1878_v4 }
 0x542   : > { %v4461_v38 = vmax.f32 %v4453_v57, 1e-12 }
 0x544   : > { %3240 = vmatmul.msk.f32.gmra.mxu1 %vm5291_vm13, %v4395_v62 }
 0x545   : > { %v1879_v44 = vpop.f32.mrf.mxu2 }
 0x546   : > { %v1880_v62 = vadd.f32 1.0, %v1879_v44 }
 0x548   : > { %v4496_v48 = vmul.f32 %v4294_v0, %v1880_v62 }
 0x54c   : > { %3241 = vmatmul.msk.f32.gmra.mxu1 %vm5292_vm15, %v4390_v53 }
 0x54d   : > { %v1882_v23 = vpop.f32.mrf.mxu2 }
 0x54e   : > { %v1883_v30 = vadd.f32 1.0, %v1882_v23 }
 0x550   : > { %v4466_v27 = vmul.f32 %v4206_v47, %v1883_v30 }
 0x552   : > { %v4472_v23 = vmax.f32 %v4466_v27, 1e-12 }
 0x554   : > { %3242 = vmatmul.msk.f32.gmra.mxu1 %vm5293_vm7, %v4386_v54 }
 0x555   : > { %v1884_v29 = vpop.f32.mrf.mxu2 }
 0x556   : > { %v1885_v59 = vadd.f32 1.0, %v1884_v29 }
 0x558   : > { %v4450_v61 = vmul.f32 %v4228_v40, %v1885_v59 }
 0x55a   : > { %v4456_v60 = vmax.f32 %v4450_v61, 1e-12 }
 0x55c   : > { %3243 = vmatmul.msk.f32.gmra.mxu1 %vm5294_vm10, %v4381_v37  ;;  %3410 = vrsqrt.f32 %v4456_v60  ;;  %vm1957_vm10 = vweird.f32 %v4456_v60 }
 0x55d   : > { %v1887_v46 = vpop.f32.mrf.mxu2  ;;  %3412 = vrsqrt.f32 %v4461_v38 }
 0x55e   : > { %v1888_v31 = vadd.f32 1.0, %v1887_v46 }
 0x560   : > { %v1901_v15 = vmul.f32 %v4264_v34, %v1888_v31 }
 0x562   : > { %v1917_v29 = vmax.f32 %v1901_v15, 1e-12  ;;  %v4469_v4 = vpop.eup %3410  ;;  %vm1909_vm15 = vcmp.gt.f32.partialorder %v1901_v15, 0.0 }
 0x563   : > { %v1952_v39 = vmul.f32 %v4469_v4, %v4456_v60  ;;  %v4476_v46 = vpop.eup %3412  ;;  %vm1958_vm7 = vweird.f32 %v4469_v4 }
 0x564   : > { %3414 = vrsqrt.f32 %v1917_v29  ;;  %v1922_v54 = vmul.f32 %v4476_v46, %v4461_v38  ;;  %vm1967_vm12 = vweird.f32 %v1917_v29 }
 0x565   : > { %v1889_v59 = vpop.f32.mrf.mxu2  ;;  %3416 = vrsqrt.f32 %v4472_v23 }
 0x566   : > { %v1890_v22 = vadd.f32 1.0, %v1889_v59  ;;  %v1953_v59 = vmul.f32 %v4469_v4, %v1952_v39  ;;  %v1923_v19 = vmul.f32 %v4476_v46, %v1922_v54 }
 0x568   : > { %v4479_v31 = vmul.f32 %v4195_v24, %v1890_v22  ;;  %v1954_v26 = vmul.f32 0.5, %v1953_v59 }
 0x56a   : > { %v3415_v30 = vpop.eup %3414  ;;  %v4483_v21 = vmax.f32 %v4479_v31, 1e-12  ;;  %v1955_v3 = vsub.f32 1.5, %v1954_v26 }
 0x56b   : > { %v1962_v37 = vmul.f32 %v3415_v30, %v1917_v29  ;;  %v4489_v22 = vpop.eup %3416  ;;  %vm1968_vm6 = vweird.f32 %v3415_v30 }
 0x56c   : > { %3418 = vrsqrt.f32 %v4483_v21  ;;  %v1942_v39 = vmul.f32 %v4489_v22, %v4472_v23  ;;  %vm1969_vm13 = vmor %vm1967_vm12, %vm1968_vm6  ;;  %vm1928_vm12 = vweird.f32 %v4476_v46 }
 0x56d   : > { %v1892_v53 = vpop.f32.mrf.mxu2  ;;  %v1963_v13 = vmul.f32 %v3415_v30, %v1962_v37  ;;  %vm1959_vm6 = vmor %vm1957_vm10, %vm1958_vm7  ;;  %vm1905_vm7 = vcmp.gt.f32.partialorder %v4453_v57, 0.0 }
 0x56e   : > { %v1893_v8 = vadd.f32 1.0, %v1892_v53  ;;  %v1924_v53 = vmul.f32 0.5, %v1923_v19  ;;  %v1956_v19 = vmul.f32 %v4469_v4, %v1955_v3 }
 0x56f   : > { %v1964_v11 = vmul.f32 0.5, %v1963_v13  ;;  %v4504_v13 = vmax.f32 %v4496_v48, 1e-12 }
 0x570   : > { %v4493_v36 = vmul.f32 %v4215_v7, %v1893_v8  ;;  %v1943_v8 = vmul.f32 %v4489_v22, %v1942_v39  ;;  %v1925_v41 = vsub.f32 1.5, %v1924_v53  ;;  %v1960_v53 = vsel %vm1959_vm6, %v4469_v4, %v1956_v19 }
 0x571   : > { %v1965_v17 = vsub.f32 1.5, %v1964_v11  ;;  %vm1948_vm6 = vweird.f32 %v4489_v22 }
 0x572   : > { %v1919_v37 = vmax.f32 %v4493_v36, 1e-12  ;;  %v4501_v54 = vpop.eup %3418  ;;  %v1944_v29 = vmul.f32 0.5, %v1943_v8  ;;  %v1926_v3 = vmul.f32 %v4476_v46, %v1925_v41 }
 0x573   : > { %v1966_v44 = vmul.f32 %v3415_v30, %v1965_v17  ;;  %v1972_v17 = vmul.f32 %v4501_v54, %v4483_v21  ;;  %vm1978_vm3 = vweird.f32 %v4501_v54 }
 0x574   : > { %3420 = vrsqrt.f32 %v1919_v37 }
 0x575   : > { %v1894_v62 = vpop.f32.mrf.mxu2  ;;  %v1970_v11 = vsel %vm1969_vm13, %v3415_v30, %v1966_v44  ;;  %3422 = vrsqrt.f32 %v4504_v13  ;;  %v1973_v44 = vmul.f32 %v4501_v54, %v1972_v17  ;;  %vm1927_vm13 = vweird.f32 %v4461_v38 }
 0x576   : > { %v1895_v59 = vadd.f32 1.0, %v1894_v62  ;;  %v4507_v1 = vsel %vm1909_vm15, %v1970_v11, 0.0  ;;  %vm1908_vm15 = vcmp.gt.f32.partialorder %v4450_v61, 0.0  ;;  %v1945_v62 = vsub.f32 1.5, %v1944_v29  ;;  %vm1929_vm1 = vmor %vm1927_vm13, %vm1928_vm12 }
 0x577   : > { %2096 = vperm.xlu0 %3367, %v4507_v1   ;;  %v4526_v11 = vsel %vm1908_vm15, %v1960_v53, 0.0  ;;  %v1930_v4 = vsel %vm1929_vm1, %v4476_v46, %v1926_v3  ;;  %v1974_v41 = vmul.f32 0.5, %v1973_v44  ;;  %vm1987_vm12 = vweird.f32 %v1919_v37 }
 0x578   : > { %v4515_v26 = vmul.f32 %v4237_v33, %v1895_v59  ;;  %v2001_v19 = vsel %vm1905_vm7, %v1930_v4, 0.0  ;;  %v1946_v29 = vmul.f32 %v4489_v22, %v1945_v62  ;;  %vm1947_vm1 = vweird.f32 %v4472_v23 }
 0x579   : > { %vm1911_vm15 = vcmp.gt.f32.partialorder %v4493_v36, 0.0  ;;  %v2163_v46 = vmul.f32 %v2001_v19, %v2001_v19  ;;  %vm1949_vm7 = vmor %vm1947_vm1, %vm1948_vm6 }
 0x57a   : > { %v3421_v15 = vpop.eup %3420  ;;  %v1920_v30 = vmax.f32 %v4515_v26, 1e-12 }
 0x57b   : > { %v1982_v39 = vmul.f32 %v3421_v15, %v1919_v37  ;;  %v4528_v8 = vpop.eup %3422  ;;  %vm1988_vm10 = vweird.f32 %v3421_v15  ;;  %v1950_v37 = vsel %vm1949_vm7, %v4489_v22, %v1946_v29  ;;  %vm1912_vm7 = vcmp.gt.f32.partialorder %v4515_v26, 0.0 }
 0x57c   : > { %3424 = vrsqrt.f32 %v1920_v30  ;;  %v1932_v61 = vmul.f32 %v4528_v8, %v4504_v13  ;;  %vm1989_vm13 = vmor %vm1987_vm12, %vm1988_vm10  ;;  %vm1907_vm10 = vcmp.gt.f32.partialorder %v4466_v27, 0.0  ;;  %vm1977_vm12 = vweird.f32 %v4483_v21 }
 0x57d   : > { %v1983_v60 = vmul.f32 %v3421_v15, %v1982_v39  ;;  %vm1979_vm9 = vmor %vm1977_vm12, %vm1978_vm3  ;;  %v2003_v23 = vsel %vm1907_vm10, %v1950_v37, 0.0  ;;  %vm1997_vm6 = vweird.f32 %v1920_v30  ;;  %vm1938_vm3 = vweird.f32 %v4528_v8 }
 0x57e   : > { %v1933_v44 = vmul.f32 %v4528_v8, %v1932_v61  ;;  %v2165_v61 = vmul.f32 %v2003_v23, %v2003_v23  ;;  %vm1906_vm12 = vcmp.gt.f32.partialorder %v4496_v48, 0.0  ;;  %v2166_v48 = vmul.f32 %v4526_v11, %v4526_v11 }
 0x57f   : > { %2091 = vperm.xlu0 %3367, %v4526_v11   ;;  %v1984_v59 = vmul.f32 0.5, %v1983_v60  ;;  %v1975_v60 = vsub.f32 1.5, %v1974_v41 }
 0x581   : > { %v1985_v17 = vsub.f32 1.5, %v1984_v59  ;;  %v1976_v62 = vmul.f32 %v4501_v54, %v1975_v60 }
 0x582   : > { %v3425_v38 = vpop.eup %3424 }
 0x583   : > { %v1992_v39 = vmul.f32 %v3425_v38, %v1920_v30  ;;  %v1986_v53 = vmul.f32 %v3421_v15, %v1985_v17  ;;  %v1980_v41 = vsel %vm1979_vm9, %v4501_v54, %v1976_v62  ;;  %vm1937_vm9 = vweird.f32 %v4504_v13 }
 0x584   : > { %vm1939_vm10 = vmor %vm1937_vm9, %vm1938_vm3 }
 0x585   : > { %v1990_v57 = vsel %vm1989_vm13, %v3421_v15, %v1986_v53  ;;  %v1993_v3 = vmul.f32 %v3425_v38, %v1992_v39  ;;  %vm1998_vm13 = vweird.f32 %v3425_v38  ;;  %v1934_v15 = vmul.f32 0.5, %v1933_v44 }
 0x586   : > { %v2007_v59 = vsel %vm1911_vm15, %v1990_v57, 0.0  ;;  %vm1999_vm1 = vmor %vm1997_vm6, %vm1998_vm13  ;;  %vm1910_vm15 = vcmp.gt.f32.partialorder %v4479_v31, 0.0  ;;  %vm5295_vm13 = vcmask 261120  }
 0x587   : > { %2106 = vperm.xlu1 %3368, %v2007_v59   ;;  %2173 = vperm.xlu0 %3367, %v2163_v46   ;;  %v1994_v4 = vmul.f32 0.5, %v1993_v3  ;;  %v2006_v29 = vsel %vm1910_vm15, %v1980_v41, 0.0  ;;  %v1935_v39 = vsub.f32 1.5, %v1934_v15  ;;  %v2169_v60 = vmul.f32 %v2007_v59, %v2007_v59  ;;  %vm5296_vm6 = vmmov %vm5295_vm13 }
 0x588   : > { %v2168_v26 = vmul.f32 %v2006_v29, %v2006_v29 }
 0x589   : > { %v1995_v36 = vsub.f32 1.5, %v1994_v4  ;;  %v1936_v21 = vmul.f32 %v4528_v8, %v1935_v39 }
 0x58b   : > { %v1996_v17 = vmul.f32 %v3425_v38, %v1995_v36  ;;  %v1940_v31 = vsel %vm1939_vm10, %v4528_v8, %v1936_v21  ;;  %v2167_v8 = vmul.f32 %v4507_v1, %v4507_v1 }
 0x58c   : > { %v2002_v54 = vsel %vm1906_vm12, %v1940_v31, 0.0  ;;  %vm5303_vm12 = vcmp.eq.s32.totalorder %v3952_v51, %v3954_v52 }
 0x58d   : > { %v2000_v22 = vsel %vm1999_vm1, %v3425_v38, %v1996_v17  ;;  %v2164_v30 = vmul.f32 %v2002_v54, %v2002_v54  ;;  %vm5297_vm1 = vmmov %vm5296_vm6 }
 0x58e   : > { %v2008_v27 = vsel %vm1912_vm7, %v2000_v22, 0.0  ;;  %vm5298_vm15 = vmmov %vm5297_vm1 }
 0x58f   : > { %2101 = vperm.xlu1 %3368, %v2006_v29   ;;  %2183 = vperm.xlu0 %3367, %v2165_v61   ;;  %vm5299_vm7 = vmmov %vm5297_vm1 }
 0x590   : > { %2111 = vperm.xlu2 %3369, %v2008_v27   ;;  %vm5300_vm3 = vmmov %vm5297_vm1 }
 0x591   : > { %vm5301_vm9 = vmmov %vm5297_vm1 }
 0x592   : > { %vm5302_vm10 = vmmov %vm5297_vm1 }
 0x597   : > { %2076 = vperm.xlu1 %3368, %v2001_v19   ;;  %2258 = vperm.xlu0 %3367, %v4206_v47   ;;  %v2170_v19 = vmul.f32 %v2008_v27, %v2008_v27 }
 0x598   : > { %2086 = vperm.xlu2 %3369, %v2003_v23  }
 0x599   : > { %v4557_v13 = vpop.f32.mrf.mxu1 }
 0x59f   : > { %2178 = vperm.xlu1 %3368, %v2164_v30   ;;  %2198 = vperm.xlu0 %3367, %v2168_v26  }
 0x5a0   : > { %2081 = vperm.xlu2 %3369, %v2002_v54  }
 0x5a1   : > { %v2050_v38 = vpop.f32.mrf.mxu1 }
 0x5a7   : > { %2253 = vperm.xlu1 %3368, %v4294_v0   ;;  %2273 = vperm.xlu0 %3367, %v4195_v24  }
 0x5a8   : > { %2248 = vperm.xlu2 %3369, %v4259_v32  }
 0x5a9   : > { %v2053_v53 = vpop.f32.mrf.mxu1 }
 0x5af   : > { %2193 = vperm.xlu1 %3368, %v2167_v8   ;;  %2283 = vperm.xlu0 %3367, %v4237_v33  }
 0x5b0   : > { %2188 = vperm.xlu2 %3369, %v2166_v48   ;;  %v3223_v48 = vld [vmem:[%s5170_s9 + $0x38] sm:$0xff] }
 0x5b1   : > { %v4566_v57 = vpop.f32.mrf.mxu1  ;;  %2330 = vmatpush.msra.mxu0 %v3223_v48 }
 0x5b7   : > { %2268 = vperm.xlu1 %3368, %v4264_v34  }
 0x5b8   : > { %2263 = vperm.xlu2 %3369, %v4228_v40  }
 0x5b9   : > { %v4569_v1 = vpop.f32.mrf.mxu1 }
 0x5bf   : > { %2208 = vperm.xlu1 %3368, %v2170_v19   ;;  %v3222_v19 = vld [vmem:[%s5170_s9 + $0x30] sm:$0xff] }
 0x5c0   : > { %2203 = vperm.xlu2 %3369, %v2169_v60   ;;  %2331 = vmatpush.msra.mxu0 %v3222_v19 }
 0x5c1   : > { %v4571_v11 = vpop.f32.mrf.mxu1 }
 0x5c8   : > { %2278 = vperm.xlu2 %3369, %v4215_v7  }
 0x5c9   : > { %v4573_v46 = vpop.f32.mrf.mxu1 }
 0x5d1   : > { %v4575_v3 = vpop.f32.mrf.mxu1 }
 0x5d9   : > { %v4581_v37 = vpop.f32.mrf.mxu1 }
 0x5e9   : > { %v4579_v62 = vpop.permute.xlu0 %2096 }
 0x5ea   : > { %v4577_v44 = vpop.permute.xlu2 %2111  ;;  %v2118_v61 = vmul.f32 %v4579_v62, %v4571_v11 }
 0x5eb   : > { %v2121_v4 = vmul.f32 %v4577_v44, %v4581_v37 }
 0x5f1   : > { %v2092_v41 = vpop.permute.xlu0 %2091 }
 0x5f2   : > { %v2087_v15 = vpop.permute.xlu2 %2086  ;;  %v2117_v29 = vmul.f32 %v2092_v41, %v4569_v1 }
 0x5f3   : > { %v2116_v27 = vmul.f32 %v2087_v15, %v4566_v57 }
 0x5f5   : > { %v2123_v31 = vpack.c.bf16 %v2117_v29, %v2116_v27 }
 0x5f9   : > { %v4583_v59 = vpop.permute.xlu1 %2106  ;;  %v2174_v60 = vpop.permute.xlu0 %2173 }
 0x5fa   : > { %v2120_v36 = vmul.f32 %v4583_v59, %v4575_v3  ;;  %v2082_v21 = vpop.permute.xlu2 %2081 }
 0x5fb   : > { %v2115_v26 = vmul.f32 %v2082_v21, %v2053_v53 }
 0x5fc   : > { %v2125_v23 = vpack.c.bf16 %v2121_v4, %v2120_v36  ;;  %v2211_v4 = vmul.f32 %v2174_v60, %v2050_v38 }
 0x5fe   : > { %2130 = vmatpush.bf16.msra.mxu3 %v2125_v23 }
 0x601   : > { %v4589_v17 = vpop.permute.xlu1 %2101 }
 0x602   : > { %v2119_v22 = vmul.f32 %v4589_v17, %v4573_v46  ;;  %v2249_v27 = vpop.permute.xlu2 %2248 }
 0x604   : > { %v2124_v39 = vpack.c.bf16 %v2119_v22, %v2118_v61 }
 0x606   : > { %2131 = vmatpush.bf16.msra.mxu3 %v2124_v39 }
 0x609   : > { %v2077_v54 = vpop.permute.xlu1 %2076 }
 0x60a   : > { %v2114_v30 = vmul.f32 %v2077_v54, %v2050_v38  ;;  %2132 = vmatpush.bf16.msra.mxu3 %v2123_v31 }
 0x60c   : > { %v2122_v8 = vpack.c.bf16 %v2115_v26, %v2114_v30 }
 0x60e   : > { %2133 = vmatpush.bf16.msra.mxu3 %v2122_v8 }
 0x611   : > { %3244 = vmatmul.msk.bf16.vlgmr.msra.gmra.mxu3 %vm5228_vm0, %v4351_v56  ;;  %v3221_v56 = vld [vmem:[%s5170_s9 + $0x28] sm:$0xff]  ;;  %v2179_v22 = vpop.permute.xlu1 %2178 }
 0x612   : > { %2332 = vmatpush.msra.mxu0 %v3221_v56  ;;  %v2212_v31 = vmul.f32 %v2179_v22, %v2053_v53 }
 0x619   : > { %v2254_v19 = vpop.permute.xlu1 %2253 }
 0x621   : > { %3245 = vmatmul.msk.bf16.gmra.mxu3 %vm5228_vm0, %v4365_v20  ;;  %v3220_v20 = vld [vmem:[%s5170_s9 + $0x20] sm:$0xff] }
 0x622   : > { %2333 = vmatpush.msra.mxu0 %v3220_v20 }
 0x631   : > { %3246 = vmatmul.msk.bf16.gmra.mxu3 %vm5228_vm0, %v4370_v12 }
 0x641   : > { %3247 = vmatmul.msk.bf16.gmra.mxu3 %vm5228_vm0, %v4375_v14  ;;  %v4620_v14 = vld [vmem:[%s5169_s8] ss:$0 sm:$0xff] }
 0x694   : > { %v2135_v12 = vpop.f32.mrf.mxu3 }
 0x695   : > { %v2155_v36 = vmul.f32 %v2135_v12, %v2077_v54  ;;  %v2184_v54 = vpop.permute.xlu0 %2183 }
 0x696   : > { %v2213_v20 = vmul.f32 %v2184_v54, %v4566_v57 }
 0x697   : > { %v2219_v23 = vadd.f32 %v2211_v4, %v2155_v36 }
 0x699   : > { %v2230_v61 = vadd.f32 %v4620_v14, %v2219_v23 }
 0x69b   : > { %v2238_v29 = vmax.f32 %v2230_v61, 0.0 }
 0x69c   : > { %v2137_v39 = vpop.f32.mrf.mxu3 }
 0x69d   : > { %v4623_v26 = vmul.f32 %v2249_v27, %v2238_v29  ;;  %v2156_v30 = vmul.f32 %v2137_v39, %v2082_v21  ;;  %v2189_v21 = vpop.permute.xlu2 %2188  ;;  %v2259_v23 = vpop.permute.xlu0 %2258 }
 0x69e   : > { %v2214_v22 = vmul.f32 %v2189_v21, %v4569_v1 }
 0x69f   : > { %v2220_v8 = vadd.f32 %v2212_v31, %v2156_v30  ;;  %3248 = vmatmul.msk.f32.vlgmr.msra.gmra.mxu0 %vm5295_vm13, %v4623_v26  ;;  %vm5304_vm13 = vcmp.eq.s32.totalorder %v3959_v55, %v3954_v52 }
 0x6a1   : > { %v2231_v38 = vadd.f32 %v4620_v14, %v2220_v8 }
 0x6a3   : > { %v2239_v48 = vmax.f32 %v2231_v38, 0.0 }
 0x6a4   : > { %v2140_v56 = vpop.f32.mrf.mxu3 }
 0x6a5   : > { %v2157_v60 = vmul.f32 %v2140_v56, %v2087_v15  ;;  %v4629_v12 = vmul.f32 %v2254_v19, %v2239_v48  ;;  %v2194_v15 = vpop.permute.xlu1 %2193  ;;  %v2264_v30 = vpop.permute.xlu2 %2263 }
 0x6a6   : > { %v2215_v38 = vmul.f32 %v2194_v15, %v4571_v11  ;;  %v2199_v19 = vpop.permute.xlu0 %2198 }
 0x6a7   : > { %v2221_v4 = vadd.f32 %v2213_v20, %v2157_v60  ;;  %3249 = vmatmul.msk.f32.gmra.mxu0 %vm5296_vm6, %v4629_v12  ;;  %vm5305_vm6 = vcmp.eq.s32.totalorder %v3966_v45, %v3954_v52 }
 0x6a9   : > { %v2232_v53 = vadd.f32 %v4620_v14, %v2221_v4  ;;  %v2216_v4 = vmul.f32 %v2199_v19, %v4573_v46 }
 0x6ab   : > { %v2240_v36 = vmax.f32 %v2232_v53, 0.0 }
 0x6ac   : > { %v2142_v61 = vpop.f32.mrf.mxu3 }
 0x6ad   : > { %v2158_v29 = vmul.f32 %v2142_v61, %v2092_v41  ;;  %v4635_v27 = vmul.f32 %v2259_v23, %v2240_v36  ;;  %v2269_v20 = vpop.permute.xlu1 %2268  ;;  %v2204_v36 = vpop.permute.xlu2 %2203 }
 0x6ae   : > { %v2274_v61 = vpop.permute.xlu0 %2273 }
 0x6af   : > { %v2222_v39 = vadd.f32 %v2214_v22, %v2158_v29  ;;  %3250 = vmatmul.msk.f32.gmra.mxu0 %vm5297_vm1, %v4635_v27  ;;  %v2217_v29 = vmul.f32 %v2204_v36, %v4575_v3  ;;  %vm5306_vm1 = vcmp.eq.s32.totalorder %v3979_v9, %v3954_v52 }
 0x6b1   : > { %v2233_v57 = vadd.f32 %v4620_v14, %v2222_v39 }
 0x6b3   : > { %v2241_v31 = vmax.f32 %v2233_v57, 0.0 }
 0x6b4   : > { %v2145_v8 = vpop.f32.mrf.mxu3 }
 0x6b5   : > { %v2159_v54 = vmul.f32 %v2145_v8, %v4579_v62  ;;  %v4642_v48 = vmul.f32 %v2264_v30, %v2241_v31  ;;  %v2209_v15 = vpop.permute.xlu1 %2208  ;;  %v2279_v30 = vpop.permute.xlu2 %2278 }
 0x6b6   : > { %v2284_v19 = vpop.permute.xlu0 %2283 }
 0x6b7   : > { %v2223_v1 = vadd.f32 %v2215_v38, %v2159_v54  ;;  %3251 = vmatmul.msk.f32.gmra.mxu0 %vm5298_vm15, %v4642_v48  ;;  %v2218_v38 = vmul.f32 %v2209_v15, %v4581_v37  ;;  %vm5307_vm15 = vcmp.eq.s32.totalorder %v3986_v10, %v3954_v52 }
 0x6b9   : > { %v2234_v41 = vadd.f32 %v4620_v14, %v2223_v1 }
 0x6bb   : > { %v2242_v56 = vmax.f32 %v2234_v41, 0.0 }
 0x6bc   : > { %v2147_v60 = vpop.f32.mrf.mxu3 }
 0x6bd   : > { %v2160_v53 = vmul.f32 %v2147_v60, %v4589_v17  ;;  %v4649_v21 = vmul.f32 %v2269_v20, %v2242_v56 }
 0x6bf   : > { %v2224_v11 = vadd.f32 %v2216_v4, %v2160_v53  ;;  %3252 = vmatmul.msk.f32.gmra.mxu0 %vm5299_vm7, %v4649_v21  ;;  %vm5308_vm7 = vcmp.eq.s32.totalorder %v3997_v58, %v3954_v52 }
 0x6c1   : > { %v2235_v62 = vadd.f32 %v4620_v14, %v2224_v11 }
 0x6c3   : > { %v2243_v23 = vmax.f32 %v2235_v62, 0.0 }
 0x6c4   : > { %v2150_v22 = vpop.f32.mrf.mxu3 }
 0x6c5   : > { %v2161_v39 = vmul.f32 %v2150_v22, %v4583_v59  ;;  %v4656_v57 = vmul.f32 %v2274_v61, %v2243_v23 }
 0x6c7   : > { %v2225_v46 = vadd.f32 %v2217_v29, %v2161_v39  ;;  %3253 = vmatmul.msk.f32.gmra.mxu0 %vm5300_vm3, %v4656_v57  ;;  %vm5309_vm3 = vcmp.eq.s32.totalorder %v4012_v16, %v3954_v52 }
 0x6c9   : > { %v2236_v17 = vadd.f32 %v4620_v14, %v2225_v46 }
 0x6cb   : > { %v2244_v31 = vmax.f32 %v2236_v17, 0.0 }
 0x6cc   : > { %v2152_v8 = vpop.f32.mrf.mxu3 }
 0x6cd   : > { %v2162_v54 = vmul.f32 %v2152_v8, %v4577_v44  ;;  %v4663_v1 = vmul.f32 %v2279_v30, %v2244_v31 }
 0x6cf   : > { %v2226_v3 = vadd.f32 %v2218_v38, %v2162_v54  ;;  %3254 = vmatmul.msk.f32.gmra.mxu0 %vm5301_vm9, %v4663_v1  ;;  %vm5310_vm9 = vcmp.eq.s32.totalorder %v3949_v50, %v3954_v52 }
 0x6d1   : > { %v2237_v59 = vadd.f32 %v4620_v14, %v2226_v3 }
 0x6d3   : > { %v2245_v41 = vmax.f32 %v2237_v59, 0.0  ;;  %v5311_v59 = vmov 1.0  }
 0x6d5   : > { %v4668_v56 = vmul.f32 %v2284_v19, %v2245_v41  ;;  %v5312_v41 = vmov 1.0|1.0   ;;  %v5321_v19 = vld [vmem:[#allocation12_spill] sm:$0xff] }
 0x6d7   : > { %3255 = vmatmul.msk.f32.gmra.mxu0 %vm5302_vm10, %v4668_v56 }
 0x71c   : > { %v2335_v20 = vpop.f32.mrf.mxu0 }
 0x724   : > { %v2338_v60 = vpop.f32.mrf.mxu0 }
 0x72c   : > { %v2341_v37 = vpop.f32.mrf.mxu0 }
 0x734   : > { %v2344_v4 = vpop.f32.mrf.mxu0 }
 0x73c   : > { %v2347_v44 = vpop.f32.mrf.mxu0 }
 0x744   : > { %v2350_v53 = vpop.f32.mrf.mxu0 }
 0x745   : > { %3426 = vtanh.f32 %v2350_v53 }
 0x746   : > { %3428 = vtanh.f32 %v2341_v37  ;;  %v5325_v37 = vld [vmem:[#allocation14_spill] sm:$0xff] }
 0x74b   : > { %v4672_v11 = vpop.eup %3426 }
 0x74c   : > { %2394 = vperm.xlu0 %3367, %v4672_v11   ;;  %v2353_v14 = vpop.f32.mrf.mxu0  ;;  %v4675_v62 = vpop.eup %3428 }
 0x74d   : > { %3430 = vtanh.f32 %v2353_v14 }
 0x74e   : > { %3432 = vtanh.f32 %v2344_v4 }
 0x753   : > { %v4677_v36 = vpop.eup %3430 }
 0x754   : > { %2379 = vperm.xlu0 %3367, %v4675_v62   ;;  %2399 = vperm.xlu2 %3369, %v4677_v36   ;;  %v2356_v23 = vpop.f32.mrf.mxu0  ;;  %v4681_v61 = vpop.eup %3432 }
 0x755   : > { %3434 = vtanh.f32 %v2356_v23 }
 0x756   : > { %3436 = vtanh.f32 %v2335_v20 }
 0x757   : > { %3438 = vtanh.f32 %v2347_v44  ;;  %v5326_v44 = vld [vmem:[#allocation13_spill] sm:$0xff] }
 0x758   : > { %3440 = vtanh.f32 %v2338_v60 }
 0x75b   : > { %v4683_v22 = vpop.eup %3434 }
 0x75c   : > { %2384 = vperm.xlu2 %3369, %v4681_v61   ;;  %2404 = vperm.xlu1 %3368, %v4683_v22   ;;  %v4687_v29 = vpop.eup %3436 }
 0x75d   : > { %v4689_v39 = vpop.eup %3438 }
 0x75e   : > { %v4693_v46 = vpop.eup %3440 }
 0x764   : > { %2369 = vperm.xlu2 %3369, %v4687_v29   ;;  %2389 = vperm.xlu1 %3368, %v4689_v39  }
 0x76c   : > { %2374 = vperm.xlu1 %3368, %v4693_v46  }
 0x7ae   : > { %v4696_v17 = vpop.permute.xlu2 %2399 }
 0x7b6   : > { %v2385_v30 = vpop.permute.xlu2 %2384 }
 0x7be   : > { %v4704_v31 = vpop.permute.xlu0 %2394  ;;  %v2370_v3 = vpop.permute.xlu2 %2369 }
 0x7c6   : > { %v2380_v38 = vpop.permute.xlu0 %2379 }
 0x7ce   : > { %v4698_v15 = vpop.permute.xlu1 %2404 }
 0x7cf   : > { %3256 = vmatpush.msk.msra.mxu1 %vm5303_vm12, %v4698_v15 }
 0x7d1   : > { %3257 = vmatpush.msk.msra.mxu1 %vm5304_vm13, %v4696_v17 }
 0x7d3   : > { %3258 = vmatpush.msk.msra.mxu1 %vm5305_vm6, %v4704_v31 }
 0x7d6   : > { %v2390_v8 = vpop.permute.xlu1 %2389 }
 0x7d7   : > { %3259 = vmatpush.msk.msra.mxu1 %vm5306_vm1, %v2390_v8 }
 0x7d9   : > { %3260 = vmatpush.msk.msra.mxu1 %vm5307_vm15, %v2385_v30 }
 0x7db   : > { %3261 = vmatpush.msk.msra.mxu1 %vm5308_vm7, %v2380_v38 }
 0x7de   : > { %v2375_v54 = vpop.permute.xlu1 %2374 }
 0x7df   : > { %3262 = vmatpush.msk.msra.mxu1 %vm5309_vm3, %v2375_v54 }
 0x7e1   : > { %3263 = vmatpush.msk.msra.mxu1 %vm5310_vm9, %v2370_v3 }
 0x7e2   : > { %3264 = vmatmul.msk.f32.vlgmr.msra.gmra.mxu1 %vm5228_vm0, %v5311_v59 }
 0x7e3   : > { %3278 = vmatpush.bf16.msk.msrb.mxu1 %vm4300_vm2, %v5312_v41 }
 0x7e7   : > { %3280 = vmatpush.bf16.msk.msrb.mxu1 %vm4318_vm11, %v5312_v41 }
 0x7eb   : > { %3282 = vmatpush.bf16.msk.msrb.mxu1 %vm4329_vm8, %v5312_v41 }
 0x7ef   : > { %3284 = vmatpush.bf16.msk.msrb.mxu1 %vm4340_vm14, %v5312_v41 }
 0x7f2   : > { %3285 = vmatmul.msk.bf16.vlgmr.msrb.gmra.mxu1 %vm5228_vm0, %v4054_v28 }
 0x802   : > { %3286 = vmatmul.msk.bf16.gmra.mxu1 %vm5228_vm0, %v4068_v49 }
 0x812   : > { %3287 = vmatmul.msk.bf16.gmra.mxu1 %vm5228_vm0, %v4082_v35 }
 0x822   : > { %3288 = vmatmul.msk.bf16.gmra.mxu1 %vm5228_vm0, %v4096_v5 }
 0x85f   : > { %v2432_v18 = vpop.f32.mrf.mxu1 }
 0x860   : > { %v2435_v6 = vperm.slane %v2432_v18, 0 }
 0x862   : > { %vm2436_vm2 = vcmp.gt.f32.partialorder %v2435_v6, %v2370_v3  ;;  %vm2444_vm11 = vcmp.eq.f32.partialorder %v2435_v6, %v2370_v3  ;;  %vm2445_vm8 = vcmp.eq.f32.partialorder %v2435_v6, %v2375_v54  ;;  %vm2437_vm10 = vcmp.gt.f32.partialorder %v2435_v6, %v2375_v54 }
 0x863   : > { %vm2452_vm14 = vmand %vm2444_vm11, %vm649_vm4  ;;  %vm2446_vm7 = vcmp.eq.f32.partialorder %v2435_v6, %v2380_v38  ;;  %vm2447_vm3 = vcmp.eq.f32.partialorder %v2435_v6, %v2385_v30  ;;  %vm2438_vm9 = vcmp.gt.f32.partialorder %v2435_v6, %v2380_v38  ;;  %vm5313_vm4 = vcmp.lt.s32.totalorder %v3954_v52, %v3997_v58  ;;  %v5320_v58 = vld [vmem:[#allocation11_spill] sm:$0xff] }
 0x864   : > { %vm2453_vm12 = vmand %vm2445_vm8, %vm650_vm5  ;;  %vm2439_vm0 = vcmp.gt.f32.partialorder %v2435_v6, %v2385_v30  ;;  %vm5314_vm5 = vcmp.lt.s32.totalorder %v3954_v52, %v3986_v10  ;;  %vm5315_vm8 = vcmask 523264  }
 0x865   : > { %vm2460_vm13 = vmor %vm2436_vm2, %vm2452_vm14 }
 0x866   : > { %vm2461_vm6 = vmor %vm2437_vm10, %vm2453_vm12 }
 0x867   : > { %vm2468_vm1 = vmpackc.low %vm2460_vm13, %vm2460_vm13 }
 0x868   : > { %vm2469_vm15 = vmpackc.low %vm2461_vm6, %vm2461_vm6  ;;  %v2476_v28 = vsel %vm2468_vm1, %v4046_v25, 0  ;;  %v5316_v25 = vld [vmem:[#allocation10_spill] sm:$0xff]  ;;  %vm2448_vm6 = vcmp.eq.f32.partialorder %v2435_v6, %v2390_v8  ;;  %vm2449_vm1 = vcmp.eq.f32.partialorder %v2435_v6, %v4704_v31 }
 0x869   : > { %v2477_v49 = vsel %vm2469_vm15, %v4050_v2, 0  ;;  %v2492_v35 = vunpack.c.l.b16 %v2476_v28  ;;  %vm2454_vm11 = vmand %vm2446_vm7, %vm5313_vm4  ;;  %vm2440_vm15 = vcmp.gt.f32.partialorder %v2435_v6, %v2390_v8  ;;  %vm5317_vm7 = vcmp.lt.s32.totalorder %v3954_v52, %v3979_v9 }
 0x86a   : > { %v2493_v5 = vunpack.c.l.b16 %v2477_v49  ;;  %vm2455_vm2 = vmand %vm2447_vm3, %vm5314_vm5 }
 0x86b   : > { %vm2462_vm10 = vmor %vm2438_vm9, %vm2454_vm11  ;;  %vm2441_vm9 = vcmp.gt.f32.partialorder %v2435_v6, %v4704_v31 }
 0x86c   : > { %v2500_v50 = vpack.c.b16 %v2493_v5, %v2492_v35  ;;  %vm2463_vm14 = vmor %vm2439_vm0, %vm2455_vm2  ;;  %vm5318_vm0 = vcmp.lt.s32.totalorder %v3954_v52, %v3966_v45 }
 0x86d   : > { %vm2470_vm12 = vmpackc.low %vm2462_vm10, %vm2462_vm10 }
 0x86e   : > { %3273 = vmatmul.msk.bf16.vlgmr.msrb.gmra.mxu2 %vm5315_vm8, %v2500_v50  ;;  %vm2471_vm13 = vmpackc.low %vm2463_vm14, %vm2463_vm14  ;;  %v2478_v16 = vsel %vm2470_vm12, %v4064_v43, 0  ;;  %vm2450_vm14 = vcmp.eq.f32.partialorder %v2435_v6, %v4696_v17  ;;  %vm2451_vm12 = vcmp.eq.f32.partialorder %v2435_v6, %v4698_v15 }
 0x86f   : > { %v2479_v2 = vsel %vm2471_vm13, %v5316_v25, 0  ;;  %v2494_v42 = vunpack.c.l.b16 %v2478_v16  ;;  %vm2456_vm3 = vmand %vm2448_vm6, %vm5317_vm7  ;;  %vm2442_vm13 = vcmp.gt.f32.partialorder %v2435_v6, %v4696_v17  ;;  %vm5322_vm6 = vcmp.lt.s32.totalorder %v3954_v52, %v3959_v55  ;;  %v2554_v17 = vpop.f32.mrf.mxu1 }
 0x870   : > { %v2495_v63 = vunpack.c.l.b16 %v2479_v2  ;;  %vm2457_vm4 = vmand %vm2449_vm1, %vm5318_vm0  ;;  %vm5323_vm7 = vcmp.lt.s32.totalorder %v3954_v52, %v3952_v51  ;;  %v2574_v31 = vmul.f32 0.8, %v2554_v17  ;;  %v5330_v25 = vmov 0.0  }
 0x871   : > { %vm5319_vm11 = vmmov %vm5315_vm8 }
 0x872   : > { %v2501_v10 = vpack.c.b16 %v2495_v63, %v2494_v42  ;;  %vm2464_vm5 = vmor %vm2440_vm15, %vm2456_vm3  ;;  %vm2443_vm15 = vcmp.gt.f32.partialorder %v2435_v6, %v4698_v15  ;;  %v2582_v52 = vceil.f32 %v2574_v31 }
 0x873   : > { %vm2465_vm2 = vmor %vm2441_vm9, %vm2457_vm4 }
 0x874   : > { %vm2472_vm8 = vmpackc.low %vm2464_vm5, %vm2464_vm5 }
 0x875   : > { %vm2473_vm10 = vmpackc.low %vm2465_vm2, %vm2465_vm2  ;;  %v2480_v43 = vsel %vm2472_vm8, %v5320_v58, 0 }
 0x876   : > { %v2481_v20 = vsel %vm2473_vm10, %v5321_v19, 0  ;;  %v2496_v60 = vunpack.c.l.b16 %v2480_v43  ;;  %vm2458_vm1 = vmand %vm2450_vm14, %vm5322_vm6 }
 0x877   : > { %v2497_v9 = vunpack.c.l.b16 %v2481_v20  ;;  %vm2459_vm3 = vmand %vm2451_vm12, %vm5323_vm7  ;;  %v2556_v15 = vpop.f32.mrf.mxu1 }
 0x878   : > { %vm5324_vm9 = vmmov %vm5319_vm11 }
 0x879   : > { %v2502_v45 = vpack.c.b16 %v2497_v9, %v2496_v60  ;;  %vm2466_vm0 = vmor %vm2442_vm13, %vm2458_vm1 }
 0x87a   : > { %vm2467_vm4 = vmor %vm2443_vm15, %vm2459_vm3 }
 0x87b   : > { %vm2475_vm5 = vmpackc.low %vm2467_vm4, %vm2467_vm4 }
 0x87c   : > { %v2483_v53 = vsel %vm2475_vm5, %v5326_v44, 0  ;;  %vm5327_vm2 = vmmov %vm5324_vm9 }
 0x87d   : > { %v2499_v55 = vunpack.c.l.b16 %v2483_v53  ;;  %vm5332_vm7 = vmmov %vm5327_vm2 }
 0x87e   : > { %3274 = vmatmul.msk.bf16.gmra.mxu2 %vm5319_vm11, %v2501_v10  ;;  %vm2474_vm11 = vmpackc.low %vm2466_vm0, %vm2466_vm0 }
 0x87f   : > { %v2482_v4 = vsel %vm2474_vm11, %v5325_v37, 0  ;;  %v2559_v51 = vpop.f32.mrf.mxu1 }
 0x880   : > { %v2498_v14 = vunpack.c.l.b16 %v2482_v4  ;;  %v2576_v49 = vmul.f32 0.8, %v2559_v51  ;;  %v3212_v51 = vadd.f32 -1.0, %v4259_v32 }
 0x882   : > { %v2503_v23 = vpack.c.b16 %v2499_v55, %v2498_v14  ;;  %v2584_v16 = vceil.f32 %v2576_v49 }
 0x887   : > { %v2561_v38 = vpop.f32.mrf.mxu1 }
 0x888   : > { %v2577_v10 = vmul.f32 0.8, %v2561_v38  ;;  %v1646_v38 = vmul.f32 1e+30, %v3212_v51 }
 0x88a   : > { %v2585_v9 = vceil.f32 %v2577_v10  ;;  %v4853_v10 = vld [vmem:[%s5165_s4] ss:$0 sm:$0xff] }
 0x88e   : > { %3275 = vmatmul.msk.bf16.gmra.mxu2 %vm5324_vm9, %v2502_v45 }
 0x88f   : > { %v2564_v59 = vpop.f32.mrf.mxu1 }
 0x890   : > { %v2578_v14 = vmul.f32 0.8, %v2564_v59 }
 0x897   : > { %v2566_v18 = vpop.f32.mrf.mxu1 }
 0x898   : > { %v2579_v28 = vmul.f32 0.8, %v2566_v18 }
 0x89a   : > { %v2587_v5 = vceil.f32 %v2579_v28 }
 0x89e   : > { %3276 = vmatmul.msk.bf16.gmra.mxu2 %vm5327_vm2, %v2503_v23 }
 0x89f   : > { %v2569_v35 = vpop.f32.mrf.mxu1 }
 0x8a0   : > { %v2580_v42 = vmul.f32 0.8, %v2569_v35  ;;  %v3214_v35 = vadd.f32 -1.0, %v4206_v47 }
 0x8a2   : > { %v2588_v19 = vceil.f32 %v2580_v42 }
 0x8a7   : > { %v2571_v20 = vpop.f32.mrf.mxu1 }
 0x8a8   : > { %v2581_v4 = vmul.f32 0.8, %v2571_v20 }
 0x8aa   : > { %v2589_v23 = vceil.f32 %v2581_v4 }
 0x8f1   : > { %v2525_v30 = vpop.f32.mrf.mxu2 }
 0x8f2   : > { %vm4793_vm8 = vcmp.lt.f32.partialorder %v2525_v30, %v2582_v52  ;;  %v2586_v52 = vceil.f32 %v2578_v14  ;;  %v3456_v14 = vld [vmem:[%s3924_s22 + $0x18] sm:$0xff] }
 0x8f3   : > { %vm722_vm11 = vcmp.eq.s32.totalorder %v4853_v10, %v3456_v14 }
 0x8f9   : > { %v2527_v54 = vpop.f32.mrf.mxu2 }
 0x901   : > { %v2530_v3 = vpop.f32.mrf.mxu2 }
 0x902   : > { %vm2592_vm14 = vcmp.lt.f32.partialorder %v2530_v3, %v2584_v16 }
 0x903   : > { %v3291_v43 = vsel %vm2592_vm14, 1.0, %v5330_v25 }
 0x904   : > { %v2616_v45 = vmul.f32 %v3291_v43, %v4206_v47 }
 0x906   : > { %v2624_v53 = vmul.f32 %v4675_v62, %v2616_v45 }
 0x909   : > { %v2532_v41 = vpop.f32.mrf.mxu2 }
 0x90a   : > { %vm2593_vm13 = vcmp.lt.f32.partialorder %v2532_v41, %v2585_v9  ;;  %v3289_v41 = vsel %vm4793_vm8, 1.0, %v5330_v25 }
 0x90b   : > { %v3292_v55 = vsel %vm2593_vm13, 1.0, %v5330_v25 }
 0x90c   : > { %v4814_v31 = vmul.f32 %v3292_v55, %v4228_v40  ;;  %v3217_v55 = vadd.f32 -1.0, %v4195_v24 }
 0x90e   : > { %v2625_v3 = vmul.f32 %v4681_v61, %v4814_v31 }
 0x911   : > { %v2535_v6 = vpop.f32.mrf.mxu2 }
 0x912   : > { %vm2594_vm1 = vcmp.lt.f32.partialorder %v2535_v6, %v2586_v52  ;;  %v3215_v6 = vadd.f32 -1.0, %v4228_v40  ;;  %v3457_v52 = vld [vmem:[%s3924_s22 + $0x10] sm:$0xff] }
 0x913   : > { %v3293_v18 = vsel %vm2594_vm1, 1.0, %v5330_v25  ;;  %vm721_vm2 = vcmp.eq.s32.totalorder %v4853_v10, %v3457_v52 }
 0x914   : > { %v4834_v61 = vmul.f32 %v3293_v18, %v4264_v34  ;;  %v1649_v8 = vmul.f32 1e+30, %v3215_v6  ;;  %v3459_v18 = vld [vmem:[%s3924_s22 + $0x28] sm:$0xff] }
 0x919   : > { %v2537_v50 = vpop.f32.mrf.mxu2 }
 0x91a   : > { %vm2595_vm10 = vcmp.lt.f32.partialorder %v2537_v50, %v2587_v5  ;;  %v5331_v5 = vld [vmem:[#allocation15_spill] sm:$0xff]  ;;  %v1648_v50 = vmul.f32 1e+30, %v3214_v35 }
 0x91b   : > { %v3294_v2 = vsel %vm2595_vm10, 1.0, %v5330_v25 }
 0x91c   : > { %v4799_v63 = vmul.f32 %v3294_v2, %v4195_v24  ;;  %v3213_v2 = vadd.f32 -1.0, %v4294_v0 }
 0x91e   : > { %v2627_v58 = vmul.f32 %v4672_v11, %v4799_v63  ;;  %v3304_v51 = vadd.f32 -1.0, %v4799_v63 }
 0x920   : > { %2657 = vperm.xlu2 %3369, %v2627_v58   ;;  %v1647_v58 = vmul.f32 1e+30, %v3213_v2  ;;  %v2752_v24 = vmul.f32 1e+30, %v3304_v51 }
 0x921   : > { %v2540_v60 = vpop.f32.mrf.mxu2 }
 0x922   : > { %vm2596_vm12 = vcmp.lt.f32.partialorder %v2540_v60, %v2588_v19  ;;  %v4862_v60 = vld [vmem:[%s5165_s4 + $0x1] ss:$0 sm:$0xff] }
 0x923   : > { %v3295_v37 = vsel %vm2596_vm12, 1.0, %v5330_v25  ;;  %vm730_vm4 = vcmp.eq.s32.totalorder %v4862_v60, %v3456_v14  ;;  %vm729_vm5 = vcmp.eq.s32.totalorder %v4862_v60, %v3457_v52  ;;  %vm732_vm14 = vcmp.eq.s32.totalorder %v4862_v60, %v3459_v18 }
 0x924   : > { %v4807_v44 = vmul.f32 %v3295_v37, %v4215_v7  ;;  %v3302_v37 = vadd.f32 -1.0, %v4814_v31 }
 0x926   : > { %v2628_v11 = vmul.f32 %v4677_v36, %v4807_v44  ;;  %v2575_v36 = vmul.f32 0.8, %v2556_v15  ;;  %v2614_v15 = vmul.f32 %v3289_v41, %v4259_v32  ;;  %v2626_v32 = vmul.f32 %v4689_v39, %v4834_v61 }
 0x927   : > { %v3216_v39 = vadd.f32 -1.0, %v4264_v34  ;;  %v3531_v34 = vmov -1e+30  }
 0x928   : > { %2642 = vperm.xlu2 %3369, %v2624_v53   ;;  %2662 = vperm.xlu1 %3368, %v2628_v11   ;;  %v2583_v28 = vceil.f32 %v2575_v36  ;;  %v2622_v49 = vmul.f32 %v4687_v29, %v2614_v15  ;;  %v3299_v43 = vadd.f32 -1.0, %v2614_v15  ;;  %v2750_v11 = vmul.f32 1e+30, %v3302_v37 }
 0x929   : > { %v2542_v17 = vpop.f32.mrf.mxu2  ;;  %v1650_v42 = vmul.f32 1e+30, %v3216_v39  ;;  %v737_v36 = vsel %vm721_vm2, 0.0, %v3531_v34  ;;  %v748_v6 = vsel %vm732_vm14, 0.0, %v3531_v34 }
 0x92a   : > { %vm2597_vm6 = vcmp.lt.f32.partialorder %v2542_v17, %v2589_v23  ;;  %vm2591_vm15 = vcmp.lt.f32.partialorder %v2527_v54, %v2583_v28  ;;  %v3301_v54 = vadd.f32 -1.0, %v2616_v45  ;;  %v2747_v9 = vmul.f32 1e+30, %v3299_v43 }
 0x92b   : > { %v3296_v30 = vsel %vm2597_vm6, 1.0, %v5330_v25  ;;  %v746_v23 = vsel %vm730_vm4, 0.0, %v3531_v34  ;;  %v738_v17 = vsel %vm722_vm11, 0.0, %v3531_v34  ;;  %v3219_v28 = vadd.f32 -1.0, %v4237_v33 }
 0x92c   : > { %v4819_v62 = vmul.f32 %v3296_v30, %v4237_v33  ;;  %v2749_v29 = vmul.f32 1e+30, %v3301_v54  ;;  %v745_v30 = vsel %vm729_vm5, 0.0, %v3531_v34  ;;  %vm724_vm6 = vcmp.eq.s32.totalorder %v4853_v10, %v3459_v18  ;;  %v3461_v54 = vld [vmem:[%s3924_s22 + $0x38] sm:$0xff] }
 0x92d   : > { %vm734_vm1 = vcmp.eq.s32.totalorder %v4862_v60, %v3461_v54  ;;  %vm5337_vm4 = vcmask 261120  }
 0x92e   : > { %2686 = vmatpush.msrb.mxu3 %v4819_v62  ;;  %v2629_v59 = vmul.f32 %v4683_v22, %v4819_v62  ;;  %v3290_v22 = vsel %vm2591_vm15, 1.0, %v5330_v25  ;;  %v3306_v35 = vadd.f32 -1.0, %v4819_v62  ;;  %vm5338_vm11 = vmmov %vm5337_vm4 }
 0x92f   : > { %v2615_v40 = vmul.f32 %v3290_v22, %v4294_v0  ;;  %v5333_v0 = vld [vmem:[#allocation24_spill] sm:$0xff]  ;;  %vm5339_vm5 = vmmov %vm5337_vm4 }
 0x930   : > { %1656 = vperm.xlu2 %3369, %v1646_v38   ;;  %2647 = vperm.xlu1 %3368, %v2625_v3   ;;  %v1617_v20 = vmax.f32 %v5333_v0, 1.0  ;;  %v3458_v38 = vld [vmem:[%s3924_s22 + $0x20] sm:$0xff]  ;;  %v3303_v3 = vadd.f32 -1.0, %v4834_v61  ;;  %vm5340_vm2 = vmmov %vm5337_vm4 }
 0x931   : > { %2687 = vmatpush.msrb.mxu3 %v4807_v44  ;;  %2667 = vperm.xlu0 %3367, %v2629_v59   ;;  %v2623_v16 = vmul.f32 %v4693_v46, %v2615_v40  ;;  %v3300_v25 = vadd.f32 -1.0, %v2615_v40  ;;  %v3454_v46 = vld [vmem:[%s3924_s22 + $0x8] sm:$0xff]  ;;  %vm723_vm8 = vcmp.eq.s32.totalorder %v4853_v10, %v3458_v38  ;;  %vm731_vm13 = vcmp.eq.s32.totalorder %v4862_v60, %v3458_v38  ;;  %vm5345_vm14 = vmmov %vm5340_vm2 }
 0x932   : > { %vm720_vm3 = vcmp.eq.s32.totalorder %v4853_v10, %v3454_v46  ;;  %vm728_vm10 = vcmp.eq.s32.totalorder %v4862_v60, %v3454_v46  ;;  %v2751_v59 = vmul.f32 1e+30, %v3303_v3  ;;  %v5335_v38 = vld [vmem:[#allocation22_spill] sm:$0xff] }
 0x933   : > { %2688 = vmatpush.msrb.mxu3 %v4799_v63  ;;  %v2748_v47 = vmul.f32 1e+30, %v3300_v25  ;;  %v736_v19 = vsel %vm720_vm3, 0.0, %v3531_v34  ;;  %v739_v63 = vsel %vm723_vm8, 0.0, %v3531_v34  ;;  %v744_v41 = vsel %vm728_vm10, 0.0, %v3531_v34  ;;  %vm5343_vm8 = vmmov %vm5340_vm2 }
 0x934   : > { %vm5344_vm10 = vmmov %vm5340_vm2 }
 0x935   : > { %2689 = vmatpush.msrb.mxu3 %v4834_v61  ;;  %v1653_v61 = vmul.f32 1e+30, %v3219_v28 }
 0x937   : > { %2690 = vmatpush.msrb.mxu3 %v4814_v31  ;;  %v1651_v31 = vmul.f32 1e+30, %v3217_v55 }
 0x938   : > { %1671 = vperm.xlu2 %3369, %v1649_v8   ;;  %2632 = vperm.xlu1 %3368, %v2622_v49   ;;  %v3460_v49 = vld [vmem:[%s3924_s22 + $0x30] sm:$0xff] }
 0x939   : > { %2691 = vmatpush.msrb.mxu3 %v2616_v45  ;;  %2652 = vperm.xlu0 %3367, %v2626_v32   ;;  %v3455_v45 = vld [vmem:[%s3924_s22] sm:$0xff]  ;;  %vm725_vm12 = vcmp.eq.s32.totalorder %v4853_v10, %v3460_v49  ;;  %v740_v32 = vsel %vm724_vm6, 0.0, %v3531_v34  ;;  %vm733_vm15 = vcmp.eq.s32.totalorder %v4862_v60, %v3460_v49  ;;  %vm5348_vm6 = vmmov %vm5340_vm2  ;;  %s3476_s22 = sshra.s32 %s3025_s0, 4  ;;  %s3477_s22 = int_to_ptr.hbm [resolvable:$true] %s3476_s22 }
 0x93a   : > { %vm727_vm9 = vcmp.eq.s32.totalorder %v4862_v60, %v3455_v45  ;;  %vm719_vm0 = vcmp.eq.s32.totalorder %v4853_v10, %v3455_v45  ;;  %v741_v33 = vsel %vm725_vm12, 0.0, %v3531_v34  ;;  %v749_v2 = vsel %vm733_vm15, 0.0, %v3531_v34  ;;  %vm5346_vm12 = vmmov %vm5340_vm2  ;;  %s3478_s2 = scalar_lea.hbm %s3477_s22, 2  ;;  %p3483_p0 = scmp.lt.s32.totalorder %s3477_s22, %s5178_s17 }
 0x93b   : > { %2692 = vmatpush.msrb.mxu3 %v2615_v40  ;;  %v743_v4 = vsel %vm727_vm9, 0.0, %v3531_v34  ;;  %v735_v53 = vsel %vm719_vm0, 0.0, %v3531_v34  ;;  %vm726_vm9 = vcmp.eq.s32.totalorder %v4853_v10, %v3461_v54  ;;  %vm1840_vm0 = vcmp.gt.f32.partialorder %v5333_v0, 0.0  ;;  %p3479_p11 = scmp.ne.s32.totalorder %s3477_s22, %s3478_s2  ;;  %p3484_p1 = scmp.lt.s32.totalorder %s3482_s24, %s3478_s2 }
 0x93d   : > { %2693 = vmatpush.msrb.mxu3 %v2614_v15  ;;  %v3218_v15 = vadd.f32 -1.0, %v4215_v7  ;;  %v747_v7 = vsel %vm731_vm13, 0.0, %v3531_v34  ;;  %vm5347_vm13 = vmmov %vm5340_vm2  ;;  %p3480_p12 = pnand %p3479_p11, %p3660_p5  ;;  %p3485_p2 = por %p3484_p1, %p3483_p0 }
 0x93e   : > { %3297 = vmatmul.msk.f32.vlgmr.msrb.gmra.mxu3 %vm5332_vm7, %v5331_v5 }
 0x93f   : > { %v1652_v22 = vmul.f32 1e+30, %v3218_v15  ;;  %p3481_p13 = pneg %p3480_p12 }
 0x940   : > { %2767 = vperm.xlu2 %3369, %v2749_v29   ;;  %1666 = vperm.xlu1 %3368, %v1648_v50   ;;  %v3305_v29 = vadd.f32 -1.0, %v4807_v44  ;;  %v750_v50 = vsel %vm734_vm1, 0.0, %v3531_v34  ;;  %vm5349_vm1 = vmmov %vm5340_vm2 }
 0x941   : > { %2637 = vperm.xlu0 %3367, %v2623_v16   ;;  %v2754_v16 = vmul.f32 1e+30, %v3306_v35  ;;  %vm5350_vm15 = vmmov %vm5349_vm1  ;;  %p3486_p3 = pnand %p3485_p2, %p3481_p13 }
 0x942   : > { %v2753_v39 = vmul.f32 1e+30, %v3305_v29 }
 0x948   : > { %1676 = vperm.xlu2 %3369, %v1650_v42   ;;  %2762 = vperm.xlu1 %3368, %v2748_v47  }
 0x949   : > { %1661 = vperm.xlu0 %3367, %v1647_v58  }
 0x950   : > { %1709 = vperm.xlu2 %3369, %v736_v19   ;;  %1620 = vperm.xlu1 %3368, %v1617_v20  }
 0x951   : > { %2757 = vperm.xlu0 %3367, %v2747_v9  }
 0x958   : > { %1744 = vperm.xlu2 %3369, %v743_v4   ;;  %1704 = vperm.xlu1 %3368, %v735_v53  }
 0x959   : > { %2772 = vperm.xlu0 %3367, %v2750_v11  }
 0x960   : > { %1759 = vperm.xlu2 %3369, %v746_v23   ;;  %1719 = vperm.xlu1 %3368, %v738_v17  }
 0x961   : > { %1681 = vperm.xlu0 %3367, %v1651_v31  }
 0x968   : > { %2782 = vperm.xlu2 %3369, %v2752_v24   ;;  %1754 = vperm.xlu1 %3368, %v745_v30   ;;  %v5334_v30 = vmov 0  }
 0x969   : > { %1714 = vperm.xlu0 %3367, %v737_v36  }
 0x970   : > { %1724 = vperm.xlu2 %3369, %v739_v63   ;;  %2777 = vperm.xlu1 %3368, %v2751_v59   ;;  %v5336_v59 = vld [vmem:[#allocation20_spill] sm:$0xff] }
 0x971   : > { %1749 = vperm.xlu0 %3367, %v744_v41  }
 0x978   : > { %1769 = vperm.xlu2 %3369, %v748_v6   ;;  %1691 = vperm.xlu1 %3368, %v1653_v61  }
 0x979   : > { %1686 = vperm.xlu0 %3367, %v1652_v22  }
 0x97a   : > { %v2658_v8 = vpop.permute.xlu2 %2657 }
 0x97b   : > { %v4922_v60 = vmul.f32 %v2658_v8, %v4656_v57 }
 0x980   : > { %1734 = vperm.xlu2 %3369, %v741_v33   ;;  %1764 = vperm.xlu1 %3368, %v747_v7   ;;  %v5341_v7 = vld [vmem:[#allocation23_spill] sm:$0xff] }
 0x981   : > { %1729 = vperm.xlu0 %3367, %v740_v32  }
 0x982   : > { %v2643_v40 = vpop.permute.xlu2 %2642 }
 0x983   : > { %v2672_v47 = vmul.f32 %v2643_v40, %v4635_v27 }
 0x988   : > { %1779 = vperm.xlu2 %3369, %v750_v50   ;;  %2792 = vperm.xlu1 %3368, %v2754_v16   ;;  %v5342_v16 = vld [vmem:[#allocation21_spill] sm:$0xff] }
 0x989   : > { %2787 = vperm.xlu0 %3367, %v2753_v39  }
 0x98a   : > { %v4905_v25 = vpop.permute.xlu2 %1656 }
 0x98b   : > { %v1694_v32 = vadd.f32 %v4905_v25, %v5341_v7 }
 0x990   : > { %1774 = vperm.xlu1 %3368, %v749_v2  }
 0x992   : > { %v1672_v42 = vpop.permute.xlu2 %1671 }
 0x993   : > { %v1697_v41 = vadd.f32 %v1672_v42, %v5336_v59 }
 0x99a   : > { %v2768_v62 = vpop.permute.xlu2 %2767  ;;  %v2663_v58 = vpop.permute.xlu1 %2662 }
 0x99b   : > { %v4910_v44 = vadd.f32 %v2768_v62, %v2672_v47  ;;  %v4918_v9 = vmul.f32 %v2663_v58, %v4663_v1 }
 0x9a2   : > { %v2648_v46 = vpop.permute.xlu1 %2647  ;;  %v4915_v20 = vpop.permute.xlu2 %1676 }
 0x9a3   : > { %v2668_v43 = vpop.permute.xlu0 %2667 }
 0x9a4   : > { %v4913_v19 = vmul.f32 %v2668_v43, %v4668_v56  ;;  %v2673_v56 = vmul.f32 %v2648_v46, %v4642_v48 }
 0x9a6   : > { %2706 = vmatpush.msrb.mxu0 %v4913_v19 }
 0x9a8   : > { %2707 = vmatpush.msrb.mxu0 %v4918_v9 }
 0x9aa   : > { %2708 = vmatpush.msrb.mxu0 %v4922_v60  ;;  %v2633_v27 = vpop.permute.xlu1 %2632  ;;  %v1710_v1 = vpop.permute.xlu2 %1709 }
 0x9ab   : > { %v2653_v45 = vpop.permute.xlu0 %2652  ;;  %v2670_v11 = vmul.f32 %v2633_v27, %v4623_v26 }
 0x9ac   : > { %v4927_v37 = vmul.f32 %v2653_v45, %v4649_v21 }
 0x9ae   : > { %2709 = vmatpush.msrb.mxu0 %v4927_v37 }
 0x9b0   : > { %2710 = vmatpush.msrb.mxu0 %v2673_v56 }
 0x9b2   : > { %2711 = vmatpush.msrb.mxu0 %v2672_v47  ;;  %v1667_v4 = vpop.permute.xlu1 %1666  ;;  %v1745_v14 = vpop.permute.xlu2 %1744 }
 0x9b3   : > { %v2638_v53 = vpop.permute.xlu0 %2637  ;;  %v1790_v29 = vadd.f32 %v1745_v14, %v1694_v32  ;;  %v1696_v39 = vadd.f32 %v1667_v4, %v5342_v16 }
 0x9b4   : > { %v2671_v57 = vmul.f32 %v2638_v53, %v4629_v12 }
 0x9b5   : > { %v4969_v25 = vsel %vm5343_vm8, %v1790_v29, -inf }
 0x9b6   : > { %2712 = vmatpush.msrb.mxu0 %v2671_v57 }
 0x9b8   : > { %2713 = vmatpush.msrb.mxu0 %v2670_v11 }
 0x9b9   : > { %3298 = vmatmul.msk.f32.vlgmr.msrb.gmra.mxu0 %vm5332_vm7, %v5331_v5  ;;  %v742_v5 = vsel %vm726_vm9, 0.0, %v3531_v34  ;;  %v1841_v34 = vsel %vm1840_vm0, 1, %v5334_v30  ;;  %vm5351_vm7 = vmmov %vm5349_vm1 }
 0x9ba   : > { %v2763_v21 = vpop.permute.xlu1 %2762  ;;  %v1760_v51 = vpop.permute.xlu2 %1759  ;;  %vm5353_vm9 = vmmov %vm5349_vm1 }
 0x9bb   : > { %v4935_v55 = vadd.f32 %v2763_v21, %v2671_v57  ;;  %v1662_v48 = vpop.permute.xlu0 %1661  ;;  %vm5354_vm0 = vmmov %vm5349_vm1 }
 0x9bc   : > { %v1695_v3 = vadd.f32 %v1662_v48, %v5335_v38  ;;  %vm5363_vm8 = vmmov %vm5354_vm0 }
 0x9bd   : > { %v2804_v18 = vadd.f32 %v4935_v55, %v1710_v1 }
 0x9be   : > { %v1783_v28 = vadd.f32 %v1710_v1, %v1695_v3 }
 0x9bf   : > { %v4950_v8 = vsel %vm5337_vm4, %v2804_v18, -inf  ;;  %vm5355_vm4 = vmmov %vm5354_vm0 }
 0x9c0   : > { %v4953_v49 = vsel %vm5338_vm11, %v1783_v28, -inf  ;;  %vm5356_vm11 = vmmov %vm5354_vm0 }
 0x9c1   : > { %v2695_v23 = vpop.f32.mrf.mxu3 }
 0x9c2   : > { %v2718_v17 = vmax.f32 %v2695_v23, 1.0  ;;  %vm2861_vm3 = vcmp.gt.f32.partialorder %v2695_v23, 0.0  ;;  %v4937_v31 = vpop.permute.xlu1 %1620  ;;  %v2783_v63 = vpop.permute.xlu2 %2782 }
 0x9c3   : > { %v2758_v52 = vpop.permute.xlu0 %2757  ;;  %v2862_v26 = vsel %vm2861_vm3, 1, %v5334_v30  ;;  %vm5352_vm3 = vmmov %vm5349_vm1  ;;  %3442 = vrcp.f32 %v4937_v31 }
 0x9c4   : > { %v2795_v12 = vadd.f32 %v2758_v52, %v2670_v11  ;;  %2721 = vperm.xlu0 %3367, %v2718_v17   ;;  %2864 = vperm.xlu1 %3368, %v2862_v26   ;;  %v1793_v17 = vadd.f32 %v1760_v51, %v1697_v41  ;;  %v2800_v52 = vadd.f32 %v2783_v63, %v4922_v60 }
 0x9c6   : > { %v2811_v50 = vadd.f32 %v2795_v12, %v1745_v14  ;;  %v1823_v18 = vsel %vm5351_vm7, %v1793_v17, -inf }
 0x9c8   : > { %v2840_v43 = vsel %vm5344_vm10, %v2811_v50, -inf  ;;  %vm5364_vm10 = vmmov %vm5354_vm0 }
 0x9ca   : > { %v1705_v24 = vpop.permute.xlu1 %1704  ;;  %v4964_v35 = vpop.permute.xlu2 %1724 }
 0x9cb   : > { %v2773_v36 = vpop.permute.xlu0 %2772  ;;  %v1782_v2 = vadd.f32 %v1705_v24, %v1694_v32  ;;  %v2803_v42 = vadd.f32 %v2795_v12, %v1705_v24 }
 0x9cc   : > { %1739 = vperm.xlu0 %3367, %v742_v5   ;;  %v2798_v15 = vadd.f32 %v2773_v36, %v2673_v56 }
 0x9cd   : > { %v4974_v56 = vsel %vm5345_vm14, %v1782_v2, -inf  ;;  %v2819_v1 = vsel %vm5346_vm12, %v2803_v42, -inf  ;;  %vm5365_vm14 = vmmov %vm5354_vm0 }
 0x9ce   : > { %v2814_v12 = vadd.f32 %v2798_v15, %v1760_v51  ;;  %vm5366_vm12 = vmmov %vm5354_vm0 }
 0x9d0   : > { %v2844_v28 = vsel %vm5352_vm3, %v2814_v12, -inf  ;;  %vm5371_vm3 = vmmov %vm5354_vm0 }
 0x9d2   : > { %v1720_v6 = vpop.permute.xlu1 %1719  ;;  %v1770_v23 = vpop.permute.xlu2 %1769 }
 0x9d3   : > { %v1785_v61 = vadd.f32 %v1720_v6, %v1697_v41  ;;  %v2806_v22 = vadd.f32 %v2798_v15, %v1720_v6  ;;  %v4946_v10 = vpop.permute.xlu0 %1681  ;;  %v2816_v24 = vadd.f32 %v2800_v52, %v1770_v23 }
 0x9d4   : > { %1843 = vperm.xlu0 %3367, %v1841_v34  }
 0x9d5   : > { %v4956_v0 = vsel %vm5339_vm5, %v1785_v61, -inf  ;;  %v2823_v33 = vsel %vm5340_vm2, %v2806_v22, -inf  ;;  %vm5357_vm5 = vmmov %vm5354_vm0 }
 0x9d6   : > { %v1803_v40 = vmax.f32 %v4953_v49, %v4956_v0  ;;  %v2824_v54 = vmax.f32 %v4950_v8, %v2823_v33  ;;  %vm5358_vm2 = vmmov %vm5354_vm0 }
 0x9da   : > { %v1755_v47 = vpop.permute.xlu1 %1754  ;;  %v1735_v33 = vpop.permute.xlu2 %1734 }
 0x9db   : > { %v1792_v62 = vadd.f32 %v1755_v47, %v1696_v39  ;;  %v2813_v58 = vadd.f32 %v4910_v44, %v1755_v47  ;;  %v1715_v46 = vpop.permute.xlu0 %1714  ;;  %v5360_v47 = vld [vmem:[#allocation19_spill] sm:$0xff] }
 0x9dc   : > { %v1784_v27 = vadd.f32 %v1715_v46, %v1696_v39  ;;  %v2805_v45 = vadd.f32 %v4910_v44, %v1715_v46  ;;  %v5359_v39 = vld [vmem:[#allocation18_spill] sm:$0xff] }
 0x9dd   : > { %v1821_v4 = vsel %vm5347_vm13, %v1792_v62, -inf  ;;  %v2842_v53 = vsel %vm5348_vm6, %v2813_v58, -inf  ;;  %v1699_v2 = vadd.f32 %v4946_v10, %v5359_v39  ;;  %v1698_v62 = vadd.f32 %v4915_v20, %v5360_v47  ;;  %v5361_v58 = vld [vmem:[#allocation16_spill] sm:$0xff]  ;;  %vm5367_vm13 = vmmov %vm5354_vm0  ;;  %v2874_v39 = vld [vmem:[%s5171_s10] sm:$0xff] }
 0x9de   : > { %v1822_v57 = vmax.f32 %v4969_v25, %v1821_v4  ;;  %v2843_v11 = vmax.f32 %v2840_v43, %v2842_v53  ;;  %v4981_v14 = vsel %vm5349_vm1, %v1784_v27, -inf  ;;  %v2821_v21 = vsel %vm5350_vm15, %v2805_v45, -inf  ;;  %v5362_v53 = vld [vmem:[#allocation17_spill] sm:$0xff]  ;;  %vm5368_vm6 = vmmov %vm5354_vm0 }
 0x9df   : > { %v1801_v44 = vmax.f32 %v4974_v56, %v4981_v14  ;;  %v2822_v48 = vmax.f32 %v2819_v1, %v2821_v21  ;;  %v1795_v27 = vadd.f32 %v1770_v23, %v1699_v2  ;;  %v1632_v47 = vand.u32 2147483647, %v4937_v31 }
 0x9e0   : > { %vm1628_vm15 = vweird.f32 %v4937_v31 }
 0x9e1   : > { %v1827_v21 = vsel %vm5364_vm10, %v1795_v27, -inf }
 0x9e2   : > { %v2778_v30 = vpop.permute.xlu1 %2777  ;;  %v1780_v45 = vpop.permute.xlu2 %1779 }
 0x9e3   : > { %v2799_v26 = vadd.f32 %v2778_v30, %v4927_v37  ;;  %v1750_v5 = vpop.permute.xlu0 %1749  ;;  %v2848_v37 = vsel %vm5356_vm11, %v2816_v24, -inf  ;;  %vm5076_vm11 = vcmp.eq.f32.partialorder %v1632_v47, 8.507059e+37 }
 0x9e4   : > { %v1791_v36 = vadd.f32 %v1750_v5, %v1695_v3  ;;  %v2812_v38 = vadd.f32 %v4935_v55, %v1750_v5 }
 0x9e5   : > { %v2807_v59 = vadd.f32 %v2799_v26, %v4964_v35 }
 0x9e6   : > { %v1820_v6 = vsel %vm5353_vm9, %v1791_v36, -inf  ;;  %v2841_v41 = vsel %vm5354_vm0, %v2812_v38, -inf  ;;  %vm5372_vm9 = vmmov %vm5354_vm0 }
 0x9e7   : > { %v2825_v60 = vsel %vm5355_vm4, %v2807_v59, -inf  ;;  %v1824_v51 = vmax.f32 %v1820_v6, %v1823_v18  ;;  %v2845_v63 = vmax.f32 %v2841_v41, %v2844_v28  ;;  %v5023_v28 = vpop.eup %3442  ;;  %v2881_v6 = vld [vmem:[%s5172_s11 + $0x18] sm:$0xff]  ;;  %vm5373_vm4 = vmmov %vm5354_vm0 }
 0x9e8   : > { %v4996_v15 = vmax.f32 %v2822_v48, %v2825_v60  ;;  %2897 = vmatpush.msra.mxu3 %v2881_v6  ;;  %v2880_v60 = vld [vmem:[%s5172_s11 + $0x10] sm:$0xff]  ;;  %vm1629_vm1 = vweird.f32 %v5023_v28 }
 0x9e9   : > { %v2849_v3 = vmax.f32 %v2845_v63, %v2848_v37  ;;  %v1828_v12 = vmax.f32 %v1824_v51, %v1827_v21  ;;  %v2879_v51 = vld [vmem:[%s5172_s11 + $0x8] sm:$0xff]  ;;  %v2877_v63 = vld [vmem:[%s5171_s10 + $0x18] sm:$0xff]  ;;  %v2876_v37 = vld [vmem:[%s5171_s10 + $0x10] sm:$0xff] }
 0x9ea   : > { %v1692_v55 = vpop.permute.xlu1 %1691  ;;  %2898 = vmatpush.msra.mxu3 %v2880_v60  ;;  %2920 = vmatpush.msra.mxu0 %v2877_v63  ;;  %vm5061_vm7 = vmor %vm1628_vm15, %vm1629_vm1 }
 0x9eb   : > { %v1687_v61 = vpop.permute.xlu0 %1686  ;;  %v5007_v46 = vadd.f32 %v1692_v55, %v5361_v58 }
 0x9ec   : > { %v1700_v10 = vadd.f32 %v1687_v61, %v5362_v53  ;;  %v2878_v61 = vld [vmem:[%s5172_s11] sm:$0xff]  ;;  %2899 = vmatpush.msra.mxu3 %v2879_v51  ;;  %2921 = vmatpush.msra.mxu0 %v2876_v37  ;;  %v2967_v53 = vld [vmem:[%s5176_s15 + $0x8] sm:$0xff] }
 0x9ee   : > { %2900 = vmatpush.msra.mxu3 %v2878_v61 }
 0x9f2   : > { %v1765_v22 = vpop.permute.xlu1 %1764 }
 0x9f3   : > { %v2815_v34 = vadd.f32 %v2799_v26, %v1765_v22  ;;  %v1730_v8 = vpop.permute.xlu0 %1729  ;;  %v1794_v43 = vadd.f32 %v1765_v22, %v1698_v62  ;;  %v2875_v22 = vld [vmem:[%s5171_s10 + $0x8] sm:$0xff] }
 0x9f4   : > { %v2808_v7 = vadd.f32 %v2800_v52, %v1730_v8  ;;  %2922 = vmatpush.msra.mxu0 %v2875_v22 }
 0x9f5   : > { %v2846_v32 = vsel %vm5357_vm5, %v2815_v34, -inf  ;;  %v1634_v34 = vand.u32 2147483648, %v4937_v31  ;;  %vm5376_vm5 = vmmov %vm5354_vm0 }
 0x9f6   : > { %v2847_v29 = vmax.f32 %v2843_v11, %v2846_v32  ;;  %v2827_v50 = vsel %vm5358_vm2, %v2808_v7, -inf  ;;  %v1825_v11 = vsel %vm5363_vm8, %v1794_v43, -inf  ;;  %v1786_v7 = vadd.f32 %v4964_v35, %v1698_v62  ;;  %2923 = vmatpush.msra.mxu0 %v2874_v39  ;;  %vm5377_vm2 = vmmov %vm5354_vm0 }
 0x9f7   : > { %v5000_v16 = vmax.f32 %v2824_v54, %v2827_v50  ;;  %v1797_v54 = vadd.f32 %v1780_v45, %v5007_v46  ;;  %v1826_v30 = vmax.f32 %v1822_v57, %v1825_v11  ;;  %v1624_v57 = vmul.f32 %v5023_v28, %v4937_v31 }
 0x9f8   : > { %v1788_v32 = vadd.f32 %v1735_v33, %v1700_v10  ;;  %v1635_v35 = vor.u32 1.1754944e-38, %v1634_v34  ;;  %2989 = vmatpush.msrb.mxu0 %v2967_v53 }
 0x9f9   : > { %v1625_v41 = vsub.f32 1.0, %v1624_v57 }
 0x9fa   : > { %v2793_v42 = vpop.permute.xlu1 %2792  ;;  %v1808_v62 = vsel %vm5372_vm9, %v1788_v32, -inf  ;;  %vm5381_vm9 = vcmask 130048  }
 0x9fb   : > { %v5010_v25 = vadd.f32 %v2793_v42, %v4913_v19  ;;  %v2788_v1 = vpop.permute.xlu0 %2787  ;;  %v1831_v19 = vsel %vm5365_vm14, %v1797_v54, -inf }
 0x9fc   : > { %v2801_v20 = vadd.f32 %v2788_v1, %v4918_v9  ;;  %v1832_v24 = vmax.f32 %v1828_v12, %v1831_v19 }
 0x9fd   : > { %v2818_v4 = vadd.f32 %v5010_v25, %v1780_v45 }
 0x9fe   : > { %v2809_v50 = vadd.f32 %v2801_v20, %v1735_v33  ;;  %v2936_v33 = vld [vmem:[%s5174_s13 + $0x10] sm:$0xff] }
 0x9ff   : > { %v2852_v17 = vsel %vm5366_vm12, %v2818_v4, -inf }
 0xa00   : > { %v2853_v36 = vmax.f32 %v2849_v3, %v2852_v17  ;;  %v1626_v3 = vmul.f32 %v5023_v28, %v1625_v41  ;;  %v2829_v45 = vsel %vm5373_vm4, %v2809_v50, -inf }
 0xa01   : > { %v2830_v14 = vmax.f32 %v4996_v15, %v2829_v45 }
 0xa02   : > { %v1775_v48 = vpop.permute.xlu1 %1774  ;;  %v1627_v42 = vadd.f32 %v5023_v28, %v1626_v3 }
 0xa03   : > { %v1796_v23 = vadd.f32 %v1775_v48, %v1700_v10  ;;  %v2817_v52 = vadd.f32 %v2801_v20, %v1775_v48 }
 0xa04   : > { %v1631_v4 = vsel %vm5061_vm7, %v5023_v28, %v1627_v42  ;;  %vm5379_vm7 = vmmov %vm5354_vm0 }
 0xa05   : > { %v1829_v26 = vsel %vm5367_vm13, %v1796_v23, -inf  ;;  %v2850_v5 = vsel %vm5368_vm6, %v2817_v52, -inf  ;;  %v1636_v49 = vsel %vm5076_vm11, %v1635_v35, %v1631_v4  ;;  %vm5378_vm13 = vmmov %vm5354_vm0  ;;  %vm1848_vm6 = vcmask 1041409  }
 0xa06   : > { %v1830_v38 = vmax.f32 %v1826_v30, %v1829_v26  ;;  %v2851_v59 = vmax.f32 %v2847_v29, %v2850_v5  ;;  %v1787_v29 = vadd.f32 %v1730_v8, %v1699_v2  ;;  %v1804_v2 = vsel %vm5371_vm3, %v1786_v7, -inf  ;;  %vm5380_vm3 = vmmov %vm5354_vm0 }
 0xa07   : > { %v1805_v1 = vmax.f32 %v1801_v44, %v1804_v2  ;;  %v2935_v2 = vld [vmem:[%s5174_s13 + $0x8] sm:$0xff] }
 0xa08   : > { %v1833_v9 = vmax.f32 %v1830_v38, %v1832_v24  ;;  %v2854_v18 = vmax.f32 %v2851_v59, %v2853_v36  ;;  %v1806_v27 = vsel %vm5354_vm0, %v1787_v29, -inf  ;;  %vm2995_vm0 = vcmask 9216  }
 0xa09   : > { %v1809_v48 = vmax.f32 %v1805_v1, %v1808_v62  ;;  %v1807_v56 = vmax.f32 %v1803_v40, %v1806_v27  ;;  %v2934_v62 = vld [vmem:[%s5174_s13] sm:$0xff] }
 0xa0a   : > { %v1834_v58 = vrot.slane %v1833_v9, 4  ;;  %v2855_v43 = vrot.slane %v2854_v18, 4  ;;  %v3375_v27 = vld [vmem:[%s5173_s12] ss:$0 sm:$0xff] }
 0xa0c   : > { %v1835_v10 = vmax.f32 %v1833_v9, %v1834_v58  ;;  %v2856_v11 = vmax.f32 %v2854_v18, %v2855_v43  ;;  %v1637_v9 = vmul.f32 %v1636_v49, %v4557_v13 }
 0xa0e   : > { %v1836_v30 = vrot.slane %v1835_v10, 2  ;;  %v2857_v26 = vrot.slane %v2856_v11, 2 }
 0xa10   : > { %v1837_v57 = vmax.f32 %v1835_v10, %v1836_v30  ;;  %v2966_v10 = vld [vmem:[%s5176_s15] sm:$0xff] }
 0xa11   : > { %2990 = vmatpush.msrb.mxu0 %v2966_v10 }
 0xa36   : > { %v5043_v55 = vpop.permute.xlu0 %2721  ;;  %v2715_v5 = vpop.f32.mrf.mxu0 }
 0xa37   : > { %3444 = vrcp.f32 %v5043_v55  ;;  %v2733_v23 = vand.u32 2147483647, %v5043_v55  ;;  %v2735_v52 = vand.u32 2147483648, %v5043_v55  ;;  %vm2729_vm10 = vweird.f32 %v5043_v55  ;;  %v2865_v7 = vpop.permute.xlu1 %2864 }
 0xa38   : > { %vm2866_vm1 = vcmp.eq.s32.totalorder %v2865_v7, 1 }
 0xa39   : > { %v2736_v24 = vor.u32 1.1754944e-38, %v2735_v52  ;;  %vm2734_vm12 = vcmp.eq.f32.partialorder %v2733_v23, 8.507059e+37 }
 0xa3d   : > { %v3445_v8 = vpop.eup %3444 }
 0xa3e   : > { %v2725_v31 = vmul.f32 %v3445_v8, %v5043_v55  ;;  %v1740_v54 = vpop.permute.xlu0 %1739  ;;  %vm2730_vm8 = vweird.f32 %v3445_v8  ;;  %v1838_v55 = vrot.slane %v1837_v57, 1 }
 0xa3f   : > { %v1789_v20 = vadd.f32 %v1740_v54, %v5007_v46  ;;  %v2810_v21 = vadd.f32 %v5010_v25, %v1740_v54  ;;  %vm2731_vm14 = vmor %vm2729_vm10, %vm2730_vm8 }
 0xa40   : > { %v2726_v44 = vsub.f32 1.0, %v2725_v31  ;;  %v1839_v29 = vmax.f32 %v1837_v57, %v1838_v55 }
 0xa41   : > { %v1810_v19 = vsel %vm5376_vm5, %v1789_v20, -inf  ;;  %v2831_v17 = vsel %vm5377_vm2, %v2810_v21, -inf }
 0xa42   : > { %v1811_v12 = vmax.f32 %v1807_v56, %v1810_v19  ;;  %v2832_v46 = vmax.f32 %v5000_v16, %v2831_v17  ;;  %v2727_v25 = vmul.f32 %v3445_v8, %v2726_v44  ;;  %v2858_v16 = vmax.f32 %v2856_v11, %v2857_v26  ;;  %v3376_v11 = vld [vmem:[%s5175_s14] ss:$0 sm:$0xff] }
 0xa43   : > { %v3377_v56 = vld [vmem:[%s5177_s16] ss:$0 sm:$0xff] }
 0xa44   : > { %v1812_v0 = vmax.f32 %v1809_v48, %v1811_v12  ;;  %v2833_v40 = vmax.f32 %v2830_v14, %v2832_v46  ;;  %v2728_v15 = vadd.f32 %v3445_v8, %v2727_v25  ;;  %v2859_v61 = vrot.slane %v2858_v16, 1 }
 0xa46   : > { %v1813_v36 = vrot.slane %v1812_v0, 4  ;;  %v2834_v38 = vrot.slane %v2833_v40, 4  ;;  %v2732_v59 = vsel %vm2731_vm14, %v3445_v8, %v2728_v15  ;;  %v1844_v32 = vpop.permute.xlu0 %1843  ;;  %v2860_v39 = vmax.f32 %v2858_v16, %v2859_v61  ;;  %v2937_v8 = vld [vmem:[%s5174_s13 + $0x18] sm:$0xff] }
 0xa47   : > { %v2737_v18 = vsel %vm2734_vm12, %v2736_v24, %v2732_v59  ;;  %vm1845_vm15 = vcmp.eq.s32.totalorder %v1844_v32, 1  ;;  %2957 = vmatpush.msrb.mxu3 %v2937_v8 }
 0xa48   : > { %v1814_v28 = vmax.f32 %v1812_v0, %v1813_v36  ;;  %v2835_v6 = vmax.f32 %v2833_v40, %v2834_v38  ;;  %v2738_v41 = vmul.f32 %v2737_v18, %v2715_v5 }
 0xa49   : > { %2958 = vmatpush.msrb.mxu3 %v2936_v33 }
 0xa4a   : > { %v1815_v60 = vrot.slane %v1814_v28, 2  ;;  %v2836_v51 = vrot.slane %v2835_v6, 2  ;;  %v2873_v63 = vadd.f32 %v2738_v41, %v1637_v9 }
 0xa4b   : > { %2959 = vmatpush.msrb.mxu3 %v2935_v2 }
 0xa4c   : > { %v2837_v37 = vmax.f32 %v2835_v6, %v2836_v51  ;;  %v1816_v3 = vmax.f32 %v1814_v28, %v1815_v60  ;;  %3307 = vmatmul.msk.f32.vlgmr.msra.gmra.mxu3 %vm5378_vm13, %v2873_v63 }
 0xa4d   : > { %2960 = vmatpush.msrb.mxu3 %v2934_v62 }
 0xa4e   : > { %v1817_v22 = vrot.slane %v1816_v3, 1  ;;  %v2838_v34 = vrot.slane %v2837_v37, 1 }
 0xa50   : > { %v1818_v13 = vmax.f32 %v1816_v3, %v1817_v22  ;;  %v2839_v50 = vmax.f32 %v2837_v37, %v2838_v34 }
 0xa52   : > { %v1849_v42 = vsel %vm1848_vm6, %v1839_v29, %v1818_v13  ;;  %v2869_v47 = vsel %vm1848_vm6, %v2860_v39, %v2839_v50 }
 0xa53   : > { %v2871_v58 = vsel %vm2866_vm1, %v2869_v47, 0.0  ;;  %v1851_v43 = vsel %vm1845_vm15, %v1849_v42, 0.0 }
 0xa54   : > { %v2872_v35 = vadd.f32 %v2871_v58, %v1851_v43 }
 0xa56   : > { %3308 = vmatmul.msk.f32.vlgmr.msra.gmra.mxu0 %vm5379_vm7, %v2872_v35 }
 0xacf   : > { %v2902_v45 = vpop.f32.mrf.mxu3 }
 0xad3   : > { %v2925_v1 = vpop.f32.mrf.mxu0 }
 0xad4   : > { %v2926_v31 = vadd.f32 %v2925_v1, %v2902_v45 }
 0xad6   : > { %v2932_v54 = vadd.f32 %v3375_v27, %v2926_v31 }
 0xad8   : > { %v2933_v4 = vmax.f32 %v2932_v54, 0.0 }
 0xada   : > { %3309 = vmatmul.msk.f32.vlgmr.msrb.gmra.mxu3 %vm5380_vm3, %v2933_v4 }
 0xb5d   : > { %v2962_v20 = vpop.f32.mrf.mxu3 }
 0xb5e   : > { %v2963_v21 = vadd.f32 %v3376_v11, %v2962_v20 }
 0xb60   : > { %v2965_v48 = vmax.f32 %v2963_v21, 0.0 }
 0xb62   : > { %3310 = vmatmul.msk.f32.vlgmr.msrb.gmra.mxu0 %vm5381_vm9, %v2965_v48 }
 0xbdf   : > { %v2992_v14 = vpop.f32.mrf.mxu0 }
 0xbe0   : > { %v2993_v44 = vadd.f32 %v3377_v56, %v2992_v14 }
 0xbe2   : > { %v2996_v19 = vsel %vm2995_vm0, %v2993_v44, -inf }
 0xbe3   : > { %2997 = vmax.xlane.f32.xlu2 %v2996_v19 }
 0xc56   : > { %v2998_v17 = vpop.xlane.xlu2 %2997 }
 0xc57   : > { %v2999_v23 = vsub.f32 %v2993_v44, %v2998_v17 }
 0xc59   : > { %v3000_v52 = vmul.f32 1.442695, %v2999_v23 }
 0xc5b   : > { %3446 = vpow2.f32 %v3000_v52 }
 0xc61   : > { %v3447_v12 = vpop.eup %3446 }
 0xc62   : > { %v3002_v46 = vsel %vm2995_vm0, %v3447_v12, 0.0 }
 0xc63   : > { %3003 = vadd.xlane.f32.xlu0 %v3002_v46 }
 0xcd6   : > { %v3004_v25 = vpop.xlane.xlu0 %3003 }
 0xcd7   : > { %3448 = vlog2.f32 %v3004_v25 }
 0xcdd   : > { %v3449_v30 = vpop.eup %3448 }
 0xcde   : > { %v3006_v26 = vmul.f32 0.6931472, %v3449_v30 }
 0xce0   : > { %v3007_v49 = vsub.f32 %v2999_v23, %v3006_v26 }
 0xce2   : > { %3008 = vst.msk [vmem:[%s582_s23] sm:$0x3] %vm2995_vm0, %v3007_v49 }
 0xce3   : > { %3489 = shalt.err (!%p3486_p3)
}
 0xce4   : > { %3322 = dma.vmem_to_hbm [thread:$0]  (%p3660_p5), %s3023_s30, 32, %s3025_s0, %s3010_s21  }
 0xce5 PF: > { %s5382_s18 = sld [smem:[#allocation5_spill]]  ;;  %p3328_p4 = scmp.ge.s32.totalorder %s3524_s27, 2 }
 0xce7   : > { %p3325_p7 = pnand %p3328_p4, %p3664_p6 }
 0xce9   : > { %p3326_p8 = pneg %p3325_p7 }
 0xceb   : > { %s3036_s23 = sand.u32 1, %s5382_s18  }
 0xcec   : > { %s3037_s28 = scalar_lea.sflag [#allocation3], %s3036_s23 }
 0xced   : > { %3507 = dma.done.wait (%p3326_p8), %s3037_s28, 32  }
 0xcee   : > { %3509 = vsyncadd (%p3326_p8), %s3037_s28, 4294967264  ;;  %s5384_s27 = sld [smem:[#allocation7_spill]]  ;;  %s5387_s24 = smov %s3516_s25 }
 0xcef   : > { %s5385_s2 = sld [smem:[#allocation6_spill]] }
 0xcf0   : > { %s5386_s26 = sld [smem:[#allocation8_spill]] }
 0xcf4   : > { %p27_p9 = scmp.ge.s32.totalorder %s5384_s27, 4  }
 0xcf5   : > { %s5388_s25 = smov %s5385_s2 }
 0xcf6   :  { %29 = sbr.rel (!%p27_p9) target bundleno = 7 (0x7), region = 133 }
 0xcfb   :  { %3043 = vsyncpa [#allocation3], 1 }
 0xcfc   :  { %3045 = vsyncpa [#allocation3 + $0x1], 1 }

</bundles_post_ra>
